<compile_context>
chip_gen: v7x
topology: tpu7x:2x2x1
jax: 0.10.0
libtpu: 0.0.40
codegen_flags: <defaults>
</compile_context>

<pallas_src>
import functools
import math

import jax
import jax.numpy as jnp
from jax.experimental import pallas as pl
from jax.experimental.pallas import tpu as pltpu


# ----------------------------------------------------------------------------
# Fused forward kernel: single program, whole network.
# ----------------------------------------------------------------------------
def network_kernel(*refs, n_emb, n_cls, n_enc, n_heads, batch, seq, ln_eps):
    it = iter(refs)
    x_ref, pe_ref = next(it), next(it)
    emb = [(next(it), next(it)) for _ in range(n_emb)]
    wq_ref, bq_ref = next(it), next(it)
    wk_ref, bk_ref = next(it), next(it)
    wv_ref, bv_ref = next(it), next(it)
    wo_ref, bo_ref = next(it), next(it)
    ln1g_ref, ln1b_ref = next(it), next(it)
    fw1_ref, fb1_ref = next(it), next(it)
    fw2_ref, fb2_ref = next(it), next(it)
    ln2g_ref, ln2b_ref = next(it), next(it)
    cls = [(next(it), next(it)) for _ in range(n_cls)]
    o_ref = next(it)

    N = batch * seq
    bf16 = jnp.bfloat16

    def dot32(a, w):
        # bf16 operands on the MXU, f32 accumulation.
        return jnp.dot(a.astype(bf16), w, preferred_element_type=jnp.float32)

    def feed_forward(z, layers):
        n = len(layers)
        for i, (w_ref, b_ref) in enumerate(layers):
            z = dot32(z, w_ref[...]) + b_ref[...]
            if i < n - 1:
                z = jnp.maximum(z, 0.0)
        return z

    def layer_norm(z, g, b):
        mu = jnp.mean(z, axis=-1, keepdims=True)
        var = jnp.mean(z * z, axis=-1, keepdims=True) - mu * mu   # one-pass
        return (z - mu) * jax.lax.rsqrt(var + ln_eps) * g + b

    # ---- embedding FeedForward + positional encoding (dropout = 0) ---------
    h = feed_forward(x_ref[...], emb) + pe_ref[...]        # (B*S, D) f32
    D = h.shape[-1]
    hd = D // n_heads
    scale = 1.0 / math.sqrt(hd)

    for l in range(n_enc):                                 # static unroll
        # ---- multi-head self-attention (head-major weights, no slicing) ----
        h_bf = h.astype(bf16)
        attn = jnp.zeros((N, D), jnp.float32)
        for hh in range(n_heads):                          # static unroll
            idx = l * n_heads + hh
            q = dot32(h_bf, wq_ref[idx]) + bq_ref[idx]     # (B*S, hd)
            k = dot32(h_bf, wk_ref[idx]) + bk_ref[idx]
            v = dot32(h_bf, wv_ref[idx]) + bv_ref[idx]
            qb = (q * scale).reshape(batch, seq, hd).astype(bf16)
            kb = k.reshape(batch, seq, hd).astype(bf16)
            vb = v.reshape(batch, seq, hd).astype(bf16)
            s = jnp.einsum("bqd,bkd->bqk", qb, kb,
                           preferred_element_type=jnp.float32)      # (B,S,S)
            s = s - jnp.max(s, axis=-1, keepdims=True)
            p = jnp.exp(s)
            p = p * pl.reciprocal(jnp.sum(p, axis=-1, keepdims=True),
                                  approx=True)
            ctx = jnp.einsum("bqk,bkd->bqd", p.astype(bf16), vb,
                             preferred_element_type=jnp.float32)    # (B,S,hd)
            # head-concat fused into the output projection (per-head wo acc).
            attn = attn + dot32(ctx.reshape(N, hd), wo_ref[idx])
        attn = attn + bo_ref[l]

        # ---- post-norm residual 1 ------------------------------------------
        h = layer_norm(h + attn, ln1g_ref[l], ln1b_ref[l])

        # ---- FFN (hidden = 4*d_att, ReLU) ------------------------------------
        ff = jnp.maximum(dot32(h, fw1_ref[l]) + fb1_ref[l], 0.0)
        ff = dot32(ff, fw2_ref[l]) + fb2_ref[l]

        # ---- post-norm residual 2 --------------------------------------------
        h = layer_norm(h + ff, ln2g_ref[l], ln2b_ref[l])

    # ---- classifier + softmax (padded cols carry -1e30 bias -> prob 0) ------
    c = feed_forward(h, cls)                               # (B*S, 128)
    c = c - jnp.max(c, axis=-1, keepdims=True)
    e = jnp.exp(c)
    # exact division for the returned probabilities (strict sum-to-1).
    o_ref[...] = (e / jnp.sum(e, axis=-1, keepdims=True)).astype(o_ref.dtype)


# ----------------------------------------------------------------------------
# Wrapper: single pallas_call, whole arrays resident in VMEM.
# ----------------------------------------------------------------------------
def network_forward(x, params, n_heads, ln_eps=1e-5):
    B, S, d_in = x.shape
    pe = params["pe"]                           # (S, D) f32
    enc = params["encoders"]
    emb_layers = params["embedding"]
    cls_layers = params["classifier"]
    out_dim = params["out_dim"]
    pad_out = cls_layers[-1][0].shape[-1]       # lane-padded classifier width
    n_enc = enc["ln1_g"].shape[0]

    flat = [x.reshape(B * S, d_in).astype(jnp.float32),
            jnp.tile(pe, (B, 1))]               # (B*S, D) positional encoding
    for w_, b_ in emb_layers:
        flat += [w_, b_]
    flat += [enc["wq"], enc["bq"], enc["wk"], enc["bk"], enc["wv"], enc["bv"],
             enc["wo"], enc["bo"], enc["ln1_g"], enc["ln1_b"],
             enc["ff_w1"], enc["ff_b1"], enc["ff_w2"], enc["ff_b2"],
             enc["ln2_g"], enc["ln2_b"]]
    for w_, b_ in cls_layers:
        flat += [w_, b_]

    kernel = functools.partial(
        network_kernel,
        n_emb=len(emb_layers), n_cls=len(cls_layers), n_enc=n_enc,
        n_heads=n_heads, batch=B, seq=S, ln_eps=ln_eps)

    vmem_spec = pl.BlockSpec(memory_space=pltpu.MemorySpace.VMEM)
    # TODO(synk): for large B, tile the batch over a 'parallel' grid axis
    #             (coarse B-tiles) to use both TensorCores on v7x.
    out = pl.pallas_call(
        kernel,
        out_shape=jax.ShapeDtypeStruct((B * S, pad_out), jnp.float32),
        in_specs=[vmem_spec] * len(flat),
        out_specs=vmem_spec,
    )(*flat)
    return out[:, :out_dim].reshape(B, S, out_dim)


# ----------------------------------------------------------------------------
# Parameter construction (deterministic, synthetic weights)
# ----------------------------------------------------------------------------
def sinusoidal_pe(max_len, d):
    pos = jnp.arange(max_len, dtype=jnp.float32)[:, None]
    div = jnp.exp(jnp.arange(0, d, 2, dtype=jnp.float32) * (-math.log(10000.0) / d))
    pe = jnp.zeros((max_len, d), jnp.float32)
    pe = pe.at[:, 0::2].set(jnp.sin(pos * div))
    pe = pe.at[:, 1::2].set(jnp.cos(pos * div))
    return pe                                    # (max_len, d)


def init_params(key, n_encoder, len_in, d_in, d_att, n_heads, widths):
    keys = iter(jax.random.split(key, 128))
    bf16 = jnp.bfloat16

    def w(shape, scale=0.05):
        # matmul weights stored directly in bf16 (MXU-native on v6e/v7x).
        return (jax.random.normal(next(keys), shape, jnp.float32) * scale).astype(bf16)

    def ff_layers(d0, d1, pad_to=None):
        dims = [d0] + list(widths) + [d1]
        layers = []
        for i in range(len(dims) - 1):
            layers.append([w((dims[i], dims[i + 1])),
                           jnp.zeros((1, dims[i + 1]), jnp.float32)])
        if pad_to is not None and pad_to > dims[-1]:
            # lane-dense output: zero weight columns, -1e30 bias => softmax 0.
            wi, bi = layers[-1]
            pad = pad_to - dims[-1]
            wi = jnp.pad(wi, ((0, 0), (0, pad)))
            bi = jnp.concatenate(
                [bi, jnp.full((1, pad), -1e30, jnp.float32)], axis=-1)
            layers[-1] = [wi, bi]
        return [tuple(t) for t in layers]

    hd = d_att // n_heads
    d_ff = 4 * d_att            # TODO(synk): FFN hidden width assumed 4*d_att
    LH = n_encoder * n_heads
    out_dim = len_in + 1
    pad_out = max(128, ((out_dim + 127) // 128) * 128)

    encoders = {
        # head-major Q/K/V/O weights: (n_enc*H, D, hd) / (n_enc*H, hd, D).
        "wq": w((LH, d_att, hd)), "bq": jnp.zeros((LH, 1, hd), jnp.float32),
        "wk": w((LH, d_att, hd)), "bk": jnp.zeros((LH, 1, hd), jnp.float32),
        "wv": w((LH, d_att, hd)), "bv": jnp.zeros((LH, 1, hd), jnp.float32),
        "wo": w((LH, hd, d_att)), "bo": jnp.zeros((n_encoder, 1, d_att), jnp.float32),
        "ln1_g": jnp.ones((n_encoder, 1, d_att), jnp.float32),
        "ln1_b": jnp.zeros((n_encoder, 1, d_att), jnp.float32),
        "ff_w1": w((n_encoder, d_att, d_ff)),
        "ff_b1": jnp.zeros((n_encoder, 1, d_ff), jnp.float32),
        "ff_w2": w((n_encoder, d_ff, d_att)),
        "ff_b2": jnp.zeros((n_encoder, 1, d_att), jnp.float32),
        "ln2_g": jnp.ones((n_encoder, 1, d_att), jnp.float32),
        "ln2_b": jnp.zeros((n_encoder, 1, d_att), jnp.float32),
    }
    return {
        "embedding": ff_layers(d_in, d_att),
        "classifier": ff_layers(d_att, out_dim, pad_to=pad_out),
        "pe": sinusoidal_pe(len_in, d_att),
        "encoders": encoders,
        "out_dim": out_dim,
    }


# ----------------------------------------------------------------------------
if __name__ == "__main__":
    B, LEN_IN, D_IN, D_ATT, N_HEADS, N_ENC = 2, 8, 10, 64, 4, 2
    WIDTHS = [32]

    key = jax.random.PRNGKey(0)
    kp, kx = jax.random.split(key)
    params = init_params(kp, N_ENC, LEN_IN, D_IN, D_ATT, N_HEADS, WIDTHS)
    x = jax.random.normal(kx, (B, LEN_IN, D_IN), jnp.float32)

    out = network_forward(x, params, n_heads=N_HEADS)
    out = jax.block_until_ready(out)

    assert out.shape == (B, LEN_IN, LEN_IN + 1), out.shape
    assert bool(jnp.all(jnp.isfinite(out)))
    # each row is a softmax distribution -> sums to 1
    assert bool(jnp.allclose(jnp.sum(out, axis=-1), 1.0, atol=1e-4))
    print("KERNEL_OK")
</pallas_src>

<mosaic_0001>
module attributes {stable_mosaic.version = 11 : i64} {
  func.func @network_kernel(%arg0: memref<16x10xf32, #tpu.memory_space<vmem>>, %arg1: memref<16x64xf32, #tpu.memory_space<vmem>>, %arg2: memref<10x32xbf16, #tpu.memory_space<vmem>>, %arg3: memref<1x32xf32, #tpu.memory_space<vmem>>, %arg4: memref<32x64xbf16, #tpu.memory_space<vmem>>, %arg5: memref<1x64xf32, #tpu.memory_space<vmem>>, %arg6: memref<8x64x16xbf16, #tpu.memory_space<vmem>>, %arg7: memref<8x1x16xf32, #tpu.memory_space<vmem>>, %arg8: memref<8x64x16xbf16, #tpu.memory_space<vmem>>, %arg9: memref<8x1x16xf32, #tpu.memory_space<vmem>>, %arg10: memref<8x64x16xbf16, #tpu.memory_space<vmem>>, %arg11: memref<8x1x16xf32, #tpu.memory_space<vmem>>, %arg12: memref<8x16x64xbf16, #tpu.memory_space<vmem>>, %arg13: memref<2x1x64xf32, #tpu.memory_space<vmem>>, %arg14: memref<2x1x64xf32, #tpu.memory_space<vmem>>, %arg15: memref<2x1x64xf32, #tpu.memory_space<vmem>>, %arg16: memref<2x64x256xbf16, #tpu.memory_space<vmem>>, %arg17: memref<2x1x256xf32, #tpu.memory_space<vmem>>, %arg18: memref<2x256x64xbf16, #tpu.memory_space<vmem>>, %arg19: memref<2x1x64xf32, #tpu.memory_space<vmem>>, %arg20: memref<2x1x64xf32, #tpu.memory_space<vmem>>, %arg21: memref<2x1x64xf32, #tpu.memory_space<vmem>>, %arg22: memref<64x32xbf16, #tpu.memory_space<vmem>>, %arg23: memref<1x32xf32, #tpu.memory_space<vmem>>, %arg24: memref<32x128xbf16, #tpu.memory_space<vmem>>, %arg25: memref<1x128xf32, #tpu.memory_space<vmem>>, %arg26: memref<16x128xf32, #tpu.memory_space<vmem>>) attributes {dimension_semantics = [], scalar_prefetch = 0 : i64, scratch_operands = 0 : i64, tpu.core_type = #tpu.core_type<tc>} {
    %c0 = arith.constant 0 : index
    %c0_0 = arith.constant 0 : index
    %0 = vector.load %arg0[%c0, %c0_0] : memref<16x10xf32, #tpu.memory_space<vmem>>, vector<16x10xf32>
    %c0_1 = arith.constant 0 : index
    %c0_2 = arith.constant 0 : index
    %1 = vector.load %arg2[%c0_1, %c0_2] : memref<10x32xbf16, #tpu.memory_space<vmem>>, vector<10x32xbf16>
    %2 = arith.truncf %0 : vector<16x10xf32> to vector<16x10xbf16>
    %cst = arith.constant dense<0.000000e+00> : vector<16x32xf32>
    %3 = tpu.matmul %2, %1, %cst {dimension_numbers = #tpu.dot_dimension_numbers<[1], [0], [0], [1], [0, 0, 1, 1], [], []>} : vector<16x10xbf16>, vector<10x32xbf16>, vector<16x32xf32> -> vector<16x32xf32>
    %c0_3 = arith.constant 0 : index
    %c0_4 = arith.constant 0 : index
    %4 = vector.load %arg3[%c0_3, %c0_4] : memref<1x32xf32, #tpu.memory_space<vmem>>, vector<1x32xf32>
    %5 = vector.broadcast %4 : vector<1x32xf32> to vector<16x32xf32>
    %6 = arith.addf %3, %5 : vector<16x32xf32>
    %cst_5 = arith.constant 0.000000e+00 : f32
    %7 = vector.broadcast %cst_5 : f32 to vector<16x32xf32>
    %8 = arith.maximumf %6, %7 : vector<16x32xf32>
    %c0_6 = arith.constant 0 : index
    %c0_7 = arith.constant 0 : index
    %9 = vector.load %arg4[%c0_6, %c0_7] : memref<32x64xbf16, #tpu.memory_space<vmem>>, vector<32x64xbf16>
    %10 = arith.truncf %8 : vector<16x32xf32> to vector<16x32xbf16>
    %cst_8 = arith.constant dense<0.000000e+00> : vector<16x64xf32>
    %11 = tpu.matmul %10, %9, %cst_8 {dimension_numbers = #tpu.dot_dimension_numbers<[1], [0], [0], [1], [0, 0, 1, 1], [], []>} : vector<16x32xbf16>, vector<32x64xbf16>, vector<16x64xf32> -> vector<16x64xf32>
    %c0_9 = arith.constant 0 : index
    %c0_10 = arith.constant 0 : index
    %12 = vector.load %arg5[%c0_9, %c0_10] : memref<1x64xf32, #tpu.memory_space<vmem>>, vector<1x64xf32>
    %13 = vector.broadcast %12 : vector<1x64xf32> to vector<16x64xf32>
    %14 = arith.addf %11, %13 : vector<16x64xf32>
    %c0_11 = arith.constant 0 : index
    %c0_12 = arith.constant 0 : index
    %15 = vector.load %arg1[%c0_11, %c0_12] : memref<16x64xf32, #tpu.memory_space<vmem>>, vector<16x64xf32>
    %16 = arith.addf %14, %15 : vector<16x64xf32>
    %17 = arith.truncf %16 : vector<16x64xf32> to vector<16x64xbf16>
    %cst_13 = arith.constant 0.000000e+00 : f32
    %18 = vector.broadcast %cst_13 : f32 to vector<16x64xf32>
    %c0_14 = arith.constant 0 : index
    %c0_15 = arith.constant 0 : index
    %c0_16 = arith.constant 0 : index
    %19 = vector.load %arg6[%c0_14, %c0_15, %c0_16] : memref<8x64x16xbf16, #tpu.memory_space<vmem>>, vector<1x64x16xbf16>
    %20 = vector.shape_cast %19 : vector<1x64x16xbf16> to vector<64x16xbf16>
    %cst_17 = arith.constant dense<0.000000e+00> : vector<16x16xf32>
    %21 = tpu.matmul %17, %20, %cst_17 {dimension_numbers = #tpu.dot_dimension_numbers<[1], [0], [0], [1], [0, 0, 1, 1], [], []>} : vector<16x64xbf16>, vector<64x16xbf16>, vector<16x16xf32> -> vector<16x16xf32>
    %c0_18 = arith.constant 0 : index
    %c0_19 = arith.constant 0 : index
    %c0_20 = arith.constant 0 : index
    %22 = vector.load %arg7[%c0_18, %c0_19, %c0_20] : memref<8x1x16xf32, #tpu.memory_space<vmem>>, vector<1x1x16xf32>
    %23 = vector.shape_cast %22 : vector<1x1x16xf32> to vector<1x16xf32>
    %24 = vector.broadcast %23 : vector<1x16xf32> to vector<16x16xf32>
    %25 = arith.addf %21, %24 : vector<16x16xf32>
    %c0_21 = arith.constant 0 : index
    %c0_22 = arith.constant 0 : index
    %c0_23 = arith.constant 0 : index
    %26 = vector.load %arg8[%c0_21, %c0_22, %c0_23] : memref<8x64x16xbf16, #tpu.memory_space<vmem>>, vector<1x64x16xbf16>
    %27 = vector.shape_cast %26 : vector<1x64x16xbf16> to vector<64x16xbf16>
    %cst_24 = arith.constant dense<0.000000e+00> : vector<16x16xf32>
    %28 = tpu.matmul %17, %27, %cst_24 {dimension_numbers = #tpu.dot_dimension_numbers<[1], [0], [0], [1], [0, 0, 1, 1], [], []>} : vector<16x64xbf16>, vector<64x16xbf16>, vector<16x16xf32> -> vector<16x16xf32>
    %c0_25 = arith.constant 0 : index
    %c0_26 = arith.constant 0 : index
    %c0_27 = arith.constant 0 : index
    %29 = vector.load %arg9[%c0_25, %c0_26, %c0_27] : memref<8x1x16xf32, #tpu.memory_space<vmem>>, vector<1x1x16xf32>
    %30 = vector.shape_cast %29 : vector<1x1x16xf32> to vector<1x16xf32>
    %31 = vector.broadcast %30 : vector<1x16xf32> to vector<16x16xf32>
    %32 = arith.addf %28, %31 : vector<16x16xf32>
    %c0_28 = arith.constant 0 : index
    %c0_29 = arith.constant 0 : index
    %c0_30 = arith.constant 0 : index
    %33 = vector.load %arg10[%c0_28, %c0_29, %c0_30] : memref<8x64x16xbf16, #tpu.memory_space<vmem>>, vector<1x64x16xbf16>
    %34 = vector.shape_cast %33 : vector<1x64x16xbf16> to vector<64x16xbf16>
    %cst_31 = arith.constant dense<0.000000e+00> : vector<16x16xf32>
    %35 = tpu.matmul %17, %34, %cst_31 {dimension_numbers = #tpu.dot_dimension_numbers<[1], [0], [0], [1], [0, 0, 1, 1], [], []>} : vector<16x64xbf16>, vector<64x16xbf16>, vector<16x16xf32> -> vector<16x16xf32>
    %c0_32 = arith.constant 0 : index
    %c0_33 = arith.constant 0 : index
    %c0_34 = arith.constant 0 : index
    %36 = vector.load %arg11[%c0_32, %c0_33, %c0_34] : memref<8x1x16xf32, #tpu.memory_space<vmem>>, vector<1x1x16xf32>
    %37 = vector.shape_cast %36 : vector<1x1x16xf32> to vector<1x16xf32>
    %38 = vector.broadcast %37 : vector<1x16xf32> to vector<16x16xf32>
    %39 = arith.addf %35, %38 : vector<16x16xf32>
    %cst_35 = arith.constant 2.500000e-01 : f32
    %40 = vector.broadcast %cst_35 : f32 to vector<16x16xf32>
    %41 = arith.mulf %25, %40 : vector<16x16xf32>
    %42 = vector.shape_cast %41 : vector<16x16xf32> to vector<2x8x16xf32>
    %43 = arith.truncf %42 : vector<2x8x16xf32> to vector<2x8x16xbf16>
    %44 = vector.shape_cast %32 : vector<16x16xf32> to vector<2x8x16xf32>
    %45 = arith.truncf %44 : vector<2x8x16xf32> to vector<2x8x16xbf16>
    %46 = vector.shape_cast %39 : vector<16x16xf32> to vector<2x8x16xf32>
    %47 = arith.truncf %46 : vector<2x8x16xf32> to vector<2x8x16xbf16>
    "tpu.trace_start"() <{level = 10 : i32, message = "bqd,bkd->bqk"}> : () -> ()
    %cst_36 = arith.constant dense<0.000000e+00> : vector<2x8x8xf32>
    %48 = tpu.matmul %43, %45, %cst_36 {dimension_numbers = #tpu.dot_dimension_numbers<[2], [2], [1], [1], [0, 0, 0, 1, 1, 1], [0], [0]>} : vector<2x8x16xbf16>, vector<2x8x16xbf16>, vector<2x8x8xf32> -> vector<2x8x8xf32>
    "tpu.trace_stop"() : () -> ()
    %cst_37 = arith.constant dense<0xFF800000> : vector<2x8xf32>
    %49 = vector.multi_reduction <maximumf>, %48, %cst_37 [2] : vector<2x8x8xf32> to vector<2x8xf32>
    %50 = vector.shape_cast %49 : vector<2x8xf32> to vector<2x8x1xf32>
    %51 = vector.broadcast %50 : vector<2x8x1xf32> to vector<2x8x8xf32>
    %52 = arith.subf %48, %51 : vector<2x8x8xf32>
    %53 = math.exp %52 : vector<2x8x8xf32>
    %cst_38 = arith.constant dense<0.000000e+00> : vector<2x8xf32>
    %54 = vector.multi_reduction <add>, %53, %cst_38 [2] : vector<2x8x8xf32> to vector<2x8xf32>
    %55 = vector.shape_cast %54 : vector<2x8xf32> to vector<2x8x1xf32>
    %56 = tpu.reciprocal %55 {approx = true} : vector<2x8x1xf32> -> vector<2x8x1xf32>
    %57 = vector.broadcast %56 : vector<2x8x1xf32> to vector<2x8x8xf32>
    %58 = arith.mulf %53, %57 : vector<2x8x8xf32>
    %59 = arith.truncf %58 : vector<2x8x8xf32> to vector<2x8x8xbf16>
    "tpu.trace_start"() <{level = 10 : i32, message = "bqk,bkd->bqd"}> : () -> ()
    %cst_39 = arith.constant dense<0.000000e+00> : vector<2x8x16xf32>
    %60 = tpu.matmul %59, %47, %cst_39 {dimension_numbers = #tpu.dot_dimension_numbers<[2], [1], [1], [2], [0, 0, 0, 1, 1, 2], [0], [0]>} : vector<2x8x8xbf16>, vector<2x8x16xbf16>, vector<2x8x16xf32> -> vector<2x8x16xf32>
    "tpu.trace_stop"() : () -> ()
    %61 = vector.shape_cast %60 : vector<2x8x16xf32> to vector<16x16xf32>
    %c0_40 = arith.constant 0 : index
    %c0_41 = arith.constant 0 : index
    %c0_42 = arith.constant 0 : index
    %62 = vector.load %arg12[%c0_40, %c0_41, %c0_42] : memref<8x16x64xbf16, #tpu.memory_space<vmem>>, vector<1x16x64xbf16>
    %63 = vector.shape_cast %62 : vector<1x16x64xbf16> to vector<16x64xbf16>
    %64 = arith.truncf %61 : vector<16x16xf32> to vector<16x16xbf16>
    %cst_43 = arith.constant dense<0.000000e+00> : vector<16x64xf32>
    %65 = tpu.matmul %64, %63, %cst_43 {dimension_numbers = #tpu.dot_dimension_numbers<[1], [0], [0], [1], [0, 0, 1, 1], [], []>} : vector<16x16xbf16>, vector<16x64xbf16>, vector<16x64xf32> -> vector<16x64xf32>
    %66 = arith.addf %18, %65 : vector<16x64xf32>
    %c1 = arith.constant 1 : index
    %c0_44 = arith.constant 0 : index
    %c0_45 = arith.constant 0 : index
    %67 = vector.load %arg6[%c1, %c0_44, %c0_45] : memref<8x64x16xbf16, #tpu.memory_space<vmem>>, vector<1x64x16xbf16>
    %68 = vector.shape_cast %67 : vector<1x64x16xbf16> to vector<64x16xbf16>
    %cst_46 = arith.constant dense<0.000000e+00> : vector<16x16xf32>
    %69 = tpu.matmul %17, %68, %cst_46 {dimension_numbers = #tpu.dot_dimension_numbers<[1], [0], [0], [1], [0, 0, 1, 1], [], []>} : vector<16x64xbf16>, vector<64x16xbf16>, vector<16x16xf32> -> vector<16x16xf32>
    %c1_47 = arith.constant 1 : index
    %c0_48 = arith.constant 0 : index
    %c0_49 = arith.constant 0 : index
    %70 = vector.load %arg7[%c1_47, %c0_48, %c0_49] : memref<8x1x16xf32, #tpu.memory_space<vmem>>, vector<1x1x16xf32>
    %71 = vector.shape_cast %70 : vector<1x1x16xf32> to vector<1x16xf32>
    %72 = vector.broadcast %71 : vector<1x16xf32> to vector<16x16xf32>
    %73 = arith.addf %69, %72 : vector<16x16xf32>
    %c1_50 = arith.constant 1 : index
    %c0_51 = arith.constant 0 : index
    %c0_52 = arith.constant 0 : index
    %74 = vector.load %arg8[%c1_50, %c0_51, %c0_52] : memref<8x64x16xbf16, #tpu.memory_space<vmem>>, vector<1x64x16xbf16>
    %75 = vector.shape_cast %74 : vector<1x64x16xbf16> to vector<64x16xbf16>
    %cst_53 = arith.constant dense<0.000000e+00> : vector<16x16xf32>
    %76 = tpu.matmul %17, %75, %cst_53 {dimension_numbers = #tpu.dot_dimension_numbers<[1], [0], [0], [1], [0, 0, 1, 1], [], []>} : vector<16x64xbf16>, vector<64x16xbf16>, vector<16x16xf32> -> vector<16x16xf32>
    %c1_54 = arith.constant 1 : index
    %c0_55 = arith.constant 0 : index
    %c0_56 = arith.constant 0 : index
    %77 = vector.load %arg9[%c1_54, %c0_55, %c0_56] : memref<8x1x16xf32, #tpu.memory_space<vmem>>, vector<1x1x16xf32>
    %78 = vector.shape_cast %77 : vector<1x1x16xf32> to vector<1x16xf32>
    %79 = vector.broadcast %78 : vector<1x16xf32> to vector<16x16xf32>
    %80 = arith.addf %76, %79 : vector<16x16xf32>
    %c1_57 = arith.constant 1 : index
    %c0_58 = arith.constant 0 : index
    %c0_59 = arith.constant 0 : index
    %81 = vector.load %arg10[%c1_57, %c0_58, %c0_59] : memref<8x64x16xbf16, #tpu.memory_space<vmem>>, vector<1x64x16xbf16>
    %82 = vector.shape_cast %81 : vector<1x64x16xbf16> to vector<64x16xbf16>
    %cst_60 = arith.constant dense<0.000000e+00> : vector<16x16xf32>
    %83 = tpu.matmul %17, %82, %cst_60 {dimension_numbers = #tpu.dot_dimension_numbers<[1], [0], [0], [1], [0, 0, 1, 1], [], []>} : vector<16x64xbf16>, vector<64x16xbf16>, vector<16x16xf32> -> vector<16x16xf32>
    %c1_61 = arith.constant 1 : index
    %c0_62 = arith.constant 0 : index
    %c0_63 = arith.constant 0 : index
    %84 = vector.load %arg11[%c1_61, %c0_62, %c0_63] : memref<8x1x16xf32, #tpu.memory_space<vmem>>, vector<1x1x16xf32>
    %85 = vector.shape_cast %84 : vector<1x1x16xf32> to vector<1x16xf32>
    %86 = vector.broadcast %85 : vector<1x16xf32> to vector<16x16xf32>
    %87 = arith.addf %83, %86 : vector<16x16xf32>
    %cst_64 = arith.constant 2.500000e-01 : f32
    %88 = vector.broadcast %cst_64 : f32 to vector<16x16xf32>
    %89 = arith.mulf %73, %88 : vector<16x16xf32>
    %90 = vector.shape_cast %89 : vector<16x16xf32> to vector<2x8x16xf32>
    %91 = arith.truncf %90 : vector<2x8x16xf32> to vector<2x8x16xbf16>
    %92 = vector.shape_cast %80 : vector<16x16xf32> to vector<2x8x16xf32>
    %93 = arith.truncf %92 : vector<2x8x16xf32> to vector<2x8x16xbf16>
    %94 = vector.shape_cast %87 : vector<16x16xf32> to vector<2x8x16xf32>
    %95 = arith.truncf %94 : vector<2x8x16xf32> to vector<2x8x16xbf16>
    "tpu.trace_start"() <{level = 10 : i32, message = "bqd,bkd->bqk"}> : () -> ()
    %cst_65 = arith.constant dense<0.000000e+00> : vector<2x8x8xf32>
    %96 = tpu.matmul %91, %93, %cst_65 {dimension_numbers = #tpu.dot_dimension_numbers<[2], [2], [1], [1], [0, 0, 0, 1, 1, 1], [0], [0]>} : vector<2x8x16xbf16>, vector<2x8x16xbf16>, vector<2x8x8xf32> -> vector<2x8x8xf32>
    "tpu.trace_stop"() : () -> ()
    %cst_66 = arith.constant dense<0xFF800000> : vector<2x8xf32>
    %97 = vector.multi_reduction <maximumf>, %96, %cst_66 [2] : vector<2x8x8xf32> to vector<2x8xf32>
    %98 = vector.shape_cast %97 : vector<2x8xf32> to vector<2x8x1xf32>
    %99 = vector.broadcast %98 : vector<2x8x1xf32> to vector<2x8x8xf32>
    %100 = arith.subf %96, %99 : vector<2x8x8xf32>
    %101 = math.exp %100 : vector<2x8x8xf32>
    %cst_67 = arith.constant dense<0.000000e+00> : vector<2x8xf32>
    %102 = vector.multi_reduction <add>, %101, %cst_67 [2] : vector<2x8x8xf32> to vector<2x8xf32>
    %103 = vector.shape_cast %102 : vector<2x8xf32> to vector<2x8x1xf32>
    %104 = tpu.reciprocal %103 {approx = true} : vector<2x8x1xf32> -> vector<2x8x1xf32>
    %105 = vector.broadcast %104 : vector<2x8x1xf32> to vector<2x8x8xf32>
    %106 = arith.mulf %101, %105 : vector<2x8x8xf32>
    %107 = arith.truncf %106 : vector<2x8x8xf32> to vector<2x8x8xbf16>
    "tpu.trace_start"() <{level = 10 : i32, message = "bqk,bkd->bqd"}> : () -> ()
    %cst_68 = arith.constant dense<0.000000e+00> : vector<2x8x16xf32>
    %108 = tpu.matmul %107, %95, %cst_68 {dimension_numbers = #tpu.dot_dimension_numbers<[2], [1], [1], [2], [0, 0, 0, 1, 1, 2], [0], [0]>} : vector<2x8x8xbf16>, vector<2x8x16xbf16>, vector<2x8x16xf32> -> vector<2x8x16xf32>
    "tpu.trace_stop"() : () -> ()
    %109 = vector.shape_cast %108 : vector<2x8x16xf32> to vector<16x16xf32>
    %c1_69 = arith.constant 1 : index
    %c0_70 = arith.constant 0 : index
    %c0_71 = arith.constant 0 : index
    %110 = vector.load %arg12[%c1_69, %c0_70, %c0_71] : memref<8x16x64xbf16, #tpu.memory_space<vmem>>, vector<1x16x64xbf16>
    %111 = vector.shape_cast %110 : vector<1x16x64xbf16> to vector<16x64xbf16>
    %112 = arith.truncf %109 : vector<16x16xf32> to vector<16x16xbf16>
    %cst_72 = arith.constant dense<0.000000e+00> : vector<16x64xf32>
    %113 = tpu.matmul %112, %111, %cst_72 {dimension_numbers = #tpu.dot_dimension_numbers<[1], [0], [0], [1], [0, 0, 1, 1], [], []>} : vector<16x16xbf16>, vector<16x64xbf16>, vector<16x64xf32> -> vector<16x64xf32>
    %114 = arith.addf %66, %113 : vector<16x64xf32>
    %c2 = arith.constant 2 : index
    %c0_73 = arith.constant 0 : index
    %c0_74 = arith.constant 0 : index
    %115 = vector.load %arg6[%c2, %c0_73, %c0_74] : memref<8x64x16xbf16, #tpu.memory_space<vmem>>, vector<1x64x16xbf16>
    %116 = vector.shape_cast %115 : vector<1x64x16xbf16> to vector<64x16xbf16>
    %cst_75 = arith.constant dense<0.000000e+00> : vector<16x16xf32>
    %117 = tpu.matmul %17, %116, %cst_75 {dimension_numbers = #tpu.dot_dimension_numbers<[1], [0], [0], [1], [0, 0, 1, 1], [], []>} : vector<16x64xbf16>, vector<64x16xbf16>, vector<16x16xf32> -> vector<16x16xf32>
    %c2_76 = arith.constant 2 : index
    %c0_77 = arith.constant 0 : index
    %c0_78 = arith.constant 0 : index
    %118 = vector.load %arg7[%c2_76, %c0_77, %c0_78] : memref<8x1x16xf32, #tpu.memory_space<vmem>>, vector<1x1x16xf32>
    %119 = vector.shape_cast %118 : vector<1x1x16xf32> to vector<1x16xf32>
    %120 = vector.broadcast %119 : vector<1x16xf32> to vector<16x16xf32>
    %121 = arith.addf %117, %120 : vector<16x16xf32>
    %c2_79 = arith.constant 2 : index
    %c0_80 = arith.constant 0 : index
    %c0_81 = arith.constant 0 : index
    %122 = vector.load %arg8[%c2_79, %c0_80, %c0_81] : memref<8x64x16xbf16, #tpu.memory_space<vmem>>, vector<1x64x16xbf16>
    %123 = vector.shape_cast %122 : vector<1x64x16xbf16> to vector<64x16xbf16>
    %cst_82 = arith.constant dense<0.000000e+00> : vector<16x16xf32>
    %124 = tpu.matmul %17, %123, %cst_82 {dimension_numbers = #tpu.dot_dimension_numbers<[1], [0], [0], [1], [0, 0, 1, 1], [], []>} : vector<16x64xbf16>, vector<64x16xbf16>, vector<16x16xf32> -> vector<16x16xf32>
    %c2_83 = arith.constant 2 : index
    %c0_84 = arith.constant 0 : index
    %c0_85 = arith.constant 0 : index
    %125 = vector.load %arg9[%c2_83, %c0_84, %c0_85] : memref<8x1x16xf32, #tpu.memory_space<vmem>>, vector<1x1x16xf32>
    %126 = vector.shape_cast %125 : vector<1x1x16xf32> to vector<1x16xf32>
    %127 = vector.broadcast %126 : vector<1x16xf32> to vector<16x16xf32>
    %128 = arith.addf %124, %127 : vector<16x16xf32>
    %c2_86 = arith.constant 2 : index
    %c0_87 = arith.constant 0 : index
    %c0_88 = arith.constant 0 : index
    %129 = vector.load %arg10[%c2_86, %c0_87, %c0_88] : memref<8x64x16xbf16, #tpu.memory_space<vmem>>, vector<1x64x16xbf16>
    %130 = vector.shape_cast %129 : vector<1x64x16xbf16> to vector<64x16xbf16>
    %cst_89 = arith.constant dense<0.000000e+00> : vector<16x16xf32>
    %131 = tpu.matmul %17, %130, %cst_89 {dimension_numbers = #tpu.dot_dimension_numbers<[1], [0], [0], [1], [0, 0, 1, 1], [], []>} : vector<16x64xbf16>, vector<64x16xbf16>, vector<16x16xf32> -> vector<16x16xf32>
    %c2_90 = arith.constant 2 : index
    %c0_91 = arith.constant 0 : index
    %c0_92 = arith.constant 0 : index
    %132 = vector.load %arg11[%c2_90, %c0_91, %c0_92] : memref<8x1x16xf32, #tpu.memory_space<vmem>>, vector<1x1x16xf32>
    %133 = vector.shape_cast %132 : vector<1x1x16xf32> to vector<1x16xf32>
    %134 = vector.broadcast %133 : vector<1x16xf32> to vector<16x16xf32>
    %135 = arith.addf %131, %134 : vector<16x16xf32>
    %cst_93 = arith.constant 2.500000e-01 : f32
    %136 = vector.broadcast %cst_93 : f32 to vector<16x16xf32>
    %137 = arith.mulf %121, %136 : vector<16x16xf32>
    %138 = vector.shape_cast %137 : vector<16x16xf32> to vector<2x8x16xf32>
    %139 = arith.truncf %138 : vector<2x8x16xf32> to vector<2x8x16xbf16>
    %140 = vector.shape_cast %128 : vector<16x16xf32> to vector<2x8x16xf32>
    %141 = arith.truncf %140 : vector<2x8x16xf32> to vector<2x8x16xbf16>
    %142 = vector.shape_cast %135 : vector<16x16xf32> to vector<2x8x16xf32>
    %143 = arith.truncf %142 : vector<2x8x16xf32> to vector<2x8x16xbf16>
    "tpu.trace_start"() <{level = 10 : i32, message = "bqd,bkd->bqk"}> : () -> ()
    %cst_94 = arith.constant dense<0.000000e+00> : vector<2x8x8xf32>
    %144 = tpu.matmul %139, %141, %cst_94 {dimension_numbers = #tpu.dot_dimension_numbers<[2], [2], [1], [1], [0, 0, 0, 1, 1, 1], [0], [0]>} : vector<2x8x16xbf16>, vector<2x8x16xbf16>, vector<2x8x8xf32> -> vector<2x8x8xf32>
    "tpu.trace_stop"() : () -> ()
    %cst_95 = arith.constant dense<0xFF800000> : vector<2x8xf32>
    %145 = vector.multi_reduction <maximumf>, %144, %cst_95 [2] : vector<2x8x8xf32> to vector<2x8xf32>
    %146 = vector.shape_cast %145 : vector<2x8xf32> to vector<2x8x1xf32>
    %147 = vector.broadcast %146 : vector<2x8x1xf32> to vector<2x8x8xf32>
    %148 = arith.subf %144, %147 : vector<2x8x8xf32>
    %149 = math.exp %148 : vector<2x8x8xf32>
    %cst_96 = arith.constant dense<0.000000e+00> : vector<2x8xf32>
    %150 = vector.multi_reduction <add>, %149, %cst_96 [2] : vector<2x8x8xf32> to vector<2x8xf32>
    %151 = vector.shape_cast %150 : vector<2x8xf32> to vector<2x8x1xf32>
    %152 = tpu.reciprocal %151 {approx = true} : vector<2x8x1xf32> -> vector<2x8x1xf32>
    %153 = vector.broadcast %152 : vector<2x8x1xf32> to vector<2x8x8xf32>
    %154 = arith.mulf %149, %153 : vector<2x8x8xf32>
    %155 = arith.truncf %154 : vector<2x8x8xf32> to vector<2x8x8xbf16>
    "tpu.trace_start"() <{level = 10 : i32, message = "bqk,bkd->bqd"}> : () -> ()
    %cst_97 = arith.constant dense<0.000000e+00> : vector<2x8x16xf32>
    %156 = tpu.matmul %155, %143, %cst_97 {dimension_numbers = #tpu.dot_dimension_numbers<[2], [1], [1], [2], [0, 0, 0, 1, 1, 2], [0], [0]>} : vector<2x8x8xbf16>, vector<2x8x16xbf16>, vector<2x8x16xf32> -> vector<2x8x16xf32>
    "tpu.trace_stop"() : () -> ()
    %157 = vector.shape_cast %156 : vector<2x8x16xf32> to vector<16x16xf32>
    %c2_98 = arith.constant 2 : index
    %c0_99 = arith.constant 0 : index
    %c0_100 = arith.constant 0 : index
    %158 = vector.load %arg12[%c2_98, %c0_99, %c0_100] : memref<8x16x64xbf16, #tpu.memory_space<vmem>>, vector<1x16x64xbf16>
    %159 = vector.shape_cast %158 : vector<1x16x64xbf16> to vector<16x64xbf16>
    %160 = arith.truncf %157 : vector<16x16xf32> to vector<16x16xbf16>
    %cst_101 = arith.constant dense<0.000000e+00> : vector<16x64xf32>
    %161 = tpu.matmul %160, %159, %cst_101 {dimension_numbers = #tpu.dot_dimension_numbers<[1], [0], [0], [1], [0, 0, 1, 1], [], []>} : vector<16x16xbf16>, vector<16x64xbf16>, vector<16x64xf32> -> vector<16x64xf32>
    %162 = arith.addf %114, %161 : vector<16x64xf32>
    %c3 = arith.constant 3 : index
    %c0_102 = arith.constant 0 : index
    %c0_103 = arith.constant 0 : index
    %163 = vector.load %arg6[%c3, %c0_102, %c0_103] : memref<8x64x16xbf16, #tpu.memory_space<vmem>>, vector<1x64x16xbf16>
    %164 = vector.shape_cast %163 : vector<1x64x16xbf16> to vector<64x16xbf16>
    %cst_104 = arith.constant dense<0.000000e+00> : vector<16x16xf32>
    %165 = tpu.matmul %17, %164, %cst_104 {dimension_numbers = #tpu.dot_dimension_numbers<[1], [0], [0], [1], [0, 0, 1, 1], [], []>} : vector<16x64xbf16>, vector<64x16xbf16>, vector<16x16xf32> -> vector<16x16xf32>
    %c3_105 = arith.constant 3 : index
    %c0_106 = arith.constant 0 : index
    %c0_107 = arith.constant 0 : index
    %166 = vector.load %arg7[%c3_105, %c0_106, %c0_107] : memref<8x1x16xf32, #tpu.memory_space<vmem>>, vector<1x1x16xf32>
    %167 = vector.shape_cast %166 : vector<1x1x16xf32> to vector<1x16xf32>
    %168 = vector.broadcast %167 : vector<1x16xf32> to vector<16x16xf32>
    %169 = arith.addf %165, %168 : vector<16x16xf32>
    %c3_108 = arith.constant 3 : index
    %c0_109 = arith.constant 0 : index
    %c0_110 = arith.constant 0 : index
    %170 = vector.load %arg8[%c3_108, %c0_109, %c0_110] : memref<8x64x16xbf16, #tpu.memory_space<vmem>>, vector<1x64x16xbf16>
    %171 = vector.shape_cast %170 : vector<1x64x16xbf16> to vector<64x16xbf16>
    %cst_111 = arith.constant dense<0.000000e+00> : vector<16x16xf32>
    %172 = tpu.matmul %17, %171, %cst_111 {dimension_numbers = #tpu.dot_dimension_numbers<[1], [0], [0], [1], [0, 0, 1, 1], [], []>} : vector<16x64xbf16>, vector<64x16xbf16>, vector<16x16xf32> -> vector<16x16xf32>
    %c3_112 = arith.constant 3 : index
    %c0_113 = arith.constant 0 : index
    %c0_114 = arith.constant 0 : index
    %173 = vector.load %arg9[%c3_112, %c0_113, %c0_114] : memref<8x1x16xf32, #tpu.memory_space<vmem>>, vector<1x1x16xf32>
    %174 = vector.shape_cast %173 : vector<1x1x16xf32> to vector<1x16xf32>
    %175 = vector.broadcast %174 : vector<1x16xf32> to vector<16x16xf32>
    %176 = arith.addf %172, %175 : vector<16x16xf32>
    %c3_115 = arith.constant 3 : index
    %c0_116 = arith.constant 0 : index
    %c0_117 = arith.constant 0 : index
    %177 = vector.load %arg10[%c3_115, %c0_116, %c0_117] : memref<8x64x16xbf16, #tpu.memory_space<vmem>>, vector<1x64x16xbf16>
    %178 = vector.shape_cast %177 : vector<1x64x16xbf16> to vector<64x16xbf16>
    %cst_118 = arith.constant dense<0.000000e+00> : vector<16x16xf32>
    %179 = tpu.matmul %17, %178, %cst_118 {dimension_numbers = #tpu.dot_dimension_numbers<[1], [0], [0], [1], [0, 0, 1, 1], [], []>} : vector<16x64xbf16>, vector<64x16xbf16>, vector<16x16xf32> -> vector<16x16xf32>
    %c3_119 = arith.constant 3 : index
    %c0_120 = arith.constant 0 : index
    %c0_121 = arith.constant 0 : index
    %180 = vector.load %arg11[%c3_119, %c0_120, %c0_121] : memref<8x1x16xf32, #tpu.memory_space<vmem>>, vector<1x1x16xf32>
    %181 = vector.shape_cast %180 : vector<1x1x16xf32> to vector<1x16xf32>
    %182 = vector.broadcast %181 : vector<1x16xf32> to vector<16x16xf32>
    %183 = arith.addf %179, %182 : vector<16x16xf32>
    %cst_122 = arith.constant 2.500000e-01 : f32
    %184 = vector.broadcast %cst_122 : f32 to vector<16x16xf32>
    %185 = arith.mulf %169, %184 : vector<16x16xf32>
    %186 = vector.shape_cast %185 : vector<16x16xf32> to vector<2x8x16xf32>
    %187 = arith.truncf %186 : vector<2x8x16xf32> to vector<2x8x16xbf16>
    %188 = vector.shape_cast %176 : vector<16x16xf32> to vector<2x8x16xf32>
    %189 = arith.truncf %188 : vector<2x8x16xf32> to vector<2x8x16xbf16>
    %190 = vector.shape_cast %183 : vector<16x16xf32> to vector<2x8x16xf32>
    %191 = arith.truncf %190 : vector<2x8x16xf32> to vector<2x8x16xbf16>
    "tpu.trace_start"() <{level = 10 : i32, message = "bqd,bkd->bqk"}> : () -> ()
    %cst_123 = arith.constant dense<0.000000e+00> : vector<2x8x8xf32>
    %192 = tpu.matmul %187, %189, %cst_123 {dimension_numbers = #tpu.dot_dimension_numbers<[2], [2], [1], [1], [0, 0, 0, 1, 1, 1], [0], [0]>} : vector<2x8x16xbf16>, vector<2x8x16xbf16>, vector<2x8x8xf32> -> vector<2x8x8xf32>
    "tpu.trace_stop"() : () -> ()
    %cst_124 = arith.constant dense<0xFF800000> : vector<2x8xf32>
    %193 = vector.multi_reduction <maximumf>, %192, %cst_124 [2] : vector<2x8x8xf32> to vector<2x8xf32>
    %194 = vector.shape_cast %193 : vector<2x8xf32> to vector<2x8x1xf32>
    %195 = vector.broadcast %194 : vector<2x8x1xf32> to vector<2x8x8xf32>
    %196 = arith.subf %192, %195 : vector<2x8x8xf32>
    %197 = math.exp %196 : vector<2x8x8xf32>
    %cst_125 = arith.constant dense<0.000000e+00> : vector<2x8xf32>
    %198 = vector.multi_reduction <add>, %197, %cst_125 [2] : vector<2x8x8xf32> to vector<2x8xf32>
    %199 = vector.shape_cast %198 : vector<2x8xf32> to vector<2x8x1xf32>
    %200 = tpu.reciprocal %199 {approx = true} : vector<2x8x1xf32> -> vector<2x8x1xf32>
    %201 = vector.broadcast %200 : vector<2x8x1xf32> to vector<2x8x8xf32>
    %202 = arith.mulf %197, %201 : vector<2x8x8xf32>
    %203 = arith.truncf %202 : vector<2x8x8xf32> to vector<2x8x8xbf16>
    "tpu.trace_start"() <{level = 10 : i32, message = "bqk,bkd->bqd"}> : () -> ()
    %cst_126 = arith.constant dense<0.000000e+00> : vector<2x8x16xf32>
    %204 = tpu.matmul %203, %191, %cst_126 {dimension_numbers = #tpu.dot_dimension_numbers<[2], [1], [1], [2], [0, 0, 0, 1, 1, 2], [0], [0]>} : vector<2x8x8xbf16>, vector<2x8x16xbf16>, vector<2x8x16xf32> -> vector<2x8x16xf32>
    "tpu.trace_stop"() : () -> ()
    %205 = vector.shape_cast %204 : vector<2x8x16xf32> to vector<16x16xf32>
    %c3_127 = arith.constant 3 : index
    %c0_128 = arith.constant 0 : index
    %c0_129 = arith.constant 0 : index
    %206 = vector.load %arg12[%c3_127, %c0_128, %c0_129] : memref<8x16x64xbf16, #tpu.memory_space<vmem>>, vector<1x16x64xbf16>
    %207 = vector.shape_cast %206 : vector<1x16x64xbf16> to vector<16x64xbf16>
    %208 = arith.truncf %205 : vector<16x16xf32> to vector<16x16xbf16>
    %cst_130 = arith.constant dense<0.000000e+00> : vector<16x64xf32>
    %209 = tpu.matmul %208, %207, %cst_130 {dimension_numbers = #tpu.dot_dimension_numbers<[1], [0], [0], [1], [0, 0, 1, 1], [], []>} : vector<16x16xbf16>, vector<16x64xbf16>, vector<16x64xf32> -> vector<16x64xf32>
    %210 = arith.addf %162, %209 : vector<16x64xf32>
    %c0_131 = arith.constant 0 : index
    %c0_132 = arith.constant 0 : index
    %c0_133 = arith.constant 0 : index
    %211 = vector.load %arg13[%c0_131, %c0_132, %c0_133] : memref<2x1x64xf32, #tpu.memory_space<vmem>>, vector<1x1x64xf32>
    %212 = vector.shape_cast %211 : vector<1x1x64xf32> to vector<1x64xf32>
    %213 = vector.broadcast %212 : vector<1x64xf32> to vector<16x64xf32>
    %214 = arith.addf %210, %213 : vector<16x64xf32>
    %215 = arith.addf %16, %214 : vector<16x64xf32>
    %c0_134 = arith.constant 0 : index
    %c0_135 = arith.constant 0 : index
    %c0_136 = arith.constant 0 : index
    %216 = vector.load %arg14[%c0_134, %c0_135, %c0_136] : memref<2x1x64xf32, #tpu.memory_space<vmem>>, vector<1x1x64xf32>
    %217 = vector.shape_cast %216 : vector<1x1x64xf32> to vector<1x64xf32>
    %c0_137 = arith.constant 0 : index
    %c0_138 = arith.constant 0 : index
    %c0_139 = arith.constant 0 : index
    %218 = vector.load %arg15[%c0_137, %c0_138, %c0_139] : memref<2x1x64xf32, #tpu.memory_space<vmem>>, vector<1x1x64xf32>
    %219 = vector.shape_cast %218 : vector<1x1x64xf32> to vector<1x64xf32>
    %cst_140 = arith.constant dense<0.000000e+00> : vector<16xf32>
    %220 = vector.multi_reduction <add>, %215, %cst_140 [1] : vector<16x64xf32> to vector<16xf32>
    %221 = vector.shape_cast %220 : vector<16xf32> to vector<16x1xf32>
    %cst_141 = arith.constant 6.400000e+01 : f32
    %222 = vector.broadcast %cst_141 : f32 to vector<16x1xf32>
    %223 = arith.divf %221, %222 : vector<16x1xf32>
    %224 = arith.mulf %215, %215 : vector<16x64xf32>
    %cst_142 = arith.constant dense<0.000000e+00> : vector<16xf32>
    %225 = vector.multi_reduction <add>, %224, %cst_142 [1] : vector<16x64xf32> to vector<16xf32>
    %226 = vector.shape_cast %225 : vector<16xf32> to vector<16x1xf32>
    %cst_143 = arith.constant 6.400000e+01 : f32
    %227 = vector.broadcast %cst_143 : f32 to vector<16x1xf32>
    %228 = arith.divf %226, %227 : vector<16x1xf32>
    %229 = arith.mulf %223, %223 : vector<16x1xf32>
    %230 = arith.subf %228, %229 : vector<16x1xf32>
    %231 = vector.broadcast %223 : vector<16x1xf32> to vector<16x64xf32>
    %232 = arith.subf %215, %231 : vector<16x64xf32>
    %cst_144 = arith.constant 9.99999974E-6 : f32
    %233 = vector.broadcast %cst_144 : f32 to vector<16x1xf32>
    %234 = arith.addf %230, %233 : vector<16x1xf32>
    %235 = math.rsqrt %234 : vector<16x1xf32>
    %236 = vector.broadcast %235 : vector<16x1xf32> to vector<16x64xf32>
    %237 = arith.mulf %232, %236 : vector<16x64xf32>
    %238 = vector.broadcast %217 : vector<1x64xf32> to vector<16x64xf32>
    %239 = arith.mulf %237, %238 : vector<16x64xf32>
    %240 = vector.broadcast %219 : vector<1x64xf32> to vector<16x64xf32>
    %241 = arith.addf %239, %240 : vector<16x64xf32>
    %c0_145 = arith.constant 0 : index
    %c0_146 = arith.constant 0 : index
    %c0_147 = arith.constant 0 : index
    %242 = vector.load %arg16[%c0_145, %c0_146, %c0_147] : memref<2x64x256xbf16, #tpu.memory_space<vmem>>, vector<1x64x256xbf16>
    %243 = vector.shape_cast %242 : vector<1x64x256xbf16> to vector<64x256xbf16>
    %244 = arith.truncf %241 : vector<16x64xf32> to vector<16x64xbf16>
    %cst_148 = arith.constant dense<0.000000e+00> : vector<16x256xf32>
    %245 = tpu.matmul %244, %243, %cst_148 {dimension_numbers = #tpu.dot_dimension_numbers<[1], [0], [0], [1], [0, 0, 1, 1], [], []>} : vector<16x64xbf16>, vector<64x256xbf16>, vector<16x256xf32> -> vector<16x256xf32>
    %c0_149 = arith.constant 0 : index
    %c0_150 = arith.constant 0 : index
    %c0_151 = arith.constant 0 : index
    %246 = vector.load %arg17[%c0_149, %c0_150, %c0_151] : memref<2x1x256xf32, #tpu.memory_space<vmem>>, vector<1x1x256xf32>
    %247 = vector.shape_cast %246 : vector<1x1x256xf32> to vector<1x256xf32>
    %248 = vector.broadcast %247 : vector<1x256xf32> to vector<16x256xf32>
    %249 = arith.addf %245, %248 : vector<16x256xf32>
    %cst_152 = arith.constant 0.000000e+00 : f32
    %250 = vector.broadcast %cst_152 : f32 to vector<16x256xf32>
    %251 = arith.maximumf %249, %250 : vector<16x256xf32>
    %c0_153 = arith.constant 0 : index
    %c0_154 = arith.constant 0 : index
    %c0_155 = arith.constant 0 : index
    %252 = vector.load %arg18[%c0_153, %c0_154, %c0_155] : memref<2x256x64xbf16, #tpu.memory_space<vmem>>, vector<1x256x64xbf16>
    %253 = vector.shape_cast %252 : vector<1x256x64xbf16> to vector<256x64xbf16>
    %254 = arith.truncf %251 : vector<16x256xf32> to vector<16x256xbf16>
    %cst_156 = arith.constant dense<0.000000e+00> : vector<16x64xf32>
    %255 = tpu.matmul %254, %253, %cst_156 {dimension_numbers = #tpu.dot_dimension_numbers<[1], [0], [0], [1], [0, 0, 1, 1], [], []>} : vector<16x256xbf16>, vector<256x64xbf16>, vector<16x64xf32> -> vector<16x64xf32>
    %c0_157 = arith.constant 0 : index
    %c0_158 = arith.constant 0 : index
    %c0_159 = arith.constant 0 : index
    %256 = vector.load %arg19[%c0_157, %c0_158, %c0_159] : memref<2x1x64xf32, #tpu.memory_space<vmem>>, vector<1x1x64xf32>
    %257 = vector.shape_cast %256 : vector<1x1x64xf32> to vector<1x64xf32>
    %258 = vector.broadcast %257 : vector<1x64xf32> to vector<16x64xf32>
    %259 = arith.addf %255, %258 : vector<16x64xf32>
    %260 = arith.addf %241, %259 : vector<16x64xf32>
    %c0_160 = arith.constant 0 : index
    %c0_161 = arith.constant 0 : index
    %c0_162 = arith.constant 0 : index
    %261 = vector.load %arg20[%c0_160, %c0_161, %c0_162] : memref<2x1x64xf32, #tpu.memory_space<vmem>>, vector<1x1x64xf32>
    %262 = vector.shape_cast %261 : vector<1x1x64xf32> to vector<1x64xf32>
    %c0_163 = arith.constant 0 : index
    %c0_164 = arith.constant 0 : index
    %c0_165 = arith.constant 0 : index
    %263 = vector.load %arg21[%c0_163, %c0_164, %c0_165] : memref<2x1x64xf32, #tpu.memory_space<vmem>>, vector<1x1x64xf32>
    %264 = vector.shape_cast %263 : vector<1x1x64xf32> to vector<1x64xf32>
    %cst_166 = arith.constant dense<0.000000e+00> : vector<16xf32>
    %265 = vector.multi_reduction <add>, %260, %cst_166 [1] : vector<16x64xf32> to vector<16xf32>
    %266 = vector.shape_cast %265 : vector<16xf32> to vector<16x1xf32>
    %cst_167 = arith.constant 6.400000e+01 : f32
    %267 = vector.broadcast %cst_167 : f32 to vector<16x1xf32>
    %268 = arith.divf %266, %267 : vector<16x1xf32>
    %269 = arith.mulf %260, %260 : vector<16x64xf32>
    %cst_168 = arith.constant dense<0.000000e+00> : vector<16xf32>
    %270 = vector.multi_reduction <add>, %269, %cst_168 [1] : vector<16x64xf32> to vector<16xf32>
    %271 = vector.shape_cast %270 : vector<16xf32> to vector<16x1xf32>
    %cst_169 = arith.constant 6.400000e+01 : f32
    %272 = vector.broadcast %cst_169 : f32 to vector<16x1xf32>
    %273 = arith.divf %271, %272 : vector<16x1xf32>
    %274 = arith.mulf %268, %268 : vector<16x1xf32>
    %275 = arith.subf %273, %274 : vector<16x1xf32>
    %276 = vector.broadcast %268 : vector<16x1xf32> to vector<16x64xf32>
    %277 = arith.subf %260, %276 : vector<16x64xf32>
    %cst_170 = arith.constant 9.99999974E-6 : f32
    %278 = vector.broadcast %cst_170 : f32 to vector<16x1xf32>
    %279 = arith.addf %275, %278 : vector<16x1xf32>
    %280 = math.rsqrt %279 : vector<16x1xf32>
    %281 = vector.broadcast %280 : vector<16x1xf32> to vector<16x64xf32>
    %282 = arith.mulf %277, %281 : vector<16x64xf32>
    %283 = vector.broadcast %262 : vector<1x64xf32> to vector<16x64xf32>
    %284 = arith.mulf %282, %283 : vector<16x64xf32>
    %285 = vector.broadcast %264 : vector<1x64xf32> to vector<16x64xf32>
    %286 = arith.addf %284, %285 : vector<16x64xf32>
    %287 = arith.truncf %286 : vector<16x64xf32> to vector<16x64xbf16>
    %cst_171 = arith.constant 0.000000e+00 : f32
    %288 = vector.broadcast %cst_171 : f32 to vector<16x64xf32>
    %c4 = arith.constant 4 : index
    %c0_172 = arith.constant 0 : index
    %c0_173 = arith.constant 0 : index
    %289 = vector.load %arg6[%c4, %c0_172, %c0_173] : memref<8x64x16xbf16, #tpu.memory_space<vmem>>, vector<1x64x16xbf16>
    %290 = vector.shape_cast %289 : vector<1x64x16xbf16> to vector<64x16xbf16>
    %cst_174 = arith.constant dense<0.000000e+00> : vector<16x16xf32>
    %291 = tpu.matmul %287, %290, %cst_174 {dimension_numbers = #tpu.dot_dimension_numbers<[1], [0], [0], [1], [0, 0, 1, 1], [], []>} : vector<16x64xbf16>, vector<64x16xbf16>, vector<16x16xf32> -> vector<16x16xf32>
    %c4_175 = arith.constant 4 : index
    %c0_176 = arith.constant 0 : index
    %c0_177 = arith.constant 0 : index
    %292 = vector.load %arg7[%c4_175, %c0_176, %c0_177] : memref<8x1x16xf32, #tpu.memory_space<vmem>>, vector<1x1x16xf32>
    %293 = vector.shape_cast %292 : vector<1x1x16xf32> to vector<1x16xf32>
    %294 = vector.broadcast %293 : vector<1x16xf32> to vector<16x16xf32>
    %295 = arith.addf %291, %294 : vector<16x16xf32>
    %c4_178 = arith.constant 4 : index
    %c0_179 = arith.constant 0 : index
    %c0_180 = arith.constant 0 : index
    %296 = vector.load %arg8[%c4_178, %c0_179, %c0_180] : memref<8x64x16xbf16, #tpu.memory_space<vmem>>, vector<1x64x16xbf16>
    %297 = vector.shape_cast %296 : vector<1x64x16xbf16> to vector<64x16xbf16>
    %cst_181 = arith.constant dense<0.000000e+00> : vector<16x16xf32>
    %298 = tpu.matmul %287, %297, %cst_181 {dimension_numbers = #tpu.dot_dimension_numbers<[1], [0], [0], [1], [0, 0, 1, 1], [], []>} : vector<16x64xbf16>, vector<64x16xbf16>, vector<16x16xf32> -> vector<16x16xf32>
    %c4_182 = arith.constant 4 : index
    %c0_183 = arith.constant 0 : index
    %c0_184 = arith.constant 0 : index
    %299 = vector.load %arg9[%c4_182, %c0_183, %c0_184] : memref<8x1x16xf32, #tpu.memory_space<vmem>>, vector<1x1x16xf32>
    %300 = vector.shape_cast %299 : vector<1x1x16xf32> to vector<1x16xf32>
    %301 = vector.broadcast %300 : vector<1x16xf32> to vector<16x16xf32>
    %302 = arith.addf %298, %301 : vector<16x16xf32>
    %c4_185 = arith.constant 4 : index
    %c0_186 = arith.constant 0 : index
    %c0_187 = arith.constant 0 : index
    %303 = vector.load %arg10[%c4_185, %c0_186, %c0_187] : memref<8x64x16xbf16, #tpu.memory_space<vmem>>, vector<1x64x16xbf16>
    %304 = vector.shape_cast %303 : vector<1x64x16xbf16> to vector<64x16xbf16>
    %cst_188 = arith.constant dense<0.000000e+00> : vector<16x16xf32>
    %305 = tpu.matmul %287, %304, %cst_188 {dimension_numbers = #tpu.dot_dimension_numbers<[1], [0], [0], [1], [0, 0, 1, 1], [], []>} : vector<16x64xbf16>, vector<64x16xbf16>, vector<16x16xf32> -> vector<16x16xf32>
    %c4_189 = arith.constant 4 : index
    %c0_190 = arith.constant 0 : index
    %c0_191 = arith.constant 0 : index
    %306 = vector.load %arg11[%c4_189, %c0_190, %c0_191] : memref<8x1x16xf32, #tpu.memory_space<vmem>>, vector<1x1x16xf32>
    %307 = vector.shape_cast %306 : vector<1x1x16xf32> to vector<1x16xf32>
    %308 = vector.broadcast %307 : vector<1x16xf32> to vector<16x16xf32>
    %309 = arith.addf %305, %308 : vector<16x16xf32>
    %cst_192 = arith.constant 2.500000e-01 : f32
    %310 = vector.broadcast %cst_192 : f32 to vector<16x16xf32>
    %311 = arith.mulf %295, %310 : vector<16x16xf32>
    %312 = vector.shape_cast %311 : vector<16x16xf32> to vector<2x8x16xf32>
    %313 = arith.truncf %312 : vector<2x8x16xf32> to vector<2x8x16xbf16>
    %314 = vector.shape_cast %302 : vector<16x16xf32> to vector<2x8x16xf32>
    %315 = arith.truncf %314 : vector<2x8x16xf32> to vector<2x8x16xbf16>
    %316 = vector.shape_cast %309 : vector<16x16xf32> to vector<2x8x16xf32>
    %317 = arith.truncf %316 : vector<2x8x16xf32> to vector<2x8x16xbf16>
    "tpu.trace_start"() <{level = 10 : i32, message = "bqd,bkd->bqk"}> : () -> ()
    %cst_193 = arith.constant dense<0.000000e+00> : vector<2x8x8xf32>
    %318 = tpu.matmul %313, %315, %cst_193 {dimension_numbers = #tpu.dot_dimension_numbers<[2], [2], [1], [1], [0, 0, 0, 1, 1, 1], [0], [0]>} : vector<2x8x16xbf16>, vector<2x8x16xbf16>, vector<2x8x8xf32> -> vector<2x8x8xf32>
    "tpu.trace_stop"() : () -> ()
    %cst_194 = arith.constant dense<0xFF800000> : vector<2x8xf32>
    %319 = vector.multi_reduction <maximumf>, %318, %cst_194 [2] : vector<2x8x8xf32> to vector<2x8xf32>
    %320 = vector.shape_cast %319 : vector<2x8xf32> to vector<2x8x1xf32>
    %321 = vector.broadcast %320 : vector<2x8x1xf32> to vector<2x8x8xf32>
    %322 = arith.subf %318, %321 : vector<2x8x8xf32>
    %323 = math.exp %322 : vector<2x8x8xf32>
    %cst_195 = arith.constant dense<0.000000e+00> : vector<2x8xf32>
    %324 = vector.multi_reduction <add>, %323, %cst_195 [2] : vector<2x8x8xf32> to vector<2x8xf32>
    %325 = vector.shape_cast %324 : vector<2x8xf32> to vector<2x8x1xf32>
    %326 = tpu.reciprocal %325 {approx = true} : vector<2x8x1xf32> -> vector<2x8x1xf32>
    %327 = vector.broadcast %326 : vector<2x8x1xf32> to vector<2x8x8xf32>
    %328 = arith.mulf %323, %327 : vector<2x8x8xf32>
    %329 = arith.truncf %328 : vector<2x8x8xf32> to vector<2x8x8xbf16>
    "tpu.trace_start"() <{level = 10 : i32, message = "bqk,bkd->bqd"}> : () -> ()
    %cst_196 = arith.constant dense<0.000000e+00> : vector<2x8x16xf32>
    %330 = tpu.matmul %329, %317, %cst_196 {dimension_numbers = #tpu.dot_dimension_numbers<[2], [1], [1], [2], [0, 0, 0, 1, 1, 2], [0], [0]>} : vector<2x8x8xbf16>, vector<2x8x16xbf16>, vector<2x8x16xf32> -> vector<2x8x16xf32>
    "tpu.trace_stop"() : () -> ()
    %331 = vector.shape_cast %330 : vector<2x8x16xf32> to vector<16x16xf32>
    %c4_197 = arith.constant 4 : index
    %c0_198 = arith.constant 0 : index
    %c0_199 = arith.constant 0 : index
    %332 = vector.load %arg12[%c4_197, %c0_198, %c0_199] : memref<8x16x64xbf16, #tpu.memory_space<vmem>>, vector<1x16x64xbf16>
    %333 = vector.shape_cast %332 : vector<1x16x64xbf16> to vector<16x64xbf16>
    %334 = arith.truncf %331 : vector<16x16xf32> to vector<16x16xbf16>
    %cst_200 = arith.constant dense<0.000000e+00> : vector<16x64xf32>
    %335 = tpu.matmul %334, %333, %cst_200 {dimension_numbers = #tpu.dot_dimension_numbers<[1], [0], [0], [1], [0, 0, 1, 1], [], []>} : vector<16x16xbf16>, vector<16x64xbf16>, vector<16x64xf32> -> vector<16x64xf32>
    %336 = arith.addf %288, %335 : vector<16x64xf32>
    %c5 = arith.constant 5 : index
    %c0_201 = arith.constant 0 : index
    %c0_202 = arith.constant 0 : index
    %337 = vector.load %arg6[%c5, %c0_201, %c0_202] : memref<8x64x16xbf16, #tpu.memory_space<vmem>>, vector<1x64x16xbf16>
    %338 = vector.shape_cast %337 : vector<1x64x16xbf16> to vector<64x16xbf16>
    %cst_203 = arith.constant dense<0.000000e+00> : vector<16x16xf32>
    %339 = tpu.matmul %287, %338, %cst_203 {dimension_numbers = #tpu.dot_dimension_numbers<[1], [0], [0], [1], [0, 0, 1, 1], [], []>} : vector<16x64xbf16>, vector<64x16xbf16>, vector<16x16xf32> -> vector<16x16xf32>
    %c5_204 = arith.constant 5 : index
    %c0_205 = arith.constant 0 : index
    %c0_206 = arith.constant 0 : index
    %340 = vector.load %arg7[%c5_204, %c0_205, %c0_206] : memref<8x1x16xf32, #tpu.memory_space<vmem>>, vector<1x1x16xf32>
    %341 = vector.shape_cast %340 : vector<1x1x16xf32> to vector<1x16xf32>
    %342 = vector.broadcast %341 : vector<1x16xf32> to vector<16x16xf32>
    %343 = arith.addf %339, %342 : vector<16x16xf32>
    %c5_207 = arith.constant 5 : index
    %c0_208 = arith.constant 0 : index
    %c0_209 = arith.constant 0 : index
    %344 = vector.load %arg8[%c5_207, %c0_208, %c0_209] : memref<8x64x16xbf16, #tpu.memory_space<vmem>>, vector<1x64x16xbf16>
    %345 = vector.shape_cast %344 : vector<1x64x16xbf16> to vector<64x16xbf16>
    %cst_210 = arith.constant dense<0.000000e+00> : vector<16x16xf32>
    %346 = tpu.matmul %287, %345, %cst_210 {dimension_numbers = #tpu.dot_dimension_numbers<[1], [0], [0], [1], [0, 0, 1, 1], [], []>} : vector<16x64xbf16>, vector<64x16xbf16>, vector<16x16xf32> -> vector<16x16xf32>
    %c5_211 = arith.constant 5 : index
    %c0_212 = arith.constant 0 : index
    %c0_213 = arith.constant 0 : index
    %347 = vector.load %arg9[%c5_211, %c0_212, %c0_213] : memref<8x1x16xf32, #tpu.memory_space<vmem>>, vector<1x1x16xf32>
    %348 = vector.shape_cast %347 : vector<1x1x16xf32> to vector<1x16xf32>
    %349 = vector.broadcast %348 : vector<1x16xf32> to vector<16x16xf32>
    %350 = arith.addf %346, %349 : vector<16x16xf32>
    %c5_214 = arith.constant 5 : index
    %c0_215 = arith.constant 0 : index
    %c0_216 = arith.constant 0 : index
    %351 = vector.load %arg10[%c5_214, %c0_215, %c0_216] : memref<8x64x16xbf16, #tpu.memory_space<vmem>>, vector<1x64x16xbf16>
    %352 = vector.shape_cast %351 : vector<1x64x16xbf16> to vector<64x16xbf16>
    %cst_217 = arith.constant dense<0.000000e+00> : vector<16x16xf32>
    %353 = tpu.matmul %287, %352, %cst_217 {dimension_numbers = #tpu.dot_dimension_numbers<[1], [0], [0], [1], [0, 0, 1, 1], [], []>} : vector<16x64xbf16>, vector<64x16xbf16>, vector<16x16xf32> -> vector<16x16xf32>
    %c5_218 = arith.constant 5 : index
    %c0_219 = arith.constant 0 : index
    %c0_220 = arith.constant 0 : index
    %354 = vector.load %arg11[%c5_218, %c0_219, %c0_220] : memref<8x1x16xf32, #tpu.memory_space<vmem>>, vector<1x1x16xf32>
    %355 = vector.shape_cast %354 : vector<1x1x16xf32> to vector<1x16xf32>
    %356 = vector.broadcast %355 : vector<1x16xf32> to vector<16x16xf32>
    %357 = arith.addf %353, %356 : vector<16x16xf32>
    %cst_221 = arith.constant 2.500000e-01 : f32
    %358 = vector.broadcast %cst_221 : f32 to vector<16x16xf32>
    %359 = arith.mulf %343, %358 : vector<16x16xf32>
    %360 = vector.shape_cast %359 : vector<16x16xf32> to vector<2x8x16xf32>
    %361 = arith.truncf %360 : vector<2x8x16xf32> to vector<2x8x16xbf16>
    %362 = vector.shape_cast %350 : vector<16x16xf32> to vector<2x8x16xf32>
    %363 = arith.truncf %362 : vector<2x8x16xf32> to vector<2x8x16xbf16>
    %364 = vector.shape_cast %357 : vector<16x16xf32> to vector<2x8x16xf32>
    %365 = arith.truncf %364 : vector<2x8x16xf32> to vector<2x8x16xbf16>
    "tpu.trace_start"() <{level = 10 : i32, message = "bqd,bkd->bqk"}> : () -> ()
    %cst_222 = arith.constant dense<0.000000e+00> : vector<2x8x8xf32>
    %366 = tpu.matmul %361, %363, %cst_222 {dimension_numbers = #tpu.dot_dimension_numbers<[2], [2], [1], [1], [0, 0, 0, 1, 1, 1], [0], [0]>} : vector<2x8x16xbf16>, vector<2x8x16xbf16>, vector<2x8x8xf32> -> vector<2x8x8xf32>
    "tpu.trace_stop"() : () -> ()
    %cst_223 = arith.constant dense<0xFF800000> : vector<2x8xf32>
    %367 = vector.multi_reduction <maximumf>, %366, %cst_223 [2] : vector<2x8x8xf32> to vector<2x8xf32>
    %368 = vector.shape_cast %367 : vector<2x8xf32> to vector<2x8x1xf32>
    %369 = vector.broadcast %368 : vector<2x8x1xf32> to vector<2x8x8xf32>
    %370 = arith.subf %366, %369 : vector<2x8x8xf32>
    %371 = math.exp %370 : vector<2x8x8xf32>
    %cst_224 = arith.constant dense<0.000000e+00> : vector<2x8xf32>
    %372 = vector.multi_reduction <add>, %371, %cst_224 [2] : vector<2x8x8xf32> to vector<2x8xf32>
    %373 = vector.shape_cast %372 : vector<2x8xf32> to vector<2x8x1xf32>
    %374 = tpu.reciprocal %373 {approx = true} : vector<2x8x1xf32> -> vector<2x8x1xf32>
    %375 = vector.broadcast %374 : vector<2x8x1xf32> to vector<2x8x8xf32>
    %376 = arith.mulf %371, %375 : vector<2x8x8xf32>
    %377 = arith.truncf %376 : vector<2x8x8xf32> to vector<2x8x8xbf16>
    "tpu.trace_start"() <{level = 10 : i32, message = "bqk,bkd->bqd"}> : () -> ()
    %cst_225 = arith.constant dense<0.000000e+00> : vector<2x8x16xf32>
    %378 = tpu.matmul %377, %365, %cst_225 {dimension_numbers = #tpu.dot_dimension_numbers<[2], [1], [1], [2], [0, 0, 0, 1, 1, 2], [0], [0]>} : vector<2x8x8xbf16>, vector<2x8x16xbf16>, vector<2x8x16xf32> -> vector<2x8x16xf32>
    "tpu.trace_stop"() : () -> ()
    %379 = vector.shape_cast %378 : vector<2x8x16xf32> to vector<16x16xf32>
    %c5_226 = arith.constant 5 : index
    %c0_227 = arith.constant 0 : index
    %c0_228 = arith.constant 0 : index
    %380 = vector.load %arg12[%c5_226, %c0_227, %c0_228] : memref<8x16x64xbf16, #tpu.memory_space<vmem>>, vector<1x16x64xbf16>
    %381 = vector.shape_cast %380 : vector<1x16x64xbf16> to vector<16x64xbf16>
    %382 = arith.truncf %379 : vector<16x16xf32> to vector<16x16xbf16>
    %cst_229 = arith.constant dense<0.000000e+00> : vector<16x64xf32>
    %383 = tpu.matmul %382, %381, %cst_229 {dimension_numbers = #tpu.dot_dimension_numbers<[1], [0], [0], [1], [0, 0, 1, 1], [], []>} : vector<16x16xbf16>, vector<16x64xbf16>, vector<16x64xf32> -> vector<16x64xf32>
    %384 = arith.addf %336, %383 : vector<16x64xf32>
    %c6 = arith.constant 6 : index
    %c0_230 = arith.constant 0 : index
    %c0_231 = arith.constant 0 : index
    %385 = vector.load %arg6[%c6, %c0_230, %c0_231] : memref<8x64x16xbf16, #tpu.memory_space<vmem>>, vector<1x64x16xbf16>
    %386 = vector.shape_cast %385 : vector<1x64x16xbf16> to vector<64x16xbf16>
    %cst_232 = arith.constant dense<0.000000e+00> : vector<16x16xf32>
    %387 = tpu.matmul %287, %386, %cst_232 {dimension_numbers = #tpu.dot_dimension_numbers<[1], [0], [0], [1], [0, 0, 1, 1], [], []>} : vector<16x64xbf16>, vector<64x16xbf16>, vector<16x16xf32> -> vector<16x16xf32>
    %c6_233 = arith.constant 6 : index
    %c0_234 = arith.constant 0 : index
    %c0_235 = arith.constant 0 : index
    %388 = vector.load %arg7[%c6_233, %c0_234, %c0_235] : memref<8x1x16xf32, #tpu.memory_space<vmem>>, vector<1x1x16xf32>
    %389 = vector.shape_cast %388 : vector<1x1x16xf32> to vector<1x16xf32>
    %390 = vector.broadcast %389 : vector<1x16xf32> to vector<16x16xf32>
    %391 = arith.addf %387, %390 : vector<16x16xf32>
    %c6_236 = arith.constant 6 : index
    %c0_237 = arith.constant 0 : index
    %c0_238 = arith.constant 0 : index
    %392 = vector.load %arg8[%c6_236, %c0_237, %c0_238] : memref<8x64x16xbf16, #tpu.memory_space<vmem>>, vector<1x64x16xbf16>
    %393 = vector.shape_cast %392 : vector<1x64x16xbf16> to vector<64x16xbf16>
    %cst_239 = arith.constant dense<0.000000e+00> : vector<16x16xf32>
    %394 = tpu.matmul %287, %393, %cst_239 {dimension_numbers = #tpu.dot_dimension_numbers<[1], [0], [0], [1], [0, 0, 1, 1], [], []>} : vector<16x64xbf16>, vector<64x16xbf16>, vector<16x16xf32> -> vector<16x16xf32>
    %c6_240 = arith.constant 6 : index
    %c0_241 = arith.constant 0 : index
    %c0_242 = arith.constant 0 : index
    %395 = vector.load %arg9[%c6_240, %c0_241, %c0_242] : memref<8x1x16xf32, #tpu.memory_space<vmem>>, vector<1x1x16xf32>
    %396 = vector.shape_cast %395 : vector<1x1x16xf32> to vector<1x16xf32>
    %397 = vector.broadcast %396 : vector<1x16xf32> to vector<16x16xf32>
    %398 = arith.addf %394, %397 : vector<16x16xf32>
    %c6_243 = arith.constant 6 : index
    %c0_244 = arith.constant 0 : index
    %c0_245 = arith.constant 0 : index
    %399 = vector.load %arg10[%c6_243, %c0_244, %c0_245] : memref<8x64x16xbf16, #tpu.memory_space<vmem>>, vector<1x64x16xbf16>
    %400 = vector.shape_cast %399 : vector<1x64x16xbf16> to vector<64x16xbf16>
    %cst_246 = arith.constant dense<0.000000e+00> : vector<16x16xf32>
    %401 = tpu.matmul %287, %400, %cst_246 {dimension_numbers = #tpu.dot_dimension_numbers<[1], [0], [0], [1], [0, 0, 1, 1], [], []>} : vector<16x64xbf16>, vector<64x16xbf16>, vector<16x16xf32> -> vector<16x16xf32>
    %c6_247 = arith.constant 6 : index
    %c0_248 = arith.constant 0 : index
    %c0_249 = arith.constant 0 : index
    %402 = vector.load %arg11[%c6_247, %c0_248, %c0_249] : memref<8x1x16xf32, #tpu.memory_space<vmem>>, vector<1x1x16xf32>
    %403 = vector.shape_cast %402 : vector<1x1x16xf32> to vector<1x16xf32>
    %404 = vector.broadcast %403 : vector<1x16xf32> to vector<16x16xf32>
    %405 = arith.addf %401, %404 : vector<16x16xf32>
    %cst_250 = arith.constant 2.500000e-01 : f32
    %406 = vector.broadcast %cst_250 : f32 to vector<16x16xf32>
    %407 = arith.mulf %391, %406 : vector<16x16xf32>
    %408 = vector.shape_cast %407 : vector<16x16xf32> to vector<2x8x16xf32>
    %409 = arith.truncf %408 : vector<2x8x16xf32> to vector<2x8x16xbf16>
    %410 = vector.shape_cast %398 : vector<16x16xf32> to vector<2x8x16xf32>
    %411 = arith.truncf %410 : vector<2x8x16xf32> to vector<2x8x16xbf16>
    %412 = vector.shape_cast %405 : vector<16x16xf32> to vector<2x8x16xf32>
    %413 = arith.truncf %412 : vector<2x8x16xf32> to vector<2x8x16xbf16>
    "tpu.trace_start"() <{level = 10 : i32, message = "bqd,bkd->bqk"}> : () -> ()
    %cst_251 = arith.constant dense<0.000000e+00> : vector<2x8x8xf32>
    %414 = tpu.matmul %409, %411, %cst_251 {dimension_numbers = #tpu.dot_dimension_numbers<[2], [2], [1], [1], [0, 0, 0, 1, 1, 1], [0], [0]>} : vector<2x8x16xbf16>, vector<2x8x16xbf16>, vector<2x8x8xf32> -> vector<2x8x8xf32>
    "tpu.trace_stop"() : () -> ()
    %cst_252 = arith.constant dense<0xFF800000> : vector<2x8xf32>
    %415 = vector.multi_reduction <maximumf>, %414, %cst_252 [2] : vector<2x8x8xf32> to vector<2x8xf32>
    %416 = vector.shape_cast %415 : vector<2x8xf32> to vector<2x8x1xf32>
    %417 = vector.broadcast %416 : vector<2x8x1xf32> to vector<2x8x8xf32>
    %418 = arith.subf %414, %417 : vector<2x8x8xf32>
    %419 = math.exp %418 : vector<2x8x8xf32>
    %cst_253 = arith.constant dense<0.000000e+00> : vector<2x8xf32>
    %420 = vector.multi_reduction <add>, %419, %cst_253 [2] : vector<2x8x8xf32> to vector<2x8xf32>
    %421 = vector.shape_cast %420 : vector<2x8xf32> to vector<2x8x1xf32>
    %422 = tpu.reciprocal %421 {approx = true} : vector<2x8x1xf32> -> vector<2x8x1xf32>
    %423 = vector.broadcast %422 : vector<2x8x1xf32> to vector<2x8x8xf32>
    %424 = arith.mulf %419, %423 : vector<2x8x8xf32>
    %425 = arith.truncf %424 : vector<2x8x8xf32> to vector<2x8x8xbf16>
    "tpu.trace_start"() <{level = 10 : i32, message = "bqk,bkd->bqd"}> : () -> ()
    %cst_254 = arith.constant dense<0.000000e+00> : vector<2x8x16xf32>
    %426 = tpu.matmul %425, %413, %cst_254 {dimension_numbers = #tpu.dot_dimension_numbers<[2], [1], [1], [2], [0, 0, 0, 1, 1, 2], [0], [0]>} : vector<2x8x8xbf16>, vector<2x8x16xbf16>, vector<2x8x16xf32> -> vector<2x8x16xf32>
    "tpu.trace_stop"() : () -> ()
    %427 = vector.shape_cast %426 : vector<2x8x16xf32> to vector<16x16xf32>
    %c6_255 = arith.constant 6 : index
    %c0_256 = arith.constant 0 : index
    %c0_257 = arith.constant 0 : index
    %428 = vector.load %arg12[%c6_255, %c0_256, %c0_257] : memref<8x16x64xbf16, #tpu.memory_space<vmem>>, vector<1x16x64xbf16>
    %429 = vector.shape_cast %428 : vector<1x16x64xbf16> to vector<16x64xbf16>
    %430 = arith.truncf %427 : vector<16x16xf32> to vector<16x16xbf16>
    %cst_258 = arith.constant dense<0.000000e+00> : vector<16x64xf32>
    %431 = tpu.matmul %430, %429, %cst_258 {dimension_numbers = #tpu.dot_dimension_numbers<[1], [0], [0], [1], [0, 0, 1, 1], [], []>} : vector<16x16xbf16>, vector<16x64xbf16>, vector<16x64xf32> -> vector<16x64xf32>
    %432 = arith.addf %384, %431 : vector<16x64xf32>
    %c7 = arith.constant 7 : index
    %c0_259 = arith.constant 0 : index
    %c0_260 = arith.constant 0 : index
    %433 = vector.load %arg6[%c7, %c0_259, %c0_260] : memref<8x64x16xbf16, #tpu.memory_space<vmem>>, vector<1x64x16xbf16>
    %434 = vector.shape_cast %433 : vector<1x64x16xbf16> to vector<64x16xbf16>
    %cst_261 = arith.constant dense<0.000000e+00> : vector<16x16xf32>
    %435 = tpu.matmul %287, %434, %cst_261 {dimension_numbers = #tpu.dot_dimension_numbers<[1], [0], [0], [1], [0, 0, 1, 1], [], []>} : vector<16x64xbf16>, vector<64x16xbf16>, vector<16x16xf32> -> vector<16x16xf32>
    %c7_262 = arith.constant 7 : index
    %c0_263 = arith.constant 0 : index
    %c0_264 = arith.constant 0 : index
    %436 = vector.load %arg7[%c7_262, %c0_263, %c0_264] : memref<8x1x16xf32, #tpu.memory_space<vmem>>, vector<1x1x16xf32>
    %437 = vector.shape_cast %436 : vector<1x1x16xf32> to vector<1x16xf32>
    %438 = vector.broadcast %437 : vector<1x16xf32> to vector<16x16xf32>
    %439 = arith.addf %435, %438 : vector<16x16xf32>
    %c7_265 = arith.constant 7 : index
    %c0_266 = arith.constant 0 : index
    %c0_267 = arith.constant 0 : index
    %440 = vector.load %arg8[%c7_265, %c0_266, %c0_267] : memref<8x64x16xbf16, #tpu.memory_space<vmem>>, vector<1x64x16xbf16>
    %441 = vector.shape_cast %440 : vector<1x64x16xbf16> to vector<64x16xbf16>
    %cst_268 = arith.constant dense<0.000000e+00> : vector<16x16xf32>
    %442 = tpu.matmul %287, %441, %cst_268 {dimension_numbers = #tpu.dot_dimension_numbers<[1], [0], [0], [1], [0, 0, 1, 1], [], []>} : vector<16x64xbf16>, vector<64x16xbf16>, vector<16x16xf32> -> vector<16x16xf32>
    %c7_269 = arith.constant 7 : index
    %c0_270 = arith.constant 0 : index
    %c0_271 = arith.constant 0 : index
    %443 = vector.load %arg9[%c7_269, %c0_270, %c0_271] : memref<8x1x16xf32, #tpu.memory_space<vmem>>, vector<1x1x16xf32>
    %444 = vector.shape_cast %443 : vector<1x1x16xf32> to vector<1x16xf32>
    %445 = vector.broadcast %444 : vector<1x16xf32> to vector<16x16xf32>
    %446 = arith.addf %442, %445 : vector<16x16xf32>
    %c7_272 = arith.constant 7 : index
    %c0_273 = arith.constant 0 : index
    %c0_274 = arith.constant 0 : index
    %447 = vector.load %arg10[%c7_272, %c0_273, %c0_274] : memref<8x64x16xbf16, #tpu.memory_space<vmem>>, vector<1x64x16xbf16>
    %448 = vector.shape_cast %447 : vector<1x64x16xbf16> to vector<64x16xbf16>
    %cst_275 = arith.constant dense<0.000000e+00> : vector<16x16xf32>
    %449 = tpu.matmul %287, %448, %cst_275 {dimension_numbers = #tpu.dot_dimension_numbers<[1], [0], [0], [1], [0, 0, 1, 1], [], []>} : vector<16x64xbf16>, vector<64x16xbf16>, vector<16x16xf32> -> vector<16x16xf32>
    %c7_276 = arith.constant 7 : index
    %c0_277 = arith.constant 0 : index
    %c0_278 = arith.constant 0 : index
    %450 = vector.load %arg11[%c7_276, %c0_277, %c0_278] : memref<8x1x16xf32, #tpu.memory_space<vmem>>, vector<1x1x16xf32>
    %451 = vector.shape_cast %450 : vector<1x1x16xf32> to vector<1x16xf32>
    %452 = vector.broadcast %451 : vector<1x16xf32> to vector<16x16xf32>
    %453 = arith.addf %449, %452 : vector<16x16xf32>
    %cst_279 = arith.constant 2.500000e-01 : f32
    %454 = vector.broadcast %cst_279 : f32 to vector<16x16xf32>
    %455 = arith.mulf %439, %454 : vector<16x16xf32>
    %456 = vector.shape_cast %455 : vector<16x16xf32> to vector<2x8x16xf32>
    %457 = arith.truncf %456 : vector<2x8x16xf32> to vector<2x8x16xbf16>
    %458 = vector.shape_cast %446 : vector<16x16xf32> to vector<2x8x16xf32>
    %459 = arith.truncf %458 : vector<2x8x16xf32> to vector<2x8x16xbf16>
    %460 = vector.shape_cast %453 : vector<16x16xf32> to vector<2x8x16xf32>
    %461 = arith.truncf %460 : vector<2x8x16xf32> to vector<2x8x16xbf16>
    "tpu.trace_start"() <{level = 10 : i32, message = "bqd,bkd->bqk"}> : () -> ()
    %cst_280 = arith.constant dense<0.000000e+00> : vector<2x8x8xf32>
    %462 = tpu.matmul %457, %459, %cst_280 {dimension_numbers = #tpu.dot_dimension_numbers<[2], [2], [1], [1], [0, 0, 0, 1, 1, 1], [0], [0]>} : vector<2x8x16xbf16>, vector<2x8x16xbf16>, vector<2x8x8xf32> -> vector<2x8x8xf32>
    "tpu.trace_stop"() : () -> ()
    %cst_281 = arith.constant dense<0xFF800000> : vector<2x8xf32>
    %463 = vector.multi_reduction <maximumf>, %462, %cst_281 [2] : vector<2x8x8xf32> to vector<2x8xf32>
    %464 = vector.shape_cast %463 : vector<2x8xf32> to vector<2x8x1xf32>
    %465 = vector.broadcast %464 : vector<2x8x1xf32> to vector<2x8x8xf32>
    %466 = arith.subf %462, %465 : vector<2x8x8xf32>
    %467 = math.exp %466 : vector<2x8x8xf32>
    %cst_282 = arith.constant dense<0.000000e+00> : vector<2x8xf32>
    %468 = vector.multi_reduction <add>, %467, %cst_282 [2] : vector<2x8x8xf32> to vector<2x8xf32>
    %469 = vector.shape_cast %468 : vector<2x8xf32> to vector<2x8x1xf32>
    %470 = tpu.reciprocal %469 {approx = true} : vector<2x8x1xf32> -> vector<2x8x1xf32>
    %471 = vector.broadcast %470 : vector<2x8x1xf32> to vector<2x8x8xf32>
    %472 = arith.mulf %467, %471 : vector<2x8x8xf32>
    %473 = arith.truncf %472 : vector<2x8x8xf32> to vector<2x8x8xbf16>
    "tpu.trace_start"() <{level = 10 : i32, message = "bqk,bkd->bqd"}> : () -> ()
    %cst_283 = arith.constant dense<0.000000e+00> : vector<2x8x16xf32>
    %474 = tpu.matmul %473, %461, %cst_283 {dimension_numbers = #tpu.dot_dimension_numbers<[2], [1], [1], [2], [0, 0, 0, 1, 1, 2], [0], [0]>} : vector<2x8x8xbf16>, vector<2x8x16xbf16>, vector<2x8x16xf32> -> vector<2x8x16xf32>
    "tpu.trace_stop"() : () -> ()
    %475 = vector.shape_cast %474 : vector<2x8x16xf32> to vector<16x16xf32>
    %c7_284 = arith.constant 7 : index
    %c0_285 = arith.constant 0 : index
    %c0_286 = arith.constant 0 : index
    %476 = vector.load %arg12[%c7_284, %c0_285, %c0_286] : memref<8x16x64xbf16, #tpu.memory_space<vmem>>, vector<1x16x64xbf16>
    %477 = vector.shape_cast %476 : vector<1x16x64xbf16> to vector<16x64xbf16>
    %478 = arith.truncf %475 : vector<16x16xf32> to vector<16x16xbf16>
    %cst_287 = arith.constant dense<0.000000e+00> : vector<16x64xf32>
    %479 = tpu.matmul %478, %477, %cst_287 {dimension_numbers = #tpu.dot_dimension_numbers<[1], [0], [0], [1], [0, 0, 1, 1], [], []>} : vector<16x16xbf16>, vector<16x64xbf16>, vector<16x64xf32> -> vector<16x64xf32>
    %480 = arith.addf %432, %479 : vector<16x64xf32>
    %c1_288 = arith.constant 1 : index
    %c0_289 = arith.constant 0 : index
    %c0_290 = arith.constant 0 : index
    %481 = vector.load %arg13[%c1_288, %c0_289, %c0_290] : memref<2x1x64xf32, #tpu.memory_space<vmem>>, vector<1x1x64xf32>
    %482 = vector.shape_cast %481 : vector<1x1x64xf32> to vector<1x64xf32>
    %483 = vector.broadcast %482 : vector<1x64xf32> to vector<16x64xf32>
    %484 = arith.addf %480, %483 : vector<16x64xf32>
    %485 = arith.addf %286, %484 : vector<16x64xf32>
    %c1_291 = arith.constant 1 : index
    %c0_292 = arith.constant 0 : index
    %c0_293 = arith.constant 0 : index
    %486 = vector.load %arg14[%c1_291, %c0_292, %c0_293] : memref<2x1x64xf32, #tpu.memory_space<vmem>>, vector<1x1x64xf32>
    %487 = vector.shape_cast %486 : vector<1x1x64xf32> to vector<1x64xf32>
    %c1_294 = arith.constant 1 : index
    %c0_295 = arith.constant 0 : index
    %c0_296 = arith.constant 0 : index
    %488 = vector.load %arg15[%c1_294, %c0_295, %c0_296] : memref<2x1x64xf32, #tpu.memory_space<vmem>>, vector<1x1x64xf32>
    %489 = vector.shape_cast %488 : vector<1x1x64xf32> to vector<1x64xf32>
    %cst_297 = arith.constant dense<0.000000e+00> : vector<16xf32>
    %490 = vector.multi_reduction <add>, %485, %cst_297 [1] : vector<16x64xf32> to vector<16xf32>
    %491 = vector.shape_cast %490 : vector<16xf32> to vector<16x1xf32>
    %cst_298 = arith.constant 6.400000e+01 : f32
    %492 = vector.broadcast %cst_298 : f32 to vector<16x1xf32>
    %493 = arith.divf %491, %492 : vector<16x1xf32>
    %494 = arith.mulf %485, %485 : vector<16x64xf32>
    %cst_299 = arith.constant dense<0.000000e+00> : vector<16xf32>
    %495 = vector.multi_reduction <add>, %494, %cst_299 [1] : vector<16x64xf32> to vector<16xf32>
    %496 = vector.shape_cast %495 : vector<16xf32> to vector<16x1xf32>
    %cst_300 = arith.constant 6.400000e+01 : f32
    %497 = vector.broadcast %cst_300 : f32 to vector<16x1xf32>
    %498 = arith.divf %496, %497 : vector<16x1xf32>
    %499 = arith.mulf %493, %493 : vector<16x1xf32>
    %500 = arith.subf %498, %499 : vector<16x1xf32>
    %501 = vector.broadcast %493 : vector<16x1xf32> to vector<16x64xf32>
    %502 = arith.subf %485, %501 : vector<16x64xf32>
    %cst_301 = arith.constant 9.99999974E-6 : f32
    %503 = vector.broadcast %cst_301 : f32 to vector<16x1xf32>
    %504 = arith.addf %500, %503 : vector<16x1xf32>
    %505 = math.rsqrt %504 : vector<16x1xf32>
    %506 = vector.broadcast %505 : vector<16x1xf32> to vector<16x64xf32>
    %507 = arith.mulf %502, %506 : vector<16x64xf32>
    %508 = vector.broadcast %487 : vector<1x64xf32> to vector<16x64xf32>
    %509 = arith.mulf %507, %508 : vector<16x64xf32>
    %510 = vector.broadcast %489 : vector<1x64xf32> to vector<16x64xf32>
    %511 = arith.addf %509, %510 : vector<16x64xf32>
    %c1_302 = arith.constant 1 : index
    %c0_303 = arith.constant 0 : index
    %c0_304 = arith.constant 0 : index
    %512 = vector.load %arg16[%c1_302, %c0_303, %c0_304] : memref<2x64x256xbf16, #tpu.memory_space<vmem>>, vector<1x64x256xbf16>
    %513 = vector.shape_cast %512 : vector<1x64x256xbf16> to vector<64x256xbf16>
    %514 = arith.truncf %511 : vector<16x64xf32> to vector<16x64xbf16>
    %cst_305 = arith.constant dense<0.000000e+00> : vector<16x256xf32>
    %515 = tpu.matmul %514, %513, %cst_305 {dimension_numbers = #tpu.dot_dimension_numbers<[1], [0], [0], [1], [0, 0, 1, 1], [], []>} : vector<16x64xbf16>, vector<64x256xbf16>, vector<16x256xf32> -> vector<16x256xf32>
    %c1_306 = arith.constant 1 : index
    %c0_307 = arith.constant 0 : index
    %c0_308 = arith.constant 0 : index
    %516 = vector.load %arg17[%c1_306, %c0_307, %c0_308] : memref<2x1x256xf32, #tpu.memory_space<vmem>>, vector<1x1x256xf32>
    %517 = vector.shape_cast %516 : vector<1x1x256xf32> to vector<1x256xf32>
    %518 = vector.broadcast %517 : vector<1x256xf32> to vector<16x256xf32>
    %519 = arith.addf %515, %518 : vector<16x256xf32>
    %cst_309 = arith.constant 0.000000e+00 : f32
    %520 = vector.broadcast %cst_309 : f32 to vector<16x256xf32>
    %521 = arith.maximumf %519, %520 : vector<16x256xf32>
    %c1_310 = arith.constant 1 : index
    %c0_311 = arith.constant 0 : index
    %c0_312 = arith.constant 0 : index
    %522 = vector.load %arg18[%c1_310, %c0_311, %c0_312] : memref<2x256x64xbf16, #tpu.memory_space<vmem>>, vector<1x256x64xbf16>
    %523 = vector.shape_cast %522 : vector<1x256x64xbf16> to vector<256x64xbf16>
    %524 = arith.truncf %521 : vector<16x256xf32> to vector<16x256xbf16>
    %cst_313 = arith.constant dense<0.000000e+00> : vector<16x64xf32>
    %525 = tpu.matmul %524, %523, %cst_313 {dimension_numbers = #tpu.dot_dimension_numbers<[1], [0], [0], [1], [0, 0, 1, 1], [], []>} : vector<16x256xbf16>, vector<256x64xbf16>, vector<16x64xf32> -> vector<16x64xf32>
    %c1_314 = arith.constant 1 : index
    %c0_315 = arith.constant 0 : index
    %c0_316 = arith.constant 0 : index
    %526 = vector.load %arg19[%c1_314, %c0_315, %c0_316] : memref<2x1x64xf32, #tpu.memory_space<vmem>>, vector<1x1x64xf32>
    %527 = vector.shape_cast %526 : vector<1x1x64xf32> to vector<1x64xf32>
    %528 = vector.broadcast %527 : vector<1x64xf32> to vector<16x64xf32>
    %529 = arith.addf %525, %528 : vector<16x64xf32>
    %530 = arith.addf %511, %529 : vector<16x64xf32>
    %c1_317 = arith.constant 1 : index
    %c0_318 = arith.constant 0 : index
    %c0_319 = arith.constant 0 : index
    %531 = vector.load %arg20[%c1_317, %c0_318, %c0_319] : memref<2x1x64xf32, #tpu.memory_space<vmem>>, vector<1x1x64xf32>
    %532 = vector.shape_cast %531 : vector<1x1x64xf32> to vector<1x64xf32>
    %c1_320 = arith.constant 1 : index
    %c0_321 = arith.constant 0 : index
    %c0_322 = arith.constant 0 : index
    %533 = vector.load %arg21[%c1_320, %c0_321, %c0_322] : memref<2x1x64xf32, #tpu.memory_space<vmem>>, vector<1x1x64xf32>
    %534 = vector.shape_cast %533 : vector<1x1x64xf32> to vector<1x64xf32>
    %cst_323 = arith.constant dense<0.000000e+00> : vector<16xf32>
    %535 = vector.multi_reduction <add>, %530, %cst_323 [1] : vector<16x64xf32> to vector<16xf32>
    %536 = vector.shape_cast %535 : vector<16xf32> to vector<16x1xf32>
    %cst_324 = arith.constant 6.400000e+01 : f32
    %537 = vector.broadcast %cst_324 : f32 to vector<16x1xf32>
    %538 = arith.divf %536, %537 : vector<16x1xf32>
    %539 = arith.mulf %530, %530 : vector<16x64xf32>
    %cst_325 = arith.constant dense<0.000000e+00> : vector<16xf32>
    %540 = vector.multi_reduction <add>, %539, %cst_325 [1] : vector<16x64xf32> to vector<16xf32>
    %541 = vector.shape_cast %540 : vector<16xf32> to vector<16x1xf32>
    %cst_326 = arith.constant 6.400000e+01 : f32
    %542 = vector.broadcast %cst_326 : f32 to vector<16x1xf32>
    %543 = arith.divf %541, %542 : vector<16x1xf32>
    %544 = arith.mulf %538, %538 : vector<16x1xf32>
    %545 = arith.subf %543, %544 : vector<16x1xf32>
    %546 = vector.broadcast %538 : vector<16x1xf32> to vector<16x64xf32>
    %547 = arith.subf %530, %546 : vector<16x64xf32>
    %cst_327 = arith.constant 9.99999974E-6 : f32
    %548 = vector.broadcast %cst_327 : f32 to vector<16x1xf32>
    %549 = arith.addf %545, %548 : vector<16x1xf32>
    %550 = math.rsqrt %549 : vector<16x1xf32>
    %551 = vector.broadcast %550 : vector<16x1xf32> to vector<16x64xf32>
    %552 = arith.mulf %547, %551 : vector<16x64xf32>
    %553 = vector.broadcast %532 : vector<1x64xf32> to vector<16x64xf32>
    %554 = arith.mulf %552, %553 : vector<16x64xf32>
    %555 = vector.broadcast %534 : vector<1x64xf32> to vector<16x64xf32>
    %556 = arith.addf %554, %555 : vector<16x64xf32>
    %c0_328 = arith.constant 0 : index
    %c0_329 = arith.constant 0 : index
    %557 = vector.load %arg22[%c0_328, %c0_329] : memref<64x32xbf16, #tpu.memory_space<vmem>>, vector<64x32xbf16>
    %558 = arith.truncf %556 : vector<16x64xf32> to vector<16x64xbf16>
    %cst_330 = arith.constant dense<0.000000e+00> : vector<16x32xf32>
    %559 = tpu.matmul %558, %557, %cst_330 {dimension_numbers = #tpu.dot_dimension_numbers<[1], [0], [0], [1], [0, 0, 1, 1], [], []>} : vector<16x64xbf16>, vector<64x32xbf16>, vector<16x32xf32> -> vector<16x32xf32>
    %c0_331 = arith.constant 0 : index
    %c0_332 = arith.constant 0 : index
    %560 = vector.load %arg23[%c0_331, %c0_332] : memref<1x32xf32, #tpu.memory_space<vmem>>, vector<1x32xf32>
    %561 = vector.broadcast %560 : vector<1x32xf32> to vector<16x32xf32>
    %562 = arith.addf %559, %561 : vector<16x32xf32>
    %cst_333 = arith.constant 0.000000e+00 : f32
    %563 = vector.broadcast %cst_333 : f32 to vector<16x32xf32>
    %564 = arith.maximumf %562, %563 : vector<16x32xf32>
    %c0_334 = arith.constant 0 : index
    %c0_335 = arith.constant 0 : index
    %565 = vector.load %arg24[%c0_334, %c0_335] : memref<32x128xbf16, #tpu.memory_space<vmem>>, vector<32x128xbf16>
    %566 = arith.truncf %564 : vector<16x32xf32> to vector<16x32xbf16>
    %cst_336 = arith.constant dense<0.000000e+00> : vector<16x128xf32>
    %567 = tpu.matmul %566, %565, %cst_336 {dimension_numbers = #tpu.dot_dimension_numbers<[1], [0], [0], [1], [0, 0, 1, 1], [], []>} : vector<16x32xbf16>, vector<32x128xbf16>, vector<16x128xf32> -> vector<16x128xf32>
    %c0_337 = arith.constant 0 : index
    %c0_338 = arith.constant 0 : index
    %568 = vector.load %arg25[%c0_337, %c0_338] : memref<1x128xf32, #tpu.memory_space<vmem>>, vector<1x128xf32>
    %569 = vector.broadcast %568 : vector<1x128xf32> to vector<16x128xf32>
    %570 = arith.addf %567, %569 : vector<16x128xf32>
    %cst_339 = arith.constant dense<0xFF800000> : vector<16xf32>
    %571 = vector.multi_reduction <maximumf>, %570, %cst_339 [1] : vector<16x128xf32> to vector<16xf32>
    %572 = vector.shape_cast %571 : vector<16xf32> to vector<16x1xf32>
    %573 = vector.broadcast %572 : vector<16x1xf32> to vector<16x128xf32>
    %574 = arith.subf %570, %573 : vector<16x128xf32>
    %575 = math.exp %574 : vector<16x128xf32>
    %cst_340 = arith.constant dense<0.000000e+00> : vector<16xf32>
    %576 = vector.multi_reduction <add>, %575, %cst_340 [1] : vector<16x128xf32> to vector<16xf32>
    %577 = vector.shape_cast %576 : vector<16xf32> to vector<16x1xf32>
    %578 = vector.broadcast %577 : vector<16x1xf32> to vector<16x128xf32>
    %579 = arith.divf %575, %578 : vector<16x128xf32>
    %c0_341 = arith.constant 0 : index
    %c0_342 = arith.constant 0 : index
    %580 = vector.load %arg26[%c0_341, %c0_342] : memref<16x128xf32, #tpu.memory_space<vmem>>, vector<16x128xf32>
    tpu.vector_store %arg26[%c0_341, %c0_342], %579 {strides = array<i32>} : memref<16x128xf32, #tpu.memory_space<vmem>>, vector<16x128xf32>,
    return
  }
}

</mosaic_0001>

<bundles_post_ra>
// kernel: tpu_custom_call.1
= control target key start
LH: loop header
LB: loop body
LE: loop exit
PB: predicated region body
PF: predicated region fallthrough
CT: control target
= control target key end

     0   :  { %s8318_s0 = inlined_call_operand.vmem [shape: f32[16,10], index: 0, kind: input, shape index: {}]   ;;  %s8319_s1 = inlined_call_operand.vmem [shape: f32[16,64], index: 1, kind: input, shape index: {}]   ;;  %s8320_s2 = inlined_call_operand.vmem [shape: bf16[10,32], index: 2, kind: input, shape index: {}]   ;;  %s8321_s3 = inlined_call_operand.vmem [shape: f32[1,32], index: 3, kind: input, shape index: {}]   ;;  %s8322_s4 = inlined_call_operand.vmem [shape: bf16[32,64], index: 4, kind: input, shape index: {}]   ;;  %s8323_s5 = inlined_call_operand.vmem [shape: f32[1,64], index: 5, kind: input, shape index: {}]   ;;  %s8324_s6 = inlined_call_operand.vmem [shape: bf16[8,64,16], index: 6, kind: input, shape index: {}]   ;;  %s8325_s7 = inlined_call_operand.vmem [shape: f32[8,1,16], index: 7, kind: input, shape index: {}]   ;;  %s8326_s8 = inlined_call_operand.vmem [shape: bf16[8,64,16], index: 8, kind: input, shape index: {}]   ;;  %s8327_s9 = inlined_call_operand.vmem [shape: f32[8,1,16], index: 9, kind: input, shape index: {}]   ;;  %s8328_s10 = inlined_call_operand.vmem [shape: bf16[8,64,16], index: 10, kind: input, shape index: {}]   ;;  %s8329_s11 = inlined_call_operand.vmem [shape: f32[8,1,16], index: 11, kind: input, shape index: {}]   ;;  %s8330_s12 = inlined_call_operand.vmem [shape: bf16[8,16,64], index: 12, kind: input, shape index: {}]   ;;  %s8331_s13 = inlined_call_operand.vmem [shape: f32[2,1,64], index: 13, kind: input, shape index: {}]   ;;  %s8332_s14 = inlined_call_operand.vmem [shape: f32[2,1,64], index: 14, kind: input, shape index: {}]   ;;  %s8333_s15 = inlined_call_operand.vmem [shape: f32[2,1,64], index: 15, kind: input, shape index: {}]   ;;  %s8334_s16 = inlined_call_operand.vmem [shape: bf16[2,64,256], index: 16, kind: input, shape index: {}]   ;;  %s8335_s17 = inlined_call_operand.vmem [shape: f32[2,1,256], index: 17, kind: input, shape index: {}]   ;;  %s8336_s18 = inlined_call_operand.vmem [shape: bf16[2,256,64], index: 18, kind: input, shape index: {}]   ;;  %s8337_s19 = inlined_call_operand.vmem [shape: f32[2,1,64], index: 19, kind: input, shape index: {}]   ;;  %s8338_s20 = inlined_call_operand.vmem [shape: f32[2,1,64], index: 20, kind: input, shape index: {}]   ;;  %s8339_s21 = inlined_call_operand.vmem [shape: f32[2,1,64], index: 21, kind: input, shape index: {}]   ;;  %s8340_s22 = inlined_call_operand.vmem [shape: bf16[64,32], index: 22, kind: input, shape index: {}]   ;;  %s8341_s23 = inlined_call_operand.vmem [shape: f32[1,32], index: 23, kind: input, shape index: {}]   ;;  %s8342_s24 = inlined_call_operand.vmem [shape: bf16[32,128], index: 24, kind: input, shape index: {}]   ;;  %s8343_s25 = inlined_call_operand.vmem [shape: f32[1,128], index: 25, kind: input, shape index: {}]   ;;  %s8344_s26 = inlined_call_operand.hbm [shape: f32[16,128], index: 26, kind: output, shape index: {}]  }
   0x1   :  { %8353 = sst [smem:[#allocation5_spill]] %s8318_s0 }
   0x2   :  { %8354 = sst [smem:[#allocation6_spill]] %s8319_s1 }
   0x3   :  { %8355 = sst [smem:[#allocation7_spill]] %s8320_s2 }
   0x4   :  { %8356 = sst [smem:[#allocation8_spill]] %s8321_s3 }
   0x5   :  { %8357 = sst [smem:[#allocation9_spill]] %s8322_s4 }
   0x6   :  { %8358 = sst [smem:[#allocation10_spill]] %s8323_s5 }
   0x7   :  { %8359 = sst [smem:[#allocation11_spill]] %s8324_s6 }
   0x8   :  { %8360 = sst [smem:[#allocation12_spill]] %s8325_s7 }
   0x9   :  { %8361 = sst [smem:[#allocation13_spill]] %s8326_s8 }
   0xa   :  { %8362 = sst [smem:[#allocation14_spill]] %s8327_s9 }
   0xb   :  { %8363 = sst [smem:[#allocation15_spill]] %s8328_s10 }
   0xc   :  { %vm106_vm0 = vcmask 1044480   ;;  %v6990_v0 = vmov 0.0   ;;  %s8364_s7 = sld [smem:[#allocation7_spill]]  ;;  %s8365_s4 = sld [smem:[#allocation5_spill]]  ;;  %vm6991_vm1 = vmmov 0   ;;  %vm102_vm2 = vcmask 80896  }
   0xd   :  { %6141 = vmatprep.subr.bf16.mxu0 %v6990_v0  ;;  %6147 = vmatprep.subr.bf16.mxu1 %v6990_v0  ;;  %s8366_s2 = sld [smem:[#allocation9_spill]]  ;;  %s8367_s27 = sld [smem:[#allocation11_spill]] }
   0xe   :  { %6143 = vmatprep.mubr.msk.bf16.mxu0 %vm6991_vm1, %v6990_v0  ;;  %6151 = vmatprep.mubr.msk.bf16.mxu1 %vm6991_vm1, %v6990_v0 }
  0x12   :  { %v6709_v1 = vld [vmem:[%s8364_s7] sm:$0x1f]   ;;  %v86_v3 = vld [vmem:[%s8365_s4 + $0x8] sm:$0xff] }
  0x13   :  { %v85_v2 = vld [vmem:[%s8365_s4] sm:$0xff]  ;;  %v108_v4 = vsel %vm106_vm0, %v6709_v1, 0  ;;  %v6711_v7 = vld [vmem:[%s8366_s2 + $0x8] sm:$0xff]  }
  0x14   :  { %v89_v5 = vpack.c.bf16 %v86_v3, %v85_v2  ;;  %6142 = vmatpush3.bf16.msra.mxu0 %v108_v4  ;;  %v6710_v6 = vld [vmem:[%s8366_s2] sm:$0xff]   ;;  %v6714_v9 = vld [vmem:[%s8367_s27 + $0x8] sm:$0xff]  }
  0x15   :  { %6155 = vmatprep.subr.bf16.mxu0 %v6990_v0  ;;  %6148 = vmatpush3.bf16.msra.mxu1 %v6710_v6  ;;  %v6712_v8 = vld [vmem:[%s8367_s27] sm:$0xff]  }
  0x16   :  { %6149 = vmatprep.subr.bf16.mxu1 %v6990_v0 }
  0x17   :  { %6144 = vmatmul.mubr.msk.bf16.vlgmr.msra.gmra.mrb[0].mxu0 %vm102_vm2, %v89_v5 }
  0x18   :  { %6163 = vmatprep.mubr.msk.bf16.mxu0 %vm6991_vm1, %v6990_v0  ;;  %6156 = vmatpush3.bf16.msra.mxu0 %v6712_v8 }
  0x19   :  { %6150 = vmatpush3.bf16.msra.mxu1 %v6711_v7  ;;  %6157 = vmatprep.subr.bf16.mxu0 %v6990_v0 }
  0x1a   :  { %6167 = vmatprep.subr.bf16.mxu1 %v6990_v0 }
  0x1c   :  { %6158 = vmatpush3.bf16.msra.mxu0 %v6714_v9 }
  0x1d   :  { %6159 = vmatprep.subr.bf16.mxu0 %v6990_v0 }
  0x1e   :  { %31 = vsyncpa [#allocation3], 0  ;;  %s8368_s4 = sld [smem:[#allocation8_spill]]  ;;  %vm177_vm3 = vcmask 261120   ;;  %s8369_s9 = sld [smem:[#allocation13_spill]]  ;;  %v6716_v22 = vld [vmem:[%s8367_s27 + $0x10] sm:$0xff]  }
  0x1f   :  { %v6718_v24 = vld [vmem:[%s8367_s27 + $0x18] sm:$0xff]   ;;  %s8370_s0 = sld [smem:[#allocation10_spill]]  ;;  %s8371_s5 = sld [smem:[#allocation6_spill]]  ;;  %vm266_vm4 = vcmask 523264   ;;  %vm479_vm5 = vcmask 130048   ;;  %vm600_vm6 = vcmask 1043456  }
  0x20   :  { %6160 = vmatpush3.bf16.msra.mxu0 %v6716_v22  ;;  %s8372_s7 = sld [smem:[#allocation15_spill]]  ;;  %s8373_s10 = sld [smem:[#allocation14_spill]]  ;;  %v5382_v62 = vld [vmem:[%s8329_s11] ss:$0 sm:$0xff]  ;;  %vm572_vm7 = vcmask 64512  }
  0x21   :  { %6161 = vmatprep.subr.bf16.mxu0 %v6990_v0  ;;  %s8374_s3 = sld [smem:[#allocation12_spill]] }
  0x24   :  { %v5363_v10 = vld [vmem:[%s8368_s4] ss:$0 sm:$0xff]  ;;  %v6715_v21 = vld [vmem:[%s8369_s9 + $0x8] sm:$0xff]   ;;  %v6717_v23 = vld [vmem:[%s8369_s9 + $0x10] sm:$0xff]   ;;  %6162 = vmatpush3.bf16.msra.mxu0 %v6718_v24 }
  0x25   :  { %v6713_v19 = vld [vmem:[%s8369_s9] sm:$0xff]   ;;  %v6719_v25 = vld [vmem:[%s8369_s9 + $0x18] sm:$0xff]   ;;  %6179 = vmatprep.subr.bf16.mxu0 %v6990_v0  ;;  %v223_v32 = vld [vmem:[%s8371_s5 + $0x8] sm:$0xff] }
  0x26   :  { %v5366_v26 = vld [vmem:[%s8370_s0] ss:$0 sm:$0xff]  ;;  %v6721_v39 = vld [vmem:[%s8372_s7 + $0x8] sm:$0xff]   ;;  %v6722_v40 = vld [vmem:[%s8372_s7 + $0x10] sm:$0xff]  }
  0x27   :  { %v222_v30 = vld [vmem:[%s8371_s5] sm:$0xff]  ;;  %v6723_v41 = vld [vmem:[%s8372_s7 + $0x18] sm:$0xff]  }
  0x28   :  { %v6720_v37 = vld [vmem:[%s8372_s7] sm:$0xff]  }
  0x29   :  { %v5376_v42 = vld [vmem:[%s8373_s10] ss:$0 sm:$0xff] }
  0x2a   :  { %v5370_v43 = vld [vmem:[%s8374_s3] ss:$0 sm:$0xff] }
  0xea   :  { %v144_v11 = vpop.f32.mrb[0].mxu0 }
  0xeb   :  { %v145_v12 = vadd.f32 %v5363_v10, %v144_v11  ;;  %v6145_v13 = vpop.f32.mrb[1].mxu0 }
  0xec   :  { %v147_v14 = vpop.f32.mrb[2].mxu0 }
  0xed   :  { %v148_v15 = vadd.f32 %v5363_v10, %v147_v14  ;;  %v6146_v16 = vpop.f32.mrb[3].mxu0  ;;  %v151_v17 = vmax.f32 %v145_v12, 0.0 }
  0xef   :  { %v152_v18 = vmax.f32 %v148_v15, 0.0 }
  0xf1   :  { %v157_v20 = vpack.c.bf16 %v152_v18, %v151_v17 }
  0xf3   :  { %6152 = vmatmul.mubr.msk.bf16.vlgmr.msra.gmra.mrb[0].mxu1 %vm177_vm3, %v157_v20 }
  0xf4   :  { %6168 = vmatpush3.bf16.msra.mxu1 %v6713_v19  ;;  %6175 = vmatprep.mubr.msk.bf16.mxu1 %vm6991_vm1, %v6990_v0 }
  0xf5   :  { %6169 = vmatprep.subr.bf16.mxu1 %v6990_v0 }
  0xf8   :  { %6170 = vmatpush3.bf16.msra.mxu1 %v6715_v21 }
  0xf9   :  { %6171 = vmatprep.subr.bf16.mxu1 %v6990_v0 }
  0xfc   :  { %6172 = vmatpush3.bf16.msra.mxu1 %v6717_v23 }
  0xfd   :  { %6173 = vmatprep.subr.bf16.mxu1 %v6990_v0 }
 0x100   :  { %6174 = vmatpush3.bf16.msra.mxu1 %v6719_v25 }
 0x101   :  { %6191 = vmatprep.subr.bf16.mxu1 %v6990_v0 }
 0x1c6   :  { %v215_v27 = vpop.f32.mrb[0].mxu1 }
 0x1c7   :  { %v216_v28 = vadd.f32 %v5366_v26, %v215_v27  ;;  %v6153_v29 = vpop.f32.mrb[1].mxu1 }
 0x1c8   :  { %v218_v31 = vpop.f32.mrb[2].mxu1 }
 0x1c9   :  { %v219_v33 = vadd.f32 %v5366_v26, %v218_v31  ;;  %v6154_v34 = vpop.f32.mrb[3].mxu1  ;;  %v7204_v35 = vadd.f32 %v222_v30, %v216_v28 }
 0x1cb   :  { %v7206_v36 = vadd.f32 %v223_v32, %v219_v33 }
 0x1cd   :  { %v7213_v38 = vpack.c.bf16 %v7206_v36, %v7204_v35 }
 0x1cf   :  { %6164 = vmatmul.mubr.msk.bf16.vlgmr.msra.gmra.mrb[4].mxu0 %vm266_vm4, %v7213_v38  ;;  %6176 = vmatmul.mubr.msk.bf16.vlgmr.msra.gmra.mrb[4].mxu1 %vm266_vm4, %v7213_v38 }
 0x1d0   :  { %6180 = vmatpush3.bf16.msra.mxu0 %v6720_v37  ;;  %6187 = vmatprep.mubr.msk.bf16.mxu0 %vm6991_vm1, %v6990_v0 }
 0x1d1   :  { %6181 = vmatprep.subr.bf16.mxu0 %v6990_v0  ;;  %6193 = vmatprep.mubr.msk.bf16.mxu1 %vm6991_vm1, %v6990_v0 }
 0x1d4   :  { %6182 = vmatpush3.bf16.msra.mxu0 %v6721_v39  ;;  %v6724_v39 = vld [vmem:[%s8369_s9 + $0x20] sm:$0xff]  }
 0x1d5   :  { %6183 = vmatprep.subr.bf16.mxu0 %v6990_v0 }
 0x1d8   :  { %6184 = vmatpush3.bf16.msra.mxu0 %v6722_v40 }
 0x1d9   :  { %6185 = vmatprep.subr.bf16.mxu0 %v6990_v0 }
 0x1dc   :  { %6186 = vmatpush3.bf16.msra.mxu0 %v6723_v41 }
 0x1dd   :  { %6203 = vmatprep.subr.bf16.mxu0 %v6990_v0 }
 0x1df   :  { %6188 = vmatmul.mubr.msk.bf16.vlgmr.msra.gmra.mrb[8].mxu0 %vm266_vm4, %v7213_v38 }
 0x1e0   :  { %6205 = vmatprep.mubr.msk.bf16.mxu0 %vm6991_vm1, %v6990_v0 }
 0x2a2   :  { %v304_v44 = vpop.f32.mrb[4].mxu0  ;;  %v384_v45 = vpop.f32.mrb[4].mxu1 }
 0x2a3   :  { %v385_v46 = vadd.f32 %v5376_v42, %v384_v45  ;;  %v6165_v47 = vpop.f32.mrb[5].mxu0  ;;  %v6177_v48 = vpop.f32.mrb[5].mxu1  ;;  %v305_v51 = vadd.f32 %v5370_v43, %v304_v44  ;;  %v6726_v44 = vld [vmem:[%s8369_s9 + $0x28] sm:$0xff]  }
 0x2a4   :  { %v307_v49 = vpop.f32.mrb[6].mxu0  ;;  %v387_v50 = vpop.f32.mrb[6].mxu1  ;;  %v6728_v47 = vld [vmem:[%s8369_s9 + $0x30] sm:$0xff]  }
 0x2a5   :  { %v475_v52 = vpack.c.bf16 %v385_v46, %v385_v46  ;;  %v6166_v53 = vpop.f32.mrb[7].mxu0  ;;  %v6178_v54 = vpop.f32.mrb[7].mxu1  ;;  %v388_v56 = vadd.f32 %v5376_v42, %v387_v50  ;;  %v471_v57 = vmul.f32 0.25, %v305_v51  ;;  %v308_v60 = vadd.f32 %v5370_v43, %v307_v49  ;;  %v6725_v43 = vld [vmem:[%s8367_s27 + $0x20] sm:$0xff]   ;;  %v6727_v46 = vld [vmem:[%s8367_s27 + $0x28] sm:$0xff]   ;;  %v6729_v48 = vld [vmem:[%s8367_s27 + $0x30] sm:$0xff]  }
 0x2a6   :  { %v6730_v49 = vld [vmem:[%s8369_s9 + $0x38] sm:$0xff]   ;;  %v6732_v51 = vld [vmem:[%s8372_s7 + $0x20] sm:$0xff]   ;;  %v6734_v53 = vld [vmem:[%s8372_s7 + $0x30] sm:$0xff]  }
 0x2a7   :  { %v484_v55 = vsel %vm479_vm5, %v475_v52, 0  ;;  %v476_v58 = vpack.c.bf16 %v388_v56, %v388_v56  ;;  %v473_v59 = vpack.c.bf16 %v471_v57, %v471_v57  ;;  %v472_v63 = vmul.f32 0.25, %v308_v60  ;;  %v6731_v50 = vld [vmem:[%s8367_s27 + $0x38] sm:$0xff]   ;;  %v6733_v52 = vld [vmem:[%s8372_s7 + $0x28] sm:$0xff]  }
 0x2a8   :  { %6192 = vmatpush3.bf16.xpose.msra.mxu1 %v484_v55  ;;  %v6735_v54 = vld [vmem:[%s8372_s7 + $0x38] sm:$0xff]  }
 0x2a9   :  { %6197 = vmatprep.subr.bf16.mxu1 %v6990_v0  ;;  %v530_v61 = vsel %vm479_vm5, %v476_v58, 0  ;;  %v474_v5 = vpack.c.bf16 %v472_v63, %v472_v63 }
 0x2af   :  { %6194 = vmatmul.mubr.msk.bf16.vlgmr.msra.gmra.mrb[8].mxu1 %vm479_vm5, %v473_v59 }
 0x2b0   :  { %6198 = vmatpush3.bf16.xpose.msra.mxu1 %v530_v61  ;;  %6199 = vmatprep.mubr.msk.bf16.mxu1 %vm6991_vm1, %v6990_v0 }
 0x2b1   :  { %6209 = vmatprep.subr.bf16.mxu1 %v6990_v0 }
 0x2b2   :  { %v464_v1 = vpop.f32.mrb[8].mxu0 }
 0x2b3   :  { %v465_v2 = vadd.f32 %v5382_v62, %v464_v1  ;;  %v6189_v3 = vpop.f32.mrb[9].mxu0  ;;  %v5416_v1 = vld [vmem:[%s8373_s10 + $0x1] ss:$0 sm:$0xff] }
 0x2b4   :  { %v467_v4 = vpop.f32.mrb[10].mxu0 }
 0x2b5   :  { %v477_v6 = vpack.c.bf16 %v465_v2, %v465_v2  ;;  %v468_v7 = vadd.f32 %v5382_v62, %v467_v4  ;;  %v6190_v8 = vpop.f32.mrb[11].mxu0 }
 0x2b7   :  { %v602_v9 = vsel %vm600_vm6, %v477_v6, 0  ;;  %v478_v10 = vpack.c.bf16 %v468_v7, %v468_v7  ;;  %6200 = vmatmul.mubr.msk.bf16.vlgmr.msra.gmra.mrb[12].mxu1 %vm479_vm5, %v474_v5  ;;  %v5401_v6 = vld [vmem:[%s8374_s3 + $0x1] ss:$0 sm:$0xff] }
 0x2b8   :  { %6204 = vmatpush3.bf16.msra.mxu0 %v602_v9  ;;  %6211 = vmatprep.mubr.msk.bf16.mxu1 %vm6991_vm1, %v6990_v0 }
 0x2b9   :  { %v648_v11 = vsel %vm600_vm6, %v478_v10, 0  ;;  %6215 = vmatprep.subr.bf16.mxu0 %v6990_v0 }
 0x2ba   :  { %6210 = vmatpush3.bf16.msra.mxu1 %v648_v11 }
 0x2bb   :  { %6227 = vmatprep.subr.bf16.mxu1 %v6990_v0 }
 0x382   :  { %v520_v12 = vpop.f32.mrb[8].mxu1 }
 0x383   :  { %v6195_v13 = vpop.f32.mrb[9].mxu1  ;;  %v573_v21 = vsel %vm572_vm7, %v520_v12, -inf }
 0x384   :  { %v523_v14 = vpop.f32.mrb[10].mxu1 }
 0x385   :  { %v6196_v15 = vpop.f32.mrb[11].mxu1 }
 0x38a   :  { %v566_v16 = vpop.f32.mrb[12].mxu1 }
 0x38b   :  { %v6201_v17 = vpop.f32.mrb[13].mxu1  ;;  %v576_v18 = vsel %vm572_vm7, %v566_v16, -inf }
 0x38c   :  { %577 = vmax.xlane.f32.xlu0 %v576_v18  ;;  %v569_v19 = vpop.f32.mrb[14].mxu1 }
 0x38d   :  { %v6202_v20 = vpop.f32.mrb[15].mxu1 }
 0x390   :  { %574 = vmax.xlane.f32.xlu0 %v573_v21 }
 0x419   :  { %v578_v22 = vpop.xlane.xlu0 %577 }
 0x41a   :  { %v580_v23 = vsub.f32 %v566_v16, %v578_v22  ;;  %v5431_v22 = vld [vmem:[%s8329_s11 + $0x1] ss:$0 sm:$0xff] }
 0x41c   :  { %v583_v24 = vmul.f32 1.442695, %v580_v23 }
 0x41d   :  { %v575_v25 = vpop.xlane.xlu0 %574 }
 0x41e   :  { %6878 = vpow2.f32 %v583_v24  ;;  %v579_v26 = vsub.f32 %v520_v12, %v575_v25 }
 0x420   :  { %v581_v27 = vmul.f32 1.442695, %v579_v26 }
 0x422   :  { %6880 = vpow2.f32 %v581_v27 }
 0x428   :  { %v6879_v28 = vpop.eup %6878 }
 0x429   :  { %v588_v29 = vsel %vm572_vm7, %v6879_v28, 0.0 }
 0x42a   :  { %589 = vadd.xlane.f32.xlu1 %v588_v29 }
 0x42c   :  { %v6881_v30 = vpop.eup %6880 }
 0x42d   :  { %v585_v31 = vsel %vm572_vm7, %v6881_v30, 0.0 }
 0x42e   :  { %586 = vadd.xlane.f32.xlu1 %v585_v31 }
 0x4b7   :  { %v590_v32 = vpop.xlane.xlu1 %589 }
 0x4b8   :  { %6882 = vrcp.f32 %v590_v32 }
 0x4bb   :  { %v587_v33 = vpop.xlane.xlu1 %586 }
 0x4bc   :  { %6884 = vrcp.f32 %v587_v33 }
 0x4c2   :  { %v6883_v34 = vpop.eup %6882 }
 0x4c3   :  { %v594_v37 = vmul.f32 %v6883_v34, %v6879_v28 }
 0x4c5   :  { %v596_v40 = vpack.c.bf16 %v594_v37, %v594_v37 }
 0x4c6   :  { %v6885_v41 = vpop.eup %6884 }
 0x4c7   :  { %v593_v42 = vmul.f32 %v6885_v41, %v6881_v30  ;;  %6212 = vmatmul.mubr.msk.bf16.vlgmr.msra.gmra.mrb[16].mxu1 %vm572_vm7, %v596_v40 }
 0x4c8   :  { %6228 = vmatpush3.bf16.msra.mxu1 %v6724_v39  ;;  %6235 = vmatprep.mubr.msk.bf16.mxu1 %vm6991_vm1, %v6990_v0 }
 0x4c9   :  { %6229 = vmatprep.subr.bf16.mxu1 %v6990_v0  ;;  %v595_v45 = vpack.c.bf16 %v593_v42, %v593_v42 }
 0x4cb   :  { %6206 = vmatmul.mubr.msk.bf16.vlgmr.msra.gmra.mrb[12].mxu0 %vm572_vm7, %v595_v45 }
 0x4cc   :  { %6216 = vmatpush3.bf16.msra.mxu0 %v6725_v43  ;;  %6230 = vmatpush3.bf16.msra.mxu1 %v6726_v44 }
 0x4cd   :  { %6217 = vmatprep.subr.bf16.mxu0 %v6990_v0  ;;  %6231 = vmatprep.subr.bf16.mxu1 %v6990_v0 }
 0x4ce   :  { %6223 = vmatprep.mubr.msk.bf16.mxu0 %vm6991_vm1, %v6990_v0 }
 0x4d0   :  { %6218 = vmatpush3.bf16.msra.mxu0 %v6727_v46  ;;  %6232 = vmatpush3.bf16.msra.mxu1 %v6728_v47 }
 0x4d1   :  { %6219 = vmatprep.subr.bf16.mxu0 %v6990_v0  ;;  %6233 = vmatprep.subr.bf16.mxu1 %v6990_v0 }
 0x4d4   :  { %6220 = vmatpush3.bf16.msra.mxu0 %v6729_v48  ;;  %6234 = vmatpush3.bf16.msra.mxu1 %v6730_v49 }
 0x4d5   :  { %6221 = vmatprep.subr.bf16.mxu0 %v6990_v0  ;;  %6251 = vmatprep.subr.bf16.mxu1 %v6990_v0 }
 0x4d7   :  { %6236 = vmatmul.mubr.msk.bf16.vlgmr.msra.gmra.mrb[20].mxu1 %vm266_vm4, %v7213_v38 }
 0x4d8   :  { %6222 = vmatpush3.bf16.msra.mxu0 %v6731_v50  ;;  %6253 = vmatprep.mubr.msk.bf16.mxu1 %vm6991_vm1, %v6990_v0 }
 0x4d9   :  { %6239 = vmatprep.subr.bf16.mxu0 %v6990_v0 }
 0x4db   :  { %6224 = vmatmul.mubr.msk.bf16.vlgmr.msra.gmra.mrb[16].mxu0 %vm266_vm4, %v7213_v38 }
 0x4dc   :  { %6240 = vmatpush3.bf16.msra.mxu0 %v6732_v51  ;;  %6247 = vmatprep.mubr.msk.bf16.mxu0 %vm6991_vm1, %v6990_v0 }
 0x4dd   :  { %6241 = vmatprep.subr.bf16.mxu0 %v6990_v0 }
 0x4e0   :  { %6242 = vmatpush3.bf16.msra.mxu0 %v6733_v52 }
 0x4e1   :  { %6243 = vmatprep.subr.bf16.mxu0 %v6990_v0 }
 0x4e4   :  { %6244 = vmatpush3.bf16.msra.mxu0 %v6734_v53 }
 0x4e5   :  { %6245 = vmatprep.subr.bf16.mxu0 %v6990_v0 }
 0x4e8   :  { %6246 = vmatpush3.bf16.msra.mxu0 %v6735_v54 }
 0x4e9   :  { %6263 = vmatprep.subr.bf16.mxu0 %v6990_v0 }
 0x4eb   :  { %6248 = vmatmul.mubr.msk.bf16.vlgmr.msra.gmra.mrb[20].mxu0 %vm266_vm4, %v7213_v38 }
 0x4ec   :  { %6265 = vmatprep.mubr.msk.bf16.mxu0 %vm6991_vm1, %v6990_v0 }
 0x59a   :  { %v7333_v55 = vpop.f32.mrb[16].mxu1 }
 0x59b   :  { %v6213_v56 = vpop.f32.mrb[17].mxu1 }
 0x59c   :  { %v687_v57 = vpop.f32.mrb[18].mxu1 }
 0x59d   :  { %v6214_v58 = vpop.f32.mrb[19].mxu1 }
 0x59e   :  { %v7335_v59 = vpop.f32.mrb[12].mxu0 }
 0x59f   :  { %v692_v60 = vpack.c.bf16 %v7333_v55, %v7335_v59  ;;  %v6207_v61 = vpop.f32.mrb[13].mxu0  ;;  %v6740_v55 = vld [vmem:[%s8369_s9 + $0x58] sm:$0xff]   ;;  %v6741_v59 = vld [vmem:[%s8330_s12 + $0x8] sm:$0xff]  }
 0x5a0   :  { %v641_v62 = vpop.f32.mrb[14].mxu0 }
 0x5a1   :  { %v6208_v63 = vpop.f32.mrb[15].mxu0 }
 0x5aa   :  { %v850_v2 = vpop.f32.mrb[20].mxu1 }
 0x5ab   :  { %v851_v3 = vadd.f32 %v5416_v1, %v850_v2  ;;  %v6237_v4 = vpop.f32.mrb[21].mxu1 }
 0x5ac   :  { %v853_v5 = vpop.f32.mrb[22].mxu1  ;;  %v6736_v4 = vld [vmem:[%s8330_s12] sm:$0xff]  }
 0x5ad   :  { %v943_v7 = vpack.c.bf16 %v851_v3, %v851_v3  ;;  %v6238_v8 = vpop.f32.mrb[23].mxu1  ;;  %v854_v11 = vadd.f32 %v5416_v1, %v853_v5 }
 0x5ae   :  { %v768_v9 = vpop.f32.mrb[16].mxu0  ;;  %v6739_v8 = vld [vmem:[%s8369_s9 + $0x50] sm:$0xff]  }
 0x5af   :  { %v951_v10 = vsel %vm479_vm5, %v943_v7, 0  ;;  %v769_v12 = vadd.f32 %v5401_v6, %v768_v9  ;;  %v6225_v13 = vpop.f32.mrb[17].mxu0  ;;  %v944_v17 = vpack.c.bf16 %v854_v11, %v854_v11  ;;  %v6738_v7 = vld [vmem:[%s8369_s9 + $0x48] sm:$0xff]  }
 0x5b0   :  { %v771_v14 = vpop.f32.mrb[18].mxu0  ;;  %6252 = vmatpush3.bf16.xpose.msra.mxu1 %v951_v10  ;;  %v6742_v13 = vld [vmem:[%s8367_s27 + $0x40] sm:$0xff]  }
 0x5b1   :  { %v939_v15 = vmul.f32 0.25, %v769_v12  ;;  %v6226_v16 = vpop.f32.mrb[19].mxu0  ;;  %6257 = vmatprep.subr.bf16.mxu1 %v6990_v0  ;;  %v772_v19 = vadd.f32 %v5401_v6, %v771_v14  ;;  %v997_v20 = vsel %vm479_vm5, %v944_v17, 0  ;;  %v6737_v6 = vld [vmem:[%s8369_s9 + $0x40] sm:$0xff]  }
 0x5b3   :  { %v941_v18 = vpack.c.bf16 %v939_v15, %v939_v15  ;;  %v940_v21 = vmul.f32 0.25, %v772_v19 }
 0x5b5   :  { %v942_v23 = vpack.c.bf16 %v940_v21, %v940_v21 }
 0x5b7   :  { %6254 = vmatmul.mubr.msk.bf16.vlgmr.msra.gmra.mrb[24].mxu1 %vm479_vm5, %v941_v18  ;;  %v6743_v18 = vld [vmem:[%s8367_s27 + $0x48] sm:$0xff]  }
 0x5b8   :  { %6258 = vmatpush3.bf16.xpose.msra.mxu1 %v997_v20  ;;  %6259 = vmatprep.mubr.msk.bf16.mxu1 %vm6991_vm1, %v6990_v0  ;;  %v6744_v20 = vld [vmem:[%s8367_s27 + $0x50] sm:$0xff]  }
 0x5b9   :  { %6269 = vmatprep.subr.bf16.mxu1 %v6990_v0 }
 0x5be   :  { %v932_v24 = vpop.f32.mrb[20].mxu0 }
 0x5bf   :  { %v933_v25 = vadd.f32 %v5431_v22, %v932_v24  ;;  %v6249_v26 = vpop.f32.mrb[21].mxu0  ;;  %6260 = vmatmul.mubr.msk.bf16.vlgmr.msra.gmra.mrb[28].mxu1 %vm479_vm5, %v942_v23  ;;  %v6745_v24 = vld [vmem:[%s8367_s27 + $0x58] sm:$0xff]  }
 0x5c0   :  { %v935_v27 = vpop.f32.mrb[22].mxu0  ;;  %6271 = vmatprep.mubr.msk.bf16.mxu1 %vm6991_vm1, %v6990_v0  ;;  %v6747_v26 = vld [vmem:[%s8372_s7 + $0x48] sm:$0xff]  }
 0x5c1   :  { %v945_v28 = vpack.c.bf16 %v933_v25, %v933_v25  ;;  %v936_v29 = vadd.f32 %v5431_v22, %v935_v27  ;;  %v6250_v30 = vpop.f32.mrb[23].mxu0  ;;  %v6746_v25 = vld [vmem:[%s8372_s7 + $0x40] sm:$0xff]  }
 0x5c2   :  { %v5471_v27 = vld [vmem:[%s8373_s10 + $0x2] ss:$0 sm:$0xff] }
 0x5c3   :  { %v1067_v31 = vsel %vm600_vm6, %v945_v28, 0  ;;  %v946_v32 = vpack.c.bf16 %v936_v29, %v936_v29  ;;  %v6748_v29 = vld [vmem:[%s8372_s7 + $0x50] sm:$0xff]  }
 0x5c4   :  { %6264 = vmatpush3.bf16.msra.mxu0 %v1067_v31 }
 0x5c5   :  { %v1113_v33 = vsel %vm600_vm6, %v946_v32, 0  ;;  %6275 = vmatprep.subr.bf16.mxu0 %v6990_v0 }
 0x5c6   :  { %6270 = vmatpush3.bf16.msra.mxu1 %v1113_v33 }
 0x5c7   :  { %6281 = vmatprep.subr.bf16.mxu1 %v6990_v0 }
 0x68a   :  { %v987_v34 = vpop.f32.mrb[24].mxu1 }
 0x68b   :  { %v6255_v37 = vpop.f32.mrb[25].mxu1  ;;  %v1039_v39 = vsel %vm572_vm7, %v987_v34, -inf }
 0x68c   :  { %1040 = vmax.xlane.f32.xlu0 %v1039_v39  ;;  %v990_v40 = vpop.f32.mrb[26].mxu1  ;;  %v6749_v39 = vld [vmem:[%s8372_s7 + $0x58] sm:$0xff]  }
 0x68d   :  { %v6256_v41 = vpop.f32.mrb[27].mxu1 }
 0x692   :  { %v1033_v42 = vpop.f32.mrb[28].mxu1 }
 0x693   :  { %v6261_v43 = vpop.f32.mrb[29].mxu1  ;;  %v1042_v44 = vsel %vm572_vm7, %v1033_v42, -inf }
 0x694   :  { %1043 = vmax.xlane.f32.xlu1 %v1042_v44  ;;  %v1036_v45 = vpop.f32.mrb[30].mxu1 }
 0x695   :  { %v6262_v46 = vpop.f32.mrb[31].mxu1 }
 0x719   :  { %v1041_v47 = vpop.xlane.xlu0 %1040 }
 0x71a   :  { %v1045_v48 = vsub.f32 %v987_v34, %v1041_v47  ;;  %v5456_v47 = vld [vmem:[%s8374_s3 + $0x2] ss:$0 sm:$0xff] }
 0x71c   :  { %v1047_v49 = vmul.f32 1.442695, %v1045_v48 }
 0x71e   :  { %6886 = vpow2.f32 %v1047_v49 }
 0x721   :  { %v1044_v50 = vpop.xlane.xlu1 %1043 }
 0x722   :  { %v1046_v51 = vsub.f32 %v1033_v42, %v1044_v50 }
 0x724   :  { %v1049_v52 = vmul.f32 1.442695, %v1046_v51 }
 0x726   :  { %6888 = vpow2.f32 %v1049_v52 }
 0x728   :  { %v6887_v53 = vpop.eup %6886 }
 0x729   :  { %v1051_v54 = vsel %vm572_vm7, %v6887_v53, 0.0 }
 0x72a   :  { %1052 = vadd.xlane.f32.xlu0 %v1051_v54 }
 0x730   :  { %v6889_v56 = vpop.eup %6888 }
 0x731   :  { %v1054_v57 = vsel %vm572_vm7, %v6889_v56, 0.0 }
 0x732   :  { %1055 = vadd.xlane.f32.xlu1 %v1054_v57 }
 0x7b7   :  { %v1053_v58 = vpop.xlane.xlu0 %1052 }
 0x7b8   :  { %6890 = vrcp.f32 %v1053_v58 }
 0x7bf   :  { %v1056_v61 = vpop.xlane.xlu1 %1055 }
 0x7c0   :  { %6892 = vrcp.f32 %v1056_v61 }
 0x7c2   :  { %v6891_v62 = vpop.eup %6890 }
 0x7c3   :  { %v1059_v63 = vmul.f32 %v6891_v62, %v6887_v53 }
 0x7c5   :  { %v1061_v1 = vpack.c.bf16 %v1059_v63, %v1059_v63  ;;  %v5486_v63 = vld [vmem:[%s8329_s11 + $0x2] ss:$0 sm:$0xff] }
 0x7c7   :  { %6266 = vmatmul.mubr.msk.bf16.vlgmr.msra.gmra.mrb[24].mxu0 %vm572_vm7, %v1061_v1 }
 0x7c8   :  { %6277 = vmatprep.mubr.msk.bf16.mxu0 %vm6991_vm1, %v6990_v0  ;;  %6276 = vmatpush3.bf16.msra.mxu0 %v6741_v59 }
 0x7c9   :  { %6287 = vmatprep.subr.bf16.mxu0 %v6990_v0 }
 0x7ca   :  { %v6893_v2 = vpop.eup %6892 }
 0x7cb   :  { %v1060_v3 = vmul.f32 %v6893_v2, %v6889_v56 }
 0x7cd   :  { %v1062_v5 = vpack.c.bf16 %v1060_v3, %v1060_v3 }
 0x7cf   :  { %6272 = vmatmul.mubr.msk.bf16.vlgmr.msra.gmra.mrb[32].mxu1 %vm572_vm7, %v1062_v5 }
 0x7d0   :  { %6282 = vmatpush3.bf16.msra.mxu1 %v6736_v4  ;;  %6283 = vmatprep.mubr.msk.bf16.mxu1 %vm6991_vm1, %v6990_v0 }
 0x7d1   :  { %6299 = vmatprep.subr.bf16.mxu1 %v6990_v0 }
 0x7d7   :  { %6284 = vmatmul.mubr.msk.bf16.vlgmr.msra.gmra.mrb[36].mxu1 %vm479_vm5, %v692_v60 }
 0x7d8   :  { %6300 = vmatpush3.bf16.msra.mxu1 %v6737_v6  ;;  %6307 = vmatprep.mubr.msk.bf16.mxu1 %vm6991_vm1, %v6990_v0 }
 0x7d9   :  { %6301 = vmatprep.subr.bf16.mxu1 %v6990_v0 }
 0x7dc   :  { %6302 = vmatpush3.bf16.msra.mxu1 %v6738_v7 }
 0x7dd   :  { %6303 = vmatprep.subr.bf16.mxu1 %v6990_v0 }
 0x7e0   :  { %6304 = vmatpush3.bf16.msra.mxu1 %v6739_v8 }
 0x7e1   :  { %6305 = vmatprep.subr.bf16.mxu1 %v6990_v0 }
 0x7e4   :  { %6306 = vmatpush3.bf16.msra.mxu1 %v6740_v55 }
 0x7e5   :  { %6323 = vmatprep.subr.bf16.mxu1 %v6990_v0 }
 0x7e7   :  { %6308 = vmatmul.mubr.msk.bf16.vlgmr.msra.gmra.mrb[40].mxu1 %vm266_vm4, %v7213_v38 }
 0x7e8   :  { %6325 = vmatprep.mubr.msk.bf16.mxu1 %vm6991_vm1, %v6990_v0 }
 0x89a   :  { %v1103_v60 = vpop.f32.mrb[24].mxu0 }
 0x89b   :  { %v6267_v9 = vpop.f32.mrb[25].mxu0 }
 0x89c   :  { %v1106_v10 = vpop.f32.mrb[26].mxu0 }
 0x89d   :  { %v6268_v11 = vpop.f32.mrb[27].mxu0 }
 0x8a2   :  { %v1149_v12 = vpop.f32.mrb[32].mxu1 }
 0x8a3   :  { %v1158_v14 = vpack.c.bf16 %v1149_v12, %v1103_v60  ;;  %v6273_v15 = vpop.f32.mrb[33].mxu1 }
 0x8a4   :  { %v1152_v16 = vpop.f32.mrb[34].mxu1 }
 0x8a5   :  { %v6274_v17 = vpop.f32.mrb[35].mxu1  ;;  %6278 = vmatmul.mubr.msk.bf16.vlgmr.msra.gmra.mrb[28].mxu0 %vm479_vm5, %v1158_v14 }
 0x8a6   :  { %6288 = vmatpush3.bf16.msra.mxu0 %v6742_v13  ;;  %6295 = vmatprep.mubr.msk.bf16.mxu0 %vm6991_vm1, %v6990_v0 }
 0x8a7   :  { %6289 = vmatprep.subr.bf16.mxu0 %v6990_v0 }
 0x8aa   :  { %6290 = vmatpush3.bf16.msra.mxu0 %v6743_v18  ;;  %v1252_v19 = vpop.f32.mrb[36].mxu1 }
 0x8ab   :  { %v6285_v21 = vpop.f32.mrb[37].mxu1  ;;  %6291 = vmatprep.subr.bf16.mxu0 %v6990_v0 }
 0x8ac   :  { %v1255_v22 = vpop.f32.mrb[38].mxu1 }
 0x8ad   :  { %v6286_v23 = vpop.f32.mrb[39].mxu1 }
 0x8ae   :  { %6292 = vmatpush3.bf16.msra.mxu0 %v6744_v20 }
 0x8af   :  { %6293 = vmatprep.subr.bf16.mxu0 %v6990_v0 }
 0x8b2   :  { %6294 = vmatpush3.bf16.msra.mxu0 %v6745_v24 }
 0x8b3   :  { %6311 = vmatprep.subr.bf16.mxu0 %v6990_v0 }
 0x8b5   :  { %6296 = vmatmul.mubr.msk.bf16.vlgmr.msra.gmra.mrb[32].mxu0 %vm266_vm4, %v7213_v38 }
 0x8b6   :  { %6312 = vmatpush3.bf16.msra.mxu0 %v6746_v25  ;;  %6319 = vmatprep.mubr.msk.bf16.mxu0 %vm6991_vm1, %v6990_v0 }
 0x8b7   :  { %6313 = vmatprep.subr.bf16.mxu0 %v6990_v0 }
 0x8ba   :  { %v1416_v28 = vpop.f32.mrb[40].mxu1  ;;  %6314 = vmatpush3.bf16.msra.mxu0 %v6747_v26 }
 0x8bb   :  { %v1417_v30 = vadd.f32 %v5471_v27, %v1416_v28  ;;  %v6309_v31 = vpop.f32.mrb[41].mxu1  ;;  %6315 = vmatprep.subr.bf16.mxu0 %v6990_v0 }
 0x8bc   :  { %v1419_v32 = vpop.f32.mrb[42].mxu1 }
 0x8bd   :  { %v1509_v33 = vpack.c.bf16 %v1417_v30, %v1417_v30  ;;  %v1420_v34 = vadd.f32 %v5471_v27, %v1419_v32  ;;  %v6310_v37 = vpop.f32.mrb[43].mxu1 }
 0x8be   :  { %6316 = vmatpush3.bf16.msra.mxu0 %v6748_v29  ;;  %v6750_v37 = vld [vmem:[%s8367_s27 + $0x60] sm:$0xff]  }
 0x8bf   :  { %v1517_v40 = vsel %vm479_vm5, %v1509_v33, 0  ;;  %6317 = vmatprep.subr.bf16.mxu0 %v6990_v0  ;;  %v1510_v52 = vpack.c.bf16 %v1420_v34, %v1420_v34 }
 0x8c0   :  { %6324 = vmatpush3.bf16.xpose.msra.mxu1 %v1517_v40  ;;  %v6751_v40 = vld [vmem:[%s8367_s27 + $0x68] sm:$0xff]  }
 0x8c1   :  { %6329 = vmatprep.subr.bf16.mxu1 %v6990_v0  ;;  %v1563_v58 = vsel %vm479_vm5, %v1510_v52, 0 }
 0x8c2   :  { %6318 = vmatpush3.bf16.msra.mxu0 %v6749_v39 }
 0x8c3   :  { %6335 = vmatprep.subr.bf16.mxu0 %v6990_v0 }
 0x8c5   :  { %6320 = vmatmul.mubr.msk.bf16.vlgmr.msra.gmra.mrb[36].mxu0 %vm266_vm4, %v7213_v38 }
 0x8c6   :  { %6337 = vmatprep.mubr.msk.bf16.mxu0 %vm6991_vm1, %v6990_v0 }
 0x978   :  { %v1202_v41 = vpop.f32.mrb[28].mxu0 }
 0x979   :  { %v7454_v42 = vadd.f32 %v1252_v19, %v1202_v41  ;;  %v6279_v43 = vpop.f32.mrb[29].mxu0  ;;  %v6752_v41 = vld [vmem:[%s8367_s27 + $0x70] sm:$0xff]  }
 0x97a   :  { %v1205_v44 = vpop.f32.mrb[30].mxu0  ;;  %v6753_v43 = vld [vmem:[%s8367_s27 + $0x78] sm:$0xff]  }
 0x97b   :  { %v7456_v45 = vadd.f32 %v1255_v22, %v1205_v44  ;;  %v6280_v46 = vpop.f32.mrb[31].mxu0  ;;  %v6754_v44 = vld [vmem:[%s8372_s7 + $0x60] sm:$0xff]  }
 0x97c   :  { %v6755_v46 = vld [vmem:[%s8372_s7 + $0x68] sm:$0xff]  }
 0x988   :  { %v1334_v48 = vpop.f32.mrb[32].mxu0 }
 0x989   :  { %v1335_v49 = vadd.f32 %v5456_v47, %v1334_v48  ;;  %v6297_v50 = vpop.f32.mrb[33].mxu0  ;;  %v6757_v48 = vld [vmem:[%s8372_s7 + $0x78] sm:$0xff]  }
 0x98a   :  { %v1337_v51 = vpop.f32.mrb[34].mxu0 }
 0x98b   :  { %v1505_v53 = vmul.f32 0.25, %v1335_v49  ;;  %v6298_v54 = vpop.f32.mrb[35].mxu0  ;;  %v1338_v57 = vadd.f32 %v5456_v47, %v1337_v51  ;;  %v6756_v47 = vld [vmem:[%s8372_s7 + $0x70] sm:$0xff]  }
 0x98c   :  { %v6758_v49 = vld [vmem:[%s8330_s12 + $0x10] sm:$0xff]  }
 0x98d   :  { %v1507_v56 = vpack.c.bf16 %v1505_v53, %v1505_v53  ;;  %v1506_v61 = vmul.f32 0.25, %v1338_v57 }
 0x98f   :  { %6326 = vmatmul.mubr.msk.bf16.vlgmr.msra.gmra.mrb[44].mxu1 %vm479_vm5, %v1507_v56  ;;  %v1508_v62 = vpack.c.bf16 %v1506_v61, %v1506_v61  ;;  %v6759_v56 = vld [vmem:[%s8369_s9 + $0x60] sm:$0xff]  }
 0x990   :  { %6330 = vmatpush3.bf16.xpose.msra.mxu1 %v1563_v58  ;;  %6331 = vmatprep.mubr.msk.bf16.mxu1 %vm6991_vm1, %v6990_v0 }
 0x991   :  { %6341 = vmatprep.subr.bf16.mxu1 %v6990_v0 }
 0x997   :  { %6332 = vmatmul.mubr.msk.bf16.vlgmr.msra.gmra.mrb[48].mxu1 %vm479_vm5, %v1508_v62 }
 0x998   :  { %v1498_v1 = vpop.f32.mrb[36].mxu0  ;;  %6343 = vmatprep.mubr.msk.bf16.mxu1 %vm6991_vm1, %v6990_v0 }
 0x999   :  { %v1499_v2 = vadd.f32 %v5486_v63, %v1498_v1  ;;  %v6321_v3 = vpop.f32.mrb[37].mxu0  ;;  %v6761_v1 = vld [vmem:[%s8369_s9 + $0x70] sm:$0xff]  }
 0x99a   :  { %v1501_v4 = vpop.f32.mrb[38].mxu0 }
 0x99b   :  { %v1511_v5 = vpack.c.bf16 %v1499_v2, %v1499_v2  ;;  %v1502_v6 = vadd.f32 %v5486_v63, %v1501_v4  ;;  %v6322_v7 = vpop.f32.mrb[39].mxu0  ;;  %v6760_v63 = vld [vmem:[%s8369_s9 + $0x68] sm:$0xff]   ;;  %v6762_v2 = vld [vmem:[%s8369_s9 + $0x78] sm:$0xff]  }
 0x99c   :  { %v5539_v7 = vld [vmem:[%s8329_s11 + $0x3] ss:$0 sm:$0xff] }
 0x99d   :  { %v1633_v8 = vsel %vm600_vm6, %v1511_v5, 0  ;;  %v1512_v55 = vpack.c.bf16 %v1502_v6, %v1502_v6 }
 0x99e   :  { %6336 = vmatpush3.bf16.msra.mxu0 %v1633_v8 }
 0x99f   :  { %v1679_v59 = vsel %vm600_vm6, %v1512_v55, 0  ;;  %6347 = vmatprep.subr.bf16.mxu0 %v6990_v0 }
 0x9a0   :  { %6342 = vmatpush3.bf16.msra.mxu1 %v1679_v59 }
 0x9a1   :  { %6353 = vmatprep.subr.bf16.mxu1 %v6990_v0 }
 0xa62   :  { %v1553_v60 = vpop.f32.mrb[44].mxu1 }
 0xa63   :  { %v6327_v9 = vpop.f32.mrb[45].mxu1  ;;  %v1605_v10 = vsel %vm572_vm7, %v1553_v60, -inf }
 0xa64   :  { %1606 = vmax.xlane.f32.xlu0 %v1605_v10  ;;  %v1556_v11 = vpop.f32.mrb[46].mxu1 }
 0xa65   :  { %v6328_v12 = vpop.f32.mrb[47].mxu1 }
 0xa6a   :  { %v1599_v13 = vpop.f32.mrb[48].mxu1 }
 0xa6b   :  { %v6333_v14 = vpop.f32.mrb[49].mxu1  ;;  %v1608_v15 = vsel %vm572_vm7, %v1599_v13, -inf }
 0xa6c   :  { %1609 = vmax.xlane.f32.xlu1 %v1608_v15  ;;  %v1602_v16 = vpop.f32.mrb[50].mxu1 }
 0xa6d   :  { %v6334_v17 = vpop.f32.mrb[51].mxu1 }
 0xaf1   :  { %v1607_v18 = vpop.xlane.xlu0 %1606 }
 0xaf2   :  { %v1611_v19 = vsub.f32 %v1553_v60, %v1607_v18  ;;  %v5524_v18 = vld [vmem:[%s8373_s10 + $0x3] ss:$0 sm:$0xff] }
 0xaf4   :  { %v1613_v20 = vmul.f32 1.442695, %v1611_v19  ;;  %v5509_v19 = vld [vmem:[%s8374_s3 + $0x3] ss:$0 sm:$0xff] }
 0xaf6   :  { %6894 = vpow2.f32 %v1613_v20 }
 0xaf9   :  { %v1610_v21 = vpop.xlane.xlu1 %1609 }
 0xafa   :  { %v1612_v22 = vsub.f32 %v1599_v13, %v1610_v21 }
 0xafc   :  { %v1615_v23 = vmul.f32 1.442695, %v1612_v22 }
 0xafe   :  { %6896 = vpow2.f32 %v1615_v23 }
 0xb00   :  { %v6895_v24 = vpop.eup %6894 }
 0xb01   :  { %v1617_v25 = vsel %vm572_vm7, %v6895_v24, 0.0 }
 0xb02   :  { %1618 = vadd.xlane.f32.xlu0 %v1617_v25 }
 0xb08   :  { %v6897_v26 = vpop.eup %6896 }
 0xb09   :  { %v1620_v27 = vsel %vm572_vm7, %v6897_v26, 0.0 }
 0xb0a   :  { %1621 = vadd.xlane.f32.xlu1 %v1620_v27 }
 0xb8f   :  { %v1619_v28 = vpop.xlane.xlu0 %1618 }
 0xb90   :  { %6898 = vrcp.f32 %v1619_v28 }
 0xb97   :  { %v1622_v29 = vpop.xlane.xlu1 %1621 }
 0xb98   :  { %6900 = vrcp.f32 %v1622_v29 }
 0xb9a   :  { %v6899_v30 = vpop.eup %6898 }
 0xb9b   :  { %v1625_v31 = vmul.f32 %v6899_v30, %v6895_v24 }
 0xb9d   :  { %v1627_v32 = vpack.c.bf16 %v1625_v31, %v1625_v31 }
 0xb9f   :  { %6338 = vmatmul.mubr.msk.bf16.vlgmr.msra.gmra.mrb[40].mxu0 %vm572_vm7, %v1627_v32 }
 0xba0   :  { %6349 = vmatprep.mubr.msk.bf16.mxu0 %vm6991_vm1, %v6990_v0  ;;  %6348 = vmatpush3.bf16.msra.mxu0 %v6758_v49 }
 0xba1   :  { %6365 = vmatprep.subr.bf16.mxu0 %v6990_v0 }
 0xba2   :  { %v6901_v33 = vpop.eup %6900 }
 0xba3   :  { %v1626_v34 = vmul.f32 %v6901_v33, %v6897_v26 }
 0xba5   :  { %v1628_v39 = vpack.c.bf16 %v1626_v34, %v1626_v34 }
 0xba7   :  { %6344 = vmatmul.mubr.msk.bf16.vlgmr.msra.gmra.mrb[52].mxu1 %vm572_vm7, %v1628_v39 }
 0xba8   :  { %6354 = vmatpush3.bf16.msra.mxu1 %v6750_v37  ;;  %6361 = vmatprep.mubr.msk.bf16.mxu1 %vm6991_vm1, %v6990_v0 }
 0xba9   :  { %6355 = vmatprep.subr.bf16.mxu1 %v6990_v0 }
 0xbac   :  { %6356 = vmatpush3.bf16.msra.mxu1 %v6751_v40 }
 0xbad   :  { %6357 = vmatprep.subr.bf16.mxu1 %v6990_v0 }
 0xbb0   :  { %6358 = vmatpush3.bf16.msra.mxu1 %v6752_v41 }
 0xbb1   :  { %6359 = vmatprep.subr.bf16.mxu1 %v6990_v0 }
 0xbb4   :  { %6360 = vmatpush3.bf16.msra.mxu1 %v6753_v43 }
 0xbb5   :  { %6377 = vmatprep.subr.bf16.mxu1 %v6990_v0 }
 0xbb7   :  { %6362 = vmatmul.mubr.msk.bf16.vlgmr.msra.gmra.mrb[56].mxu1 %vm266_vm4, %v7213_v38 }
 0xbb8   :  { %6378 = vmatpush3.bf16.msra.mxu1 %v6754_v44  ;;  %6385 = vmatprep.mubr.msk.bf16.mxu1 %vm6991_vm1, %v6990_v0 }
 0xbb9   :  { %6379 = vmatprep.subr.bf16.mxu1 %v6990_v0 }
 0xbbc   :  { %6380 = vmatpush3.bf16.msra.mxu1 %v6755_v46 }
 0xbbd   :  { %6381 = vmatprep.subr.bf16.mxu1 %v6990_v0 }
 0xbc0   :  { %6382 = vmatpush3.bf16.msra.mxu1 %v6756_v47 }
 0xbc1   :  { %6383 = vmatprep.subr.bf16.mxu1 %v6990_v0 }
 0xbc4   :  { %6384 = vmatpush3.bf16.msra.mxu1 %v6757_v48 }
 0xbc5   :  { %6401 = vmatprep.subr.bf16.mxu1 %v6990_v0 }
 0xbc7   :  { %6386 = vmatmul.mubr.msk.bf16.vlgmr.msra.gmra.mrb[60].mxu1 %vm266_vm4, %v7213_v38 }
 0xbc8   :  { %6403 = vmatprep.mubr.msk.bf16.mxu1 %vm6991_vm1, %v6990_v0 }
 0xc72   :  { %v1669_v50 = vpop.f32.mrb[40].mxu0 }
 0xc73   :  { %v6339_v51 = vpop.f32.mrb[41].mxu0 }
 0xc74   :  { %v1672_v52 = vpop.f32.mrb[42].mxu0 }
 0xc75   :  { %v6340_v53 = vpop.f32.mrb[43].mxu0 }
 0xc7a   :  { %v1715_v54 = vpop.f32.mrb[52].mxu1 }
 0xc7b   :  { %v1724_v57 = vpack.c.bf16 %v1715_v54, %v1669_v50  ;;  %v6345_v58 = vpop.f32.mrb[53].mxu1 }
 0xc7c   :  { %v1718_v61 = vpop.f32.mrb[54].mxu1 }
 0xc7d   :  { %v6346_v62 = vpop.f32.mrb[55].mxu1  ;;  %6350 = vmatmul.mubr.msk.bf16.vlgmr.msra.gmra.mrb[44].mxu0 %vm479_vm5, %v1724_v57 }
 0xc7e   :  { %6366 = vmatpush3.bf16.msra.mxu0 %v6759_v56  ;;  %6373 = vmatprep.mubr.msk.bf16.mxu0 %vm6991_vm1, %v6990_v0 }
 0xc7f   :  { %6367 = vmatprep.subr.bf16.mxu0 %v6990_v0 }
 0xc82   :  { %6368 = vmatpush3.bf16.msra.mxu0 %v6760_v63 }
 0xc83   :  { %6369 = vmatprep.subr.bf16.mxu0 %v6990_v0 }
 0xc86   :  { %6370 = vmatpush3.bf16.msra.mxu0 %v6761_v1 }
 0xc87   :  { %6371 = vmatprep.subr.bf16.mxu0 %v6990_v0 }
 0xc8a   :  { %v1852_v3 = vpop.f32.mrb[56].mxu1  ;;  %6372 = vmatpush3.bf16.msra.mxu0 %v6762_v2 }
 0xc8b   :  { %v6363_v4 = vpop.f32.mrb[57].mxu1  ;;  %6389 = vmatprep.subr.bf16.mxu0 %v6990_v0 }
 0xc8c   :  { %v1855_v5 = vpop.f32.mrb[58].mxu1 }
 0xc8d   :  { %v6364_v6 = vpop.f32.mrb[59].mxu1  ;;  %6374 = vmatmul.mubr.msk.bf16.vlgmr.msra.gmra.mrb[48].mxu0 %vm266_vm4, %v7213_v38  ;;  %v1856_v30 = vadd.f32 %v5509_v19, %v1855_v5 }
 0xc8e   :  { %6391 = vmatprep.mubr.msk.bf16.mxu0 %vm6991_vm1, %v6990_v0 }
 0xc8f   :  { %v2024_v32 = vmul.f32 0.25, %v1856_v30  ;;  %v6769_v30 = vld [vmem:[%s8334_s16 + $0x14] ss:$8 sps:$4 sm:$0xff]  }
 0xc91   :  { %v2026_v34 = vpack.c.bf16 %v2024_v32, %v2024_v32  ;;  %v6772_v32 = vld [vmem:[%s8334_s16 + $0x24] ss:$8 sps:$4 sm:$0xff]  }
 0xc9a   :  { %v2016_v8 = vpop.f32.mrb[60].mxu1 }
 0xc9b   :  { %v2017_v55 = vadd.f32 %v5539_v7, %v2016_v8  ;;  %v6387_v59 = vpop.f32.mrb[61].mxu1 }
 0xc9c   :  { %v2019_v60 = vpop.f32.mrb[62].mxu1 }
 0xc9d   :  { %v2029_v9 = vpack.c.bf16 %v2017_v55, %v2017_v55  ;;  %v2020_v10 = vadd.f32 %v5539_v7, %v2019_v60  ;;  %v6388_v11 = vpop.f32.mrb[63].mxu1  ;;  %v6763_v55 = vld [vmem:[%s8330_s12 + $0x18] sm:$0xff]  }
 0xc9f   :  { %v2151_v12 = vsel %vm600_vm6, %v2029_v9, 0  ;;  %v2030_v33 = vpack.c.bf16 %v2020_v10, %v2020_v10 }
 0xca0   :  { %6402 = vmatpush3.bf16.msra.mxu1 %v2151_v12 }
 0xca1   :  { %6413 = vmatprep.subr.bf16.mxu1 %v6990_v0  ;;  %v2197_v37 = vsel %vm600_vm6, %v2030_v33, 0  ;;  %v6770_v33 = vld [vmem:[%s8334_s16 + $0x20] ss:$8 sps:$4 sm:$0xff]  }
 0xd50   :  { %v1768_v38 = vpop.f32.mrb[44].mxu0 }
 0xd51   :  { %v7559_v13 = vadd.f32 %v1768_v38, %v7454_v42  ;;  %v6351_v14 = vpop.f32.mrb[45].mxu0  ;;  %v1853_v42 = vadd.f32 %v5509_v19, %v1852_v3 }
 0xd52   :  { %v1771_v15 = vpop.f32.mrb[46].mxu0 }
 0xd53   :  { %v7562_v16 = vadd.f32 %v1771_v15, %v7456_v45  ;;  %v6352_v17 = vpop.f32.mrb[47].mxu0  ;;  %v2023_v27 = vmul.f32 0.25, %v1853_v42 }
 0xd55   :  { %v2025_v29 = vpack.c.bf16 %v2023_v27, %v2023_v27 }
 0xd60   :  { %v1934_v20 = vpop.f32.mrb[48].mxu0 }
 0xd61   :  { %v1935_v21 = vadd.f32 %v5524_v18, %v1934_v20  ;;  %v6375_v22 = vpop.f32.mrb[49].mxu0 }
 0xd62   :  { %v1937_v23 = vpop.f32.mrb[50].mxu0 }
 0xd63   :  { %v2027_v24 = vpack.c.bf16 %v1935_v21, %v1935_v21  ;;  %v6376_v25 = vpop.f32.mrb[51].mxu0  ;;  %v1938_v45 = vadd.f32 %v5524_v18, %v1937_v23  ;;  %v5553_v18 = vld [vmem:[%s8331_s13] ss:$0 sm:$0xff] }
 0xd65   :  { %v2035_v26 = vsel %vm479_vm5, %v2027_v24, 0  ;;  %v2028_v28 = vpack.c.bf16 %v1938_v45, %v1938_v45 }
 0xd66   :  { %6390 = vmatpush3.bf16.xpose.msra.mxu0 %v2035_v26 }
 0xd67   :  { %6395 = vmatprep.subr.bf16.mxu0 %v6990_v0  ;;  %v2081_v31 = vsel %vm479_vm5, %v2028_v28, 0  ;;  %v6766_v28 = vld [vmem:[%s8334_s16 + $0x4] ss:$8 sps:$4 sm:$0xff]  }
 0xd6d   :  { %6392 = vmatmul.mubr.msk.bf16.vlgmr.msra.gmra.mrb[52].mxu0 %vm479_vm5, %v2025_v29  ;;  %v6764_v29 = vld [vmem:[%s8334_s16] ss:$8 sps:$4 sm:$0xff]  }
 0xd6e   :  { %6396 = vmatpush3.bf16.xpose.msra.mxu0 %v2081_v31  ;;  %6397 = vmatprep.mubr.msk.bf16.mxu0 %vm6991_vm1, %v6990_v0  ;;  %v6767_v31 = vld [vmem:[%s8334_s16 + $0x10] ss:$8 sps:$4 sm:$0xff]  }
 0xd6f   :  { %6407 = vmatprep.subr.bf16.mxu0 %v6990_v0 }
 0xd75   :  { %6398 = vmatmul.mubr.msk.bf16.vlgmr.msra.gmra.mrb[56].mxu0 %vm479_vm5, %v2026_v34  ;;  %v6775_v34 = vld [vmem:[%s8334_s16 + $0x34] ss:$8 sps:$4 sm:$0xff]  }
 0xd76   :  { %6408 = vmatpush3.bf16.msra.mxu0 %v2197_v37  ;;  %6409 = vmatprep.mubr.msk.bf16.mxu0 %vm6991_vm1, %v6990_v0  ;;  %v6773_v37 = vld [vmem:[%s8334_s16 + $0x30] ss:$8 sps:$4 sm:$0xff]  }
 0xd77   :  { %2419 = vmatprep.subr.bf16.mxu0 %v6766_v28 }
 0xe40   :  { %v2071_v39 = vpop.f32.mrb[52].mxu0 }
 0xe41   :  { %v6393_v40 = vpop.f32.mrb[53].mxu0  ;;  %v2123_v41 = vsel %vm572_vm7, %v2071_v39, -inf }
 0xe42   :  { %2124 = vmax.xlane.f32.xlu0 %v2123_v41  ;;  %v2074_v43 = vpop.f32.mrb[54].mxu0  ;;  %v6776_v40 = vld [vmem:[%s8336_s18 + $0x40] sm:$0xff]  }
 0xe43   :  { %v6394_v44 = vpop.f32.mrb[55].mxu0  ;;  %v6777_v41 = vld [vmem:[%s8336_s18] sm:$0xff]   ;;  %v6778_v43 = vld [vmem:[%s8336_s18 + $0x48] sm:$0xff]  }
 0xe44   :  { %v6779_v44 = vld [vmem:[%s8336_s18 + $0x8] sm:$0xff]  }
 0xe48   :  { %v2117_v46 = vpop.f32.mrb[56].mxu0 }
 0xe49   :  { %v6399_v47 = vpop.f32.mrb[57].mxu0  ;;  %v2126_v48 = vsel %vm572_vm7, %v2117_v46, -inf }
 0xe4a   :  { %2127 = vmax.xlane.f32.xlu1 %v2126_v48  ;;  %v2120_v49 = vpop.f32.mrb[58].mxu0  ;;  %v6781_v47 = vld [vmem:[%s8336_s18 + $0x10] sm:$0xff]   ;;  %v6782_v48 = vld [vmem:[%s8336_s18 + $0x58] sm:$0xff]  }
 0xe4b   :  { %v6400_v50 = vpop.f32.mrb[59].mxu0  ;;  %v6783_v49 = vld [vmem:[%s8336_s18 + $0x18] sm:$0xff]  }
 0xe4c   :  { %v6784_v50 = vld [vmem:[%s8336_s18 + $0x60] sm:$0xff]  }
 0xecf   :  { %v2125_v51 = vpop.xlane.xlu0 %2124 }
 0xed0   :  { %v2129_v52 = vsub.f32 %v2071_v39, %v2125_v51  ;;  %v6992_v39 = vmov 0   ;;  %v6785_v51 = vld [vmem:[%s8336_s18 + $0x20] sm:$0xff]  }
 0xed2   :  { %v2131_v53 = vmul.f32 1.442695, %v2129_v52  ;;  %v6786_v52 = vld [vmem:[%s8336_s18 + $0x68] sm:$0xff]  }
 0xed4   :  { %6902 = vpow2.f32 %v2131_v53 }
 0xed7   :  { %v2128_v54 = vpop.xlane.xlu1 %2127 }
 0xed8   :  { %v2130_v56 = vsub.f32 %v2117_v46, %v2128_v54  ;;  %v6780_v46 = vld [vmem:[%s8336_s18 + $0x50] sm:$0xff]  }
 0xeda   :  { %v2133_v57 = vmul.f32 1.442695, %v2130_v56 }
 0xedc   :  { %6904 = vpow2.f32 %v2133_v57 }
 0xede   :  { %v6903_v58 = vpop.eup %6902 }
 0xedf   :  { %v2135_v61 = vsel %vm572_vm7, %v6903_v58, 0.0 }
 0xee0   :  { %2136 = vadd.xlane.f32.xlu0 %v2135_v61 }
 0xee6   :  { %v6905_v62 = vpop.eup %6904 }
 0xee7   :  { %v2138_v63 = vsel %vm572_vm7, %v6905_v62, 0.0 }
 0xee8   :  { %2139 = vadd.xlane.f32.xlu1 %v2138_v63 }
 0xf6d   :  { %v2137_v1 = vpop.xlane.xlu0 %2136 }
 0xf6e   :  { %6906 = vrcp.f32 %v2137_v1 }
 0xf75   :  { %v2140_v2 = vpop.xlane.xlu1 %2139 }
 0xf76   :  { %6908 = vrcp.f32 %v2140_v2 }
 0xf78   :  { %v6907_v3 = vpop.eup %6906 }
 0xf79   :  { %v2143_v4 = vmul.f32 %v6907_v3, %v6903_v58 }
 0xf7b   :  { %v2145_v5 = vpack.c.bf16 %v2143_v4, %v2143_v4 }
 0xf7d   :  { %6404 = vmatmul.mubr.msk.bf16.vlgmr.msra.gmra.mrb[64].mxu1 %vm572_vm7, %v2145_v5 }
 0xf7e   :  { %6415 = vmatprep.mubr.msk.bf16.mxu1 %vm6991_vm1, %v6990_v0  ;;  %6414 = vmatpush3.bf16.msra.mxu1 %v6763_v55  ;;  %v5554_v55 = vld [vmem:[%s8332_s14] ss:$0 sm:$0xff] }
 0xf7f   :  { %5989 = vmatprep.subr.bf16.mxu1 %v6776_v40 }
 0xf80   :  { %v6909_v6 = vpop.eup %6908 }
 0xf81   :  { %v2144_v7 = vmul.f32 %v6909_v6, %v6905_v62 }
 0xf83   :  { %v2146_v8 = vpack.c.bf16 %v2144_v7, %v2144_v7 }
 0xf85   :  { %6410 = vmatmul.mubr.msk.bf16.vlgmr.msra.gmra.mrb[60].mxu0 %vm572_vm7, %v2146_v8 }
 0xf86   :  { %2420 = vmatpush1.bf16.msra.mxu0 %v6764_v29  ;;  %2451 = vmatprep.mubr.bf16.mxu0 %v6992_v39 }
 0xf87   :  { %2421 = vmatprep.subr.bf16.mxu0 %v6769_v30 }
 0xf8a   :  { %2422 = vmatpush1.bf16.msra.mxu0 %v6767_v31 }
 0xf8b   :  { %2423 = vmatprep.subr.bf16.mxu0 %v6772_v32 }
 0xf8e   :  { %2424 = vmatpush1.bf16.msra.mxu0 %v6770_v33 }
 0xf8f   :  { %2425 = vmatprep.subr.bf16.mxu0 %v6775_v34 }
 0xf92   :  { %2426 = vmatpush1.bf16.msra.mxu0 %v6773_v37 }
 0xf93   :  { %6419 = vmatprep.subr.bf16.mxu0 %v6990_v0 }
0x1050   :  { %v2187_v59 = vpop.f32.mrb[64].mxu1 }
0x1051   :  { %v6405_v60 = vpop.f32.mrb[65].mxu1 }
0x1052   :  { %v2190_v9 = vpop.f32.mrb[66].mxu1 }
0x1053   :  { %v6406_v10 = vpop.f32.mrb[67].mxu1 }
0x1058   :  { %v2233_v11 = vpop.f32.mrb[60].mxu0 }
0x1059   :  { %v2242_v12 = vpack.c.bf16 %v2233_v11, %v2187_v59  ;;  %v6411_v38 = vpop.f32.mrb[61].mxu0 }
0x105a   :  { %v2236_v14 = vpop.f32.mrb[62].mxu0 }
0x105b   :  { %v6412_v15 = vpop.f32.mrb[63].mxu0  ;;  %6416 = vmatmul.mubr.msk.bf16.vlgmr.msra.gmra.mrb[68].mxu1 %vm479_vm5, %v2242_v12  ;;  %v5555_v12 = vld [vmem:[%s8333_s15] ss:$0 sm:$0xff] }
0x105c   :  { %5990 = vmatpush3.bf16.msra.mxu1 %v6777_v41 }
0x105d   :  { %5991 = vmatprep.subr.bf16.mxu1 %v6778_v43 }
0x1060   :  { %5992 = vmatpush3.bf16.msra.mxu1 %v6779_v44  ;;  %v5565_v44 = vld [vmem:[%s8337_s19] ss:$0 sm:$0xff] }
0x1061   :  { %5993 = vmatprep.subr.bf16.mxu1 %v6780_v46 }
0x1064   :  { %5994 = vmatpush3.bf16.msra.mxu1 %v6781_v47 }
0x1065   :  { %5995 = vmatprep.subr.bf16.mxu1 %v6782_v48 }
0x1068   :  { %5996 = vmatpush3.bf16.msra.mxu1 %v6783_v49 }
0x1069   :  { %5997 = vmatprep.subr.bf16.mxu1 %v6784_v50 }
0x106c   :  { %5998 = vmatpush3.bf16.msra.mxu1 %v6785_v51 }
0x106d   :  { %5999 = vmatprep.subr.bf16.mxu1 %v6786_v52 }
0x112e   :  { %v2286_v17 = vpop.f32.mrb[68].mxu1 }
0x112f   :  { %v2293_v19 = vadd.f32 %v2286_v17, %v7559_v13  ;;  %v6417_v20 = vpop.f32.mrb[69].mxu1 }
0x1130   :  { %v2289_v21 = vpop.f32.mrb[70].mxu1  ;;  %v6789_v20 = vld [vmem:[%s8336_s18 + $0x30] sm:$0xff]  }
0x1131   :  { %v2302_v22 = vadd.f32 %v5553_v18, %v2293_v19  ;;  %v2294_v23 = vadd.f32 %v2289_v21, %v7562_v16  ;;  %v6418_v42 = vpop.f32.mrb[71].mxu1  ;;  %v6788_v19 = vld [vmem:[%s8336_s18 + $0x70] sm:$0xff]   ;;  %v6790_v21 = vld [vmem:[%s8336_s18 + $0x78] sm:$0xff]  }
0x1133   :  { %v7599_v24 = vadd.f32 %v2302_v22, %v7204_v35  ;;  %v2303_v25 = vadd.f32 %v5553_v18, %v2294_v23  ;;  %v6787_v18 = vld [vmem:[%s8336_s18 + $0x28] sm:$0xff]   ;;  %v6791_v22 = vld [vmem:[%s8336_s18 + $0x38] sm:$0xff]   ;;  %v2366_v23 = vlaneseq }
0x1134   :  { %6000 = vmatpush3.bf16.msra.mxu1 %v6787_v18 }
0x1135   :  { %v7602_v26 = vadd.f32 %v2303_v25, %v7206_v36  ;;  %v2308_v45 = vsel %vm266_vm4, %v7599_v24, 0.0  ;;  %v2317_v27 = vmul.f32 %v7599_v24, %v7599_v24  ;;  %6001 = vmatprep.subr.bf16.mxu1 %v6788_v19  ;;  %v7700_v42 = vshrl.u32 %v2366_v23, 7  ;;  %v2364_v25 = vld [vmem:[%s8335_s17] sm:$0x3] }
0x1136   :  { %2309 = vadd.xlane.f32.xlu0 %v2308_v45  ;;  %v5582_v23 = vld [vmem:[%s8338_s20] ss:$0 sm:$0xff] }
0x1137   :  { %v2311_v13 = vsel %vm266_vm4, %v7602_v26, 0.0  ;;  %v2318_v16 = vmul.f32 %v7602_v26, %v7602_v26  ;;  %v2319_v35 = vsel %vm266_vm4, %v2317_v27, 0.0 }
0x1138   :  { %2312 = vadd.xlane.f32.xlu1 %v2311_v13  ;;  %6002 = vmatpush3.bf16.msra.mxu1 %v6789_v20 }
0x1139   :  { %v2322_v36 = vsel %vm266_vm4, %v2318_v16, 0.0  ;;  %6003 = vmatprep.subr.bf16.mxu1 %v6790_v21 }
0x113a   :  { %2320 = vadd.xlane.f32.xlu0 %v2319_v35 }
0x113c   :  { %2323 = vadd.xlane.f32.xlu1 %v2322_v36  ;;  %6004 = vmatpush3.bf16.msra.mxu1 %v6791_v22 }
0x113d   :  { %6443 = vmatprep.subr.bf16.mxu1 %v6990_v0 }
0x11c3   :  { %v2310_v53 = vpop.xlane.xlu0 %2309 }
0x11c4   :  { %v2315_v54 = vmul.f32 0.015625, %v2310_v53 }
0x11c5   :  { %v2313_v56 = vpop.xlane.xlu1 %2312 }
0x11c6   :  { %v2316_v57 = vmul.f32 0.015625, %v2313_v56  ;;  %v2327_v61 = vmul.f32 %v2315_v54, %v2315_v54  ;;  %v2331_v7 = vsub.f32 %v7599_v24, %v2315_v54  ;;  %v2368_v24 = vsub.s32 0, %v7700_v42 }
0x11c7   :  { %v2321_v58 = vpop.xlane.xlu0 %2320 }
0x11c8   :  { %v2325_v62 = vmul.f32 0.015625, %v2321_v58  ;;  %v2328_v1 = vmul.f32 %v2316_v57, %v2316_v57  ;;  %v2332_v59 = vsub.f32 %v7602_v26, %v2316_v57  ;;  %v2372_v26 = vsub.s32 1, %v7700_v42  ;;  %v5853_v42 = vld [vmem:[%s8337_s19 + $0x1] ss:$0 sm:$0xff] }
0x11c9   :  { %v2324_v63 = vpop.xlane.xlu1 %2323  ;;  %v2369_v45 = vrot.slane %v2364_v25, %v2368_v24 }
0x11ca   :  { %v2329_v2 = vsub.f32 %v2325_v62, %v2327_v61  ;;  %v2326_v3 = vmul.f32 0.015625, %v2324_v63  ;;  %v2373_v27 = vrot.slane %v2364_v25, %v2372_v26 }
0x11cc   :  { %v2333_v4 = vadd.f32 1e-05, %v2329_v2  ;;  %v2330_v5 = vsub.f32 %v2326_v3, %v2328_v1  ;;  %v6792_v1 = vld [vmem:[%s8367_s27 + $0x80] sm:$0xff]   ;;  %v6794_v3 = vld [vmem:[%s8367_s27 + $0x88] sm:$0xff]  }
0x11cd   :  { %v6793_v2 = vld [vmem:[%s8372_s7 + $0x80] sm:$0xff]  }
0x11ce   :  { %6910 = vrsqrt.f32 %v2333_v4  ;;  %v2334_v6 = vadd.f32 1e-05, %v2330_v5  ;;  %v6795_v4 = vld [vmem:[%s8372_s7 + $0x88] sm:$0xff]   ;;  %v6796_v5 = vld [vmem:[%s8367_s27 + $0x90] sm:$0xff]  }
0x11d0   :  { %6912 = vrsqrt.f32 %v2334_v6  ;;  %v6797_v6 = vld [vmem:[%s8372_s7 + $0x90] sm:$0xff]  }
0x11d8   :  { %v6911_v8 = vpop.eup %6910 }
0x11d9   :  { %v2337_v60 = vmul.f32 %v6911_v8, %v2331_v7  ;;  %v6798_v7 = vld [vmem:[%s8367_s27 + $0x98] sm:$0xff]  }
0x11da   :  { %v6913_v9 = vpop.eup %6912  ;;  %v6799_v8 = vld [vmem:[%s8372_s7 + $0x98] sm:$0xff]  }
0x11db   :  { %v2338_v10 = vmul.f32 %v6913_v9, %v2332_v59  ;;  %v2345_v11 = vmul.f32 %v5554_v55, %v2337_v60 }
0x11dd   :  { %v2346_v38 = vmul.f32 %v5554_v55, %v2338_v10  ;;  %v2353_v14 = vadd.f32 %v5555_v12, %v2345_v11 }
0x11df   :  { %v2354_v15 = vadd.f32 %v5555_v12, %v2346_v38 }
0x11e1   :  { %v2363_v17 = vpack.c.bf16 %v2354_v15, %v2353_v14 }
0x11e3   :  { %5564 = vmatmul.mubr.msk.bf16.vlgmr.msra.gmra.mrb[64].mxu0 %vm266_vm4, %v2363_v17 }
0x11e4   :  { %6427 = vmatprep.mubr.msk.bf16.mxu0 %vm6991_vm1, %v6990_v0  ;;  %6420 = vmatpush3.bf16.msra.mxu0 %v6792_v1 }
0x11e5   :  { %6421 = vmatprep.subr.bf16.mxu0 %v6990_v0 }
0x11e8   :  { %6422 = vmatpush3.bf16.msra.mxu0 %v6794_v3 }
0x11e9   :  { %6423 = vmatprep.subr.bf16.mxu0 %v6990_v0 }
0x11ec   :  { %6424 = vmatpush3.bf16.msra.mxu0 %v6796_v5 }
0x11ed   :  { %6425 = vmatprep.subr.bf16.mxu0 %v6990_v0 }
0x11f0   :  { %6426 = vmatpush3.bf16.msra.mxu0 %v6798_v7 }
0x11f1   :  { %6431 = vmatprep.subr.bf16.mxu0 %v6990_v0 }
0x12b6   :  { %v2453_v13 = vpop.f32.mrb[64].mxu0 }
0x12b7   :  { %v2454_v16 = vadd.f32 %v2453_v13, %v2369_v45  ;;  %v2455_v35 = vpop.f32.mrb[65].mxu0 }
0x12b8   :  { %v2456_v36 = vadd.f32 %v2455_v35, %v2373_v27  ;;  %v2457_v28 = vpop.f32.mrb[66].mxu0  ;;  %v5583_v35 = vld [vmem:[%s8339_s21] ss:$0 sm:$0xff] }
0x12b9   :  { %v2458_v29 = vadd.f32 %v2457_v28, %v2369_v45  ;;  %v2459_v30 = vpop.f32.mrb[67].mxu0  ;;  %v2462_v32 = vmax.f32 %v2454_v16, 0.0 }
0x12ba   :  { %v2460_v31 = vadd.f32 %v2459_v30, %v2373_v27  ;;  %v2463_v34 = vmax.f32 %v2456_v36, 0.0  ;;  %v6800_v30 = vld [vmem:[%s8369_s9 + $0x80] sm:$0xff]  }
0x12bb   :  { %v2464_v33 = vmax.f32 %v2458_v29, 0.0 }
0x12bc   :  { %v2465_v37 = vmax.f32 %v2460_v31, 0.0 }
0x12bd   :  { %v2498_v40 = vpack.c.bf16 %v2464_v33, %v2462_v32  ;;  %v6801_v32 = vld [vmem:[%s8369_s9 + $0x88] sm:$0xff]   ;;  %v6802_v33 = vld [vmem:[%s8369_s9 + $0x90] sm:$0xff]  }
0x12be   :  { %v2499_v41 = vpack.c.bf16 %v2465_v37, %v2463_v34  ;;  %v6803_v34 = vld [vmem:[%s8369_s9 + $0x98] sm:$0xff]  }
0x12c0   :  { %2635 = vmatprep.mubr.bf16.mxu1 %v2499_v41 }
0x12c1   :  { %2636 = vmatmul.mubr.bf16.vlgmr.msra.gmra.mrb[72].mxu1 %v2498_v40 }
0x12c2   :  { %6451 = vmatprep.mubr.msk.bf16.mxu1 %vm6991_vm1, %v6990_v0  ;;  %6444 = vmatpush3.bf16.msra.mxu1 %v6793_v2 }
0x12c3   :  { %6445 = vmatprep.subr.bf16.mxu1 %v6990_v0 }
0x12c6   :  { %6446 = vmatpush3.bf16.msra.mxu1 %v6795_v4 }
0x12c7   :  { %6447 = vmatprep.subr.bf16.mxu1 %v6990_v0 }
0x12ca   :  { %6448 = vmatpush3.bf16.msra.mxu1 %v6797_v6 }
0x12cb   :  { %6449 = vmatprep.subr.bf16.mxu1 %v6990_v0 }
0x12ce   :  { %6450 = vmatpush3.bf16.msra.mxu1 %v6799_v8 }
0x12cf   :  { %6461 = vmatprep.subr.bf16.mxu1 %v6990_v0 }
0x1394   :  { %v6005_v43 = vpop.f32.mrb[72].mxu1 }
0x1395   :  { %v6006_v46 = vpop.f32.mrb[73].mxu1 }
0x1396   :  { %v6007_v47 = vadd.f32 %v6006_v46, %v6005_v43  ;;  %v6008_v48 = vpop.f32.mrb[74].mxu1 }
0x1397   :  { %v6009_v49 = vpop.f32.mrb[75].mxu1 }
0x1398   :  { %v2638_v50 = vadd.f32 %v6007_v47, %v5565_v44  ;;  %v6010_v51 = vadd.f32 %v6009_v49, %v6008_v48  ;;  %v5608_v49 = vld [vmem:[%s8373_s10 + $0x4] ss:$0 sm:$0xff] }
0x139a   :  { %v2644_v52 = vadd.f32 %v2638_v50, %v2353_v14  ;;  %v2641_v53 = vadd.f32 %v6010_v51, %v5565_v44  ;;  %v5593_v50 = vld [vmem:[%s8374_s3 + $0x4] ss:$0 sm:$0xff] }
0x139c   :  { %v2645_v54 = vadd.f32 %v2641_v53, %v2354_v15  ;;  %v2648_v56 = vsel %vm266_vm4, %v2644_v52, 0.0  ;;  %v2656_v57 = vmul.f32 %v2644_v52, %v2644_v52 }
0x139d   :  { %2649 = vadd.xlane.f32.xlu0 %v2648_v56 }
0x139e   :  { %v2651_v58 = vsel %vm266_vm4, %v2645_v54, 0.0  ;;  %v2657_v61 = vmul.f32 %v2645_v54, %v2645_v54  ;;  %v2658_v62 = vsel %vm266_vm4, %v2656_v57, 0.0 }
0x139f   :  { %2652 = vadd.xlane.f32.xlu1 %v2651_v58 }
0x13a0   :  { %v2661_v63 = vsel %vm266_vm4, %v2657_v61, 0.0 }
0x13a1   :  { %2659 = vadd.xlane.f32.xlu0 %v2658_v62 }
0x13a3   :  { %2662 = vadd.xlane.f32.xlu1 %v2661_v63 }
0x142a   :  { %v2650_v55 = vpop.xlane.xlu0 %2649 }
0x142b   :  { %v2654_v59 = vmul.f32 0.015625, %v2650_v55 }
0x142c   :  { %v2653_v60 = vpop.xlane.xlu1 %2652 }
0x142d   :  { %v2655_v9 = vmul.f32 0.015625, %v2653_v60  ;;  %v2666_v11 = vmul.f32 %v2654_v59, %v2654_v59  ;;  %v2670_v21 = vsub.f32 %v2644_v52, %v2654_v59 }
0x142e   :  { %v2660_v10 = vpop.xlane.xlu0 %2659 }
0x142f   :  { %v2664_v12 = vmul.f32 0.015625, %v2660_v10  ;;  %v2667_v14 = vmul.f32 %v2655_v9, %v2655_v9  ;;  %v2671_v25 = vsub.f32 %v2645_v54, %v2655_v9  ;;  %v5623_v54 = vld [vmem:[%s8329_s11 + $0x4] ss:$0 sm:$0xff] }
0x1430   :  { %v2663_v38 = vpop.xlane.xlu1 %2662 }
0x1431   :  { %v2668_v15 = vsub.f32 %v2664_v12, %v2666_v11  ;;  %v2665_v17 = vmul.f32 0.015625, %v2663_v38 }
0x1433   :  { %v2672_v18 = vadd.f32 1e-05, %v2668_v15  ;;  %v2669_v19 = vsub.f32 %v2665_v17, %v2667_v14 }
0x1435   :  { %6914 = vrsqrt.f32 %v2672_v18  ;;  %v2673_v20 = vadd.f32 1e-05, %v2669_v19 }
0x1437   :  { %6916 = vrsqrt.f32 %v2673_v20 }
0x143f   :  { %v6915_v22 = vpop.eup %6914 }
0x1440   :  { %v2676_v45 = vmul.f32 %v6915_v22, %v2670_v21 }
0x1441   :  { %v6917_v27 = vpop.eup %6916 }
0x1442   :  { %v2684_v13 = vmul.f32 %v5582_v23, %v2676_v45  ;;  %v2677_v16 = vmul.f32 %v6917_v27, %v2671_v25 }
0x1444   :  { %v2685_v36 = vmul.f32 %v5582_v23, %v2677_v16  ;;  %v7758_v28 = vadd.f32 %v5583_v35, %v2684_v13 }
0x1446   :  { %v7760_v29 = vadd.f32 %v5583_v35, %v2685_v36 }
0x1448   :  { %v7767_v31 = vpack.c.bf16 %v7760_v29, %v7758_v28 }
0x144a   :  { %6428 = vmatmul.mubr.msk.bf16.vlgmr.msra.gmra.mrb[68].mxu0 %vm266_vm4, %v7767_v31  ;;  %6452 = vmatmul.mubr.msk.bf16.vlgmr.msra.gmra.mrb[76].mxu1 %vm266_vm4, %v7767_v31 }
0x144b   :  { %6432 = vmatpush3.bf16.msra.mxu0 %v6800_v30  ;;  %6439 = vmatprep.mubr.msk.bf16.mxu0 %vm6991_vm1, %v6990_v0 }
0x144c   :  { %6433 = vmatprep.subr.bf16.mxu0 %v6990_v0  ;;  %6463 = vmatprep.mubr.msk.bf16.mxu1 %vm6991_vm1, %v6990_v0 }
0x144f   :  { %6434 = vmatpush3.bf16.msra.mxu0 %v6801_v32 }
0x1450   :  { %6435 = vmatprep.subr.bf16.mxu0 %v6990_v0 }
0x1453   :  { %6436 = vmatpush3.bf16.msra.mxu0 %v6802_v33 }
0x1454   :  { %6437 = vmatprep.subr.bf16.mxu0 %v6990_v0 }
0x1457   :  { %6438 = vmatpush3.bf16.msra.mxu0 %v6803_v34 }
0x1458   :  { %6455 = vmatprep.subr.bf16.mxu0 %v6990_v0 }
0x145a   :  { %6440 = vmatmul.mubr.msk.bf16.vlgmr.msra.gmra.mrb[72].mxu0 %vm266_vm4, %v7767_v31 }
0x145b   :  { %6457 = vmatprep.mubr.msk.bf16.mxu0 %vm6991_vm1, %v6990_v0 }
0x151d   :  { %v2773_v37 = vpop.f32.mrb[68].mxu0  ;;  %v2937_v40 = vpop.f32.mrb[76].mxu1 }
0x151e   :  { %v6429_v41 = vpop.f32.mrb[69].mxu0  ;;  %v6453_v43 = vpop.f32.mrb[77].mxu1  ;;  %v2774_v57 = vadd.f32 %v5593_v50, %v2773_v37  ;;  %v2938_v63 = vadd.f32 %v5623_v54, %v2937_v40 }
0x151f   :  { %v2776_v44 = vpop.f32.mrb[70].mxu0  ;;  %v2940_v46 = vpop.f32.mrb[78].mxu1  ;;  %v6804_v41 = vld [vmem:[%s8367_s27 + $0xa0] sm:$0xff]  }
0x1520   :  { %v6430_v47 = vpop.f32.mrb[71].mxu0  ;;  %v6454_v48 = vpop.f32.mrb[79].mxu1  ;;  %v2777_v1 = vadd.f32 %v5593_v50, %v2776_v44  ;;  %v2944_v4 = vmul.f32 0.25, %v2774_v57  ;;  %v2941_v5 = vadd.f32 %v5623_v54, %v2940_v46  ;;  %v2950_v7 = vpack.c.bf16 %v2938_v63, %v2938_v63  ;;  %v6805_v46 = vld [vmem:[%s8369_s9 + $0xa0] sm:$0xff]   ;;  %v6808_v50 = vld [vmem:[%s8367_s27 + $0xb0] sm:$0xff]  }
0x1521   :  { %v6806_v48 = vld [vmem:[%s8367_s27 + $0xa8] sm:$0xff]   ;;  %v6812_v54 = vld [vmem:[%s8372_s7 + $0xa0] sm:$0xff]   ;;  %v6814_v57 = vld [vmem:[%s8372_s7 + $0xb0] sm:$0xff]  }
0x1522   :  { %v2945_v8 = vmul.f32 0.25, %v2777_v1  ;;  %v2946_v55 = vpack.c.bf16 %v2944_v4, %v2944_v4  ;;  %v2951_v59 = vpack.c.bf16 %v2941_v5, %v2941_v5  ;;  %v3072_v60 = vsel %vm600_vm6, %v2950_v7, 0 }
0x1524   :  { %v2947_v9 = vpack.c.bf16 %v2945_v8, %v2945_v8  ;;  %v3118_v10 = vsel %vm600_vm6, %v2951_v59, 0  ;;  %v5659_v8 = vld [vmem:[%s8373_s10 + $0x5] ss:$0 sm:$0xff] }
0x1525   :  { %v5644_v59 = vld [vmem:[%s8374_s3 + $0x5] ss:$0 sm:$0xff] }
0x152d   :  { %v2855_v51 = vpop.f32.mrb[72].mxu0 }
0x152e   :  { %v2856_v52 = vadd.f32 %v5608_v49, %v2855_v51  ;;  %v6441_v53 = vpop.f32.mrb[73].mxu0  ;;  %v6809_v51 = vld [vmem:[%s8369_s9 + $0xb0] sm:$0xff]  }
0x152f   :  { %v2858_v56 = vpop.f32.mrb[74].mxu0  ;;  %v6811_v53 = vld [vmem:[%s8369_s9 + $0xb8] sm:$0xff]  }
0x1530   :  { %v2948_v58 = vpack.c.bf16 %v2856_v52, %v2856_v52  ;;  %v2859_v61 = vadd.f32 %v5608_v49, %v2858_v56  ;;  %v6442_v62 = vpop.f32.mrb[75].mxu0  ;;  %v6807_v49 = vld [vmem:[%s8369_s9 + $0xa8] sm:$0xff]   ;;  %v6810_v52 = vld [vmem:[%s8367_s27 + $0xb8] sm:$0xff]  }
0x1531   :  { %v6813_v56 = vld [vmem:[%s8372_s7 + $0xa8] sm:$0xff]  }
0x1532   :  { %v2956_v2 = vsel %vm479_vm5, %v2948_v58, 0  ;;  %v2949_v3 = vpack.c.bf16 %v2859_v61, %v2859_v61  ;;  %v6815_v58 = vld [vmem:[%s8372_s7 + $0xb8] sm:$0xff]  }
0x1533   :  { %6456 = vmatpush3.bf16.xpose.msra.mxu0 %v2956_v2 }
0x1534   :  { %v3002_v6 = vsel %vm479_vm5, %v2949_v3, 0  ;;  %6467 = vmatprep.subr.bf16.mxu0 %v6990_v0 }
0x1535   :  { %6462 = vmatpush3.bf16.xpose.msra.mxu1 %v3002_v6 }
0x1536   :  { %6473 = vmatprep.subr.bf16.mxu1 %v6990_v0 }
0x153a   :  { %6458 = vmatmul.mubr.msk.bf16.vlgmr.msra.gmra.mrb[76].mxu0 %vm479_vm5, %v2946_v55 }
0x153b   :  { %6468 = vmatpush3.bf16.msra.mxu0 %v3072_v60  ;;  %6469 = vmatprep.mubr.msk.bf16.mxu0 %vm6991_vm1, %v6990_v0 }
0x153c   :  { %6464 = vmatmul.mubr.msk.bf16.vlgmr.msra.gmra.mrb[80].mxu1 %vm479_vm5, %v2947_v9  ;;  %6479 = vmatprep.subr.bf16.mxu0 %v6990_v0 }
0x153d   :  { %6474 = vmatpush3.bf16.msra.mxu1 %v3118_v10  ;;  %6475 = vmatprep.mubr.msk.bf16.mxu1 %vm6991_vm1, %v6990_v0 }
0x153e   :  { %6491 = vmatprep.subr.bf16.mxu1 %v6990_v0 }
0x160d   :  { %v2992_v11 = vpop.f32.mrb[76].mxu0 }
0x160e   :  { %v6459_v12 = vpop.f32.mrb[77].mxu0  ;;  %v3044_v38 = vsel %vm572_vm7, %v2992_v11, -inf }
0x160f   :  { %v3038_v14 = vpop.f32.mrb[80].mxu1  ;;  %3045 = vmax.xlane.f32.xlu1 %v3044_v38  ;;  %v2995_v15 = vpop.f32.mrb[78].mxu0 }
0x1610   :  { %v6460_v17 = vpop.f32.mrb[79].mxu0  ;;  %v6465_v18 = vpop.f32.mrb[81].mxu1  ;;  %v3047_v19 = vsel %vm572_vm7, %v3038_v14, -inf }
0x1611   :  { %3048 = vmax.xlane.f32.xlu0 %v3047_v19  ;;  %v3041_v20 = vpop.f32.mrb[82].mxu1 }
0x1612   :  { %v6466_v21 = vpop.f32.mrb[83].mxu1 }
0x169c   :  { %v3046_v22 = vpop.xlane.xlu1 %3045 }
0x169d   :  { %v3050_v23 = vsub.f32 %v2992_v11, %v3046_v22 }
0x169e   :  { %v3049_v25 = vpop.xlane.xlu0 %3048 }
0x169f   :  { %v3052_v45 = vmul.f32 1.442695, %v3050_v23  ;;  %v3051_v27 = vsub.f32 %v3038_v14, %v3049_v25  ;;  %v5674_v25 = vld [vmem:[%s8329_s11 + $0x5] ss:$0 sm:$0xff] }
0x16a1   :  { %6918 = vpow2.f32 %v3052_v45  ;;  %v3054_v13 = vmul.f32 1.442695, %v3051_v27 }
0x16a3   :  { %6920 = vpow2.f32 %v3054_v13 }
0x16ab   :  { %v6919_v16 = vpop.eup %6918 }
0x16ac   :  { %v3056_v35 = vsel %vm572_vm7, %v6919_v16, 0.0 }
0x16ad   :  { %v6921_v36 = vpop.eup %6920  ;;  %3057 = vadd.xlane.f32.xlu1 %v3056_v35 }
0x16ae   :  { %v3059_v30 = vsel %vm572_vm7, %v6921_v36, 0.0 }
0x16af   :  { %3060 = vadd.xlane.f32.xlu0 %v3059_v30 }
0x173a   :  { %v3058_v32 = vpop.xlane.xlu1 %3057 }
0x173b   :  { %6922 = vrcp.f32 %v3058_v32 }
0x173c   :  { %v3061_v33 = vpop.xlane.xlu0 %3060 }
0x173d   :  { %6924 = vrcp.f32 %v3061_v33 }
0x1745   :  { %v6923_v34 = vpop.eup %6922 }
0x1746   :  { %v3064_v37 = vmul.f32 %v6923_v34, %v6919_v16 }
0x1747   :  { %v6925_v40 = vpop.eup %6924 }
0x1748   :  { %v3065_v43 = vmul.f32 %v6925_v40, %v6921_v36  ;;  %v3066_v44 = vpack.c.bf16 %v3064_v37, %v3064_v37 }
0x174a   :  { %6470 = vmatmul.mubr.msk.bf16.vlgmr.msra.gmra.mrb[80].mxu0 %vm572_vm7, %v3066_v44  ;;  %v3067_v47 = vpack.c.bf16 %v3065_v43, %v3065_v43 }
0x174b   :  { %6480 = vmatpush3.bf16.msra.mxu0 %v6804_v41  ;;  %6487 = vmatprep.mubr.msk.bf16.mxu0 %vm6991_vm1, %v6990_v0 }
0x174c   :  { %6476 = vmatmul.mubr.msk.bf16.vlgmr.msra.gmra.mrb[84].mxu1 %vm572_vm7, %v3067_v47  ;;  %6481 = vmatprep.subr.bf16.mxu0 %v6990_v0 }
0x174d   :  { %6492 = vmatpush3.bf16.msra.mxu1 %v6805_v46  ;;  %6499 = vmatprep.mubr.msk.bf16.mxu1 %vm6991_vm1, %v6990_v0 }
0x174e   :  { %6493 = vmatprep.subr.bf16.mxu1 %v6990_v0 }
0x174f   :  { %6482 = vmatpush3.bf16.msra.mxu0 %v6806_v48 }
0x1750   :  { %6483 = vmatprep.subr.bf16.mxu0 %v6990_v0 }
0x1751   :  { %6494 = vmatpush3.bf16.msra.mxu1 %v6807_v49 }
0x1752   :  { %6495 = vmatprep.subr.bf16.mxu1 %v6990_v0 }
0x1753   :  { %6484 = vmatpush3.bf16.msra.mxu0 %v6808_v50 }
0x1754   :  { %6485 = vmatprep.subr.bf16.mxu0 %v6990_v0 }
0x1755   :  { %6496 = vmatpush3.bf16.msra.mxu1 %v6809_v51 }
0x1756   :  { %6497 = vmatprep.subr.bf16.mxu1 %v6990_v0 }
0x1757   :  { %6486 = vmatpush3.bf16.msra.mxu0 %v6810_v52 }
0x1758   :  { %6503 = vmatprep.subr.bf16.mxu0 %v6990_v0 }
0x1759   :  { %6498 = vmatpush3.bf16.msra.mxu1 %v6811_v53 }
0x175a   :  { %6488 = vmatmul.mubr.msk.bf16.vlgmr.msra.gmra.mrb[84].mxu0 %vm266_vm4, %v7767_v31  ;;  %6515 = vmatprep.subr.bf16.mxu1 %v6990_v0 }
0x175b   :  { %6504 = vmatpush3.bf16.msra.mxu0 %v6812_v54  ;;  %6511 = vmatprep.mubr.msk.bf16.mxu0 %vm6991_vm1, %v6990_v0 }
0x175c   :  { %6500 = vmatmul.mubr.msk.bf16.vlgmr.msra.gmra.mrb[88].mxu1 %vm266_vm4, %v7767_v31  ;;  %6505 = vmatprep.subr.bf16.mxu0 %v6990_v0 }
0x175d   :  { %6517 = vmatprep.mubr.msk.bf16.mxu1 %vm6991_vm1, %v6990_v0 }
0x175f   :  { %6506 = vmatpush3.bf16.msra.mxu0 %v6813_v56 }
0x1760   :  { %6507 = vmatprep.subr.bf16.mxu0 %v6990_v0 }
0x1763   :  { %6508 = vmatpush3.bf16.msra.mxu0 %v6814_v57 }
0x1764   :  { %6509 = vmatprep.subr.bf16.mxu0 %v6990_v0 }
0x1767   :  { %6510 = vmatpush3.bf16.msra.mxu0 %v6815_v58 }
0x1768   :  { %6527 = vmatprep.subr.bf16.mxu0 %v6990_v0 }
0x176a   :  { %6512 = vmatmul.mubr.msk.bf16.vlgmr.msra.gmra.mrb[88].mxu0 %vm266_vm4, %v7767_v31 }
0x176b   :  { %6529 = vmatprep.mubr.msk.bf16.mxu0 %vm6991_vm1, %v6990_v0 }
0x181d   :  { %v7887_v61 = vpop.f32.mrb[80].mxu0 }
0x181e   :  { %v6471_v62 = vpop.f32.mrb[81].mxu0 }
0x181f   :  { %v3111_v63 = vpop.f32.mrb[82].mxu0  ;;  %v7889_v1 = vpop.f32.mrb[84].mxu1 }
0x1820   :  { %v3163_v2 = vpack.c.bf16 %v7889_v1, %v7887_v61  ;;  %v6472_v3 = vpop.f32.mrb[83].mxu0  ;;  %v6477_v4 = vpop.f32.mrb[85].mxu1  ;;  %v6820_v61 = vld [vmem:[%s8369_s9 + $0xd8] sm:$0xff]   ;;  %v6821_v1 = vld [vmem:[%s8330_s12 + $0x28] sm:$0xff]  }
0x1821   :  { %v3157_v5 = vpop.f32.mrb[86].mxu1 }
0x1822   :  { %v6478_v6 = vpop.f32.mrb[87].mxu1 }
0x182d   :  { %v3239_v7 = vpop.f32.mrb[84].mxu0 }
0x182e   :  { %v6489_v55 = vpop.f32.mrb[85].mxu0  ;;  %v3240_v14 = vadd.f32 %v5644_v59, %v3239_v7 }
0x182f   :  { %v3242_v60 = vpop.f32.mrb[86].mxu0  ;;  %v3321_v9 = vpop.f32.mrb[88].mxu1 }
0x1830   :  { %v3322_v10 = vadd.f32 %v5659_v8, %v3321_v9  ;;  %v6490_v11 = vpop.f32.mrb[87].mxu0  ;;  %v6501_v12 = vpop.f32.mrb[89].mxu1  ;;  %v3410_v20 = vmul.f32 0.25, %v3240_v14  ;;  %v3243_v23 = vadd.f32 %v5644_v59, %v3242_v60  ;;  %v6818_v14 = vld [vmem:[%s8369_s9 + $0xc8] sm:$0xff]  }
0x1831   :  { %v3324_v38 = vpop.f32.mrb[90].mxu1  ;;  %v6816_v11 = vld [vmem:[%s8330_s12 + $0x20] sm:$0xff]  }
0x1832   :  { %v3414_v15 = vpack.c.bf16 %v3322_v10, %v3322_v10  ;;  %v6502_v17 = vpop.f32.mrb[91].mxu1  ;;  %v3325_v19 = vadd.f32 %v5659_v8, %v3324_v38  ;;  %v3412_v22 = vpack.c.bf16 %v3410_v20, %v3410_v20  ;;  %v3411_v13 = vmul.f32 0.25, %v3243_v23  ;;  %v6817_v38 = vld [vmem:[%s8369_s9 + $0xc0] sm:$0xff]  }
0x1834   :  { %v3422_v18 = vsel %vm479_vm5, %v3414_v15, 0  ;;  %v3415_v21 = vpack.c.bf16 %v3325_v19, %v3325_v19  ;;  %v3413_v34 = vpack.c.bf16 %v3411_v13, %v3411_v13  ;;  %v6819_v15 = vld [vmem:[%s8369_s9 + $0xd0] sm:$0xff]  }
0x1835   :  { %6516 = vmatpush3.bf16.xpose.msra.mxu1 %v3422_v18 }
0x1836   :  { %6521 = vmatprep.subr.bf16.mxu1 %v6990_v0  ;;  %v3468_v45 = vsel %vm479_vm5, %v3415_v21, 0  ;;  %v6822_v21 = vld [vmem:[%s8367_s27 + $0xc0] sm:$0xff]  }
0x183c   :  { %6518 = vmatmul.mubr.msk.bf16.vlgmr.msra.gmra.mrb[92].mxu1 %vm479_vm5, %v3412_v22 }
0x183d   :  { %v3403_v27 = vpop.f32.mrb[88].mxu0  ;;  %6522 = vmatpush3.bf16.xpose.msra.mxu1 %v3468_v45  ;;  %6523 = vmatprep.mubr.msk.bf16.mxu1 %vm6991_vm1, %v6990_v0 }
0x183e   :  { %v3404_v16 = vadd.f32 %v5674_v25, %v3403_v27  ;;  %v6513_v35 = vpop.f32.mrb[89].mxu0  ;;  %6533 = vmatprep.subr.bf16.mxu1 %v6990_v0  ;;  %v6823_v27 = vld [vmem:[%s8367_s27 + $0xc8] sm:$0xff]  }
0x183f   :  { %v3406_v36 = vpop.f32.mrb[90].mxu0 }
0x1840   :  { %v3416_v30 = vpack.c.bf16 %v3404_v16, %v3404_v16  ;;  %v3407_v32 = vadd.f32 %v5674_v25, %v3406_v36  ;;  %v6514_v33 = vpop.f32.mrb[91].mxu0  ;;  %v6824_v16 = vld [vmem:[%s8367_s27 + $0xd0] sm:$0xff]  }
0x1841   :  { %v6826_v33 = vld [vmem:[%s8372_s7 + $0xc0] sm:$0xff]  }
0x1842   :  { %v3538_v37 = vsel %vm600_vm6, %v3416_v30, 0  ;;  %v3417_v40 = vpack.c.bf16 %v3407_v32, %v3407_v32  ;;  %v6825_v32 = vld [vmem:[%s8367_s27 + $0xd8] sm:$0xff]  }
0x1843   :  { %6528 = vmatpush3.bf16.msra.mxu0 %v3538_v37  ;;  %v5714_v37 = vld [vmem:[%s8373_s10 + $0x6] ss:$0 sm:$0xff] }
0x1844   :  { %v3584_v41 = vsel %vm600_vm6, %v3417_v40, 0  ;;  %6524 = vmatmul.mubr.msk.bf16.vlgmr.msra.gmra.mrb[96].mxu1 %vm479_vm5, %v3413_v34  ;;  %6539 = vmatprep.subr.bf16.mxu0 %v6990_v0  ;;  %v6827_v34 = vld [vmem:[%s8372_s7 + $0xc8] sm:$0xff]  }
0x1845   :  { %6534 = vmatpush3.bf16.msra.mxu1 %v3584_v41  ;;  %6535 = vmatprep.mubr.msk.bf16.mxu1 %vm6991_vm1, %v6990_v0  ;;  %v6828_v41 = vld [vmem:[%s8372_s7 + $0xd0] sm:$0xff]  }
0x1846   :  { %6545 = vmatprep.subr.bf16.mxu1 %v6990_v0 }
0x190f   :  { %v3458_v43 = vpop.f32.mrb[92].mxu1 }
0x1910   :  { %v6519_v44 = vpop.f32.mrb[93].mxu1  ;;  %v3510_v46 = vsel %vm572_vm7, %v3458_v43, -inf }
0x1911   :  { %3511 = vmax.xlane.f32.xlu0 %v3510_v46  ;;  %v3461_v47 = vpop.f32.mrb[94].mxu1 }
0x1912   :  { %v6520_v48 = vpop.f32.mrb[95].mxu1 }
0x1917   :  { %v3504_v49 = vpop.f32.mrb[96].mxu1 }
0x1918   :  { %v6525_v50 = vpop.f32.mrb[97].mxu1  ;;  %v3513_v51 = vsel %vm572_vm7, %v3504_v49, -inf }
0x1919   :  { %3514 = vmax.xlane.f32.xlu1 %v3513_v51  ;;  %v3507_v52 = vpop.f32.mrb[98].mxu1  ;;  %v6829_v50 = vld [vmem:[%s8372_s7 + $0xd8] sm:$0xff]  }
0x191a   :  { %v6526_v53 = vpop.f32.mrb[99].mxu1 }
0x199e   :  { %v3512_v54 = vpop.xlane.xlu0 %3511 }
0x199f   :  { %v3516_v56 = vsub.f32 %v3458_v43, %v3512_v54 }
0x19a1   :  { %v3518_v57 = vmul.f32 1.442695, %v3516_v56 }
0x19a3   :  { %6926 = vpow2.f32 %v3518_v57 }
0x19a6   :  { %v3515_v58 = vpop.xlane.xlu1 %3514 }
0x19a7   :  { %v3517_v62 = vsub.f32 %v3504_v49, %v3515_v58 }
0x19a9   :  { %v3520_v63 = vmul.f32 1.442695, %v3517_v62  ;;  %v5699_v62 = vld [vmem:[%s8374_s3 + $0x6] ss:$0 sm:$0xff] }
0x19ab   :  { %6928 = vpow2.f32 %v3520_v63 }
0x19ad   :  { %v6927_v3 = vpop.eup %6926 }
0x19ae   :  { %v3522_v4 = vsel %vm572_vm7, %v6927_v3, 0.0 }
0x19af   :  { %3523 = vadd.xlane.f32.xlu0 %v3522_v4 }
0x19b5   :  { %v6929_v5 = vpop.eup %6928 }
0x19b6   :  { %v3525_v6 = vsel %vm572_vm7, %v6929_v5, 0.0 }
0x19b7   :  { %3526 = vadd.xlane.f32.xlu1 %v3525_v6 }
0x1a3c   :  { %v3524_v7 = vpop.xlane.xlu0 %3523 }
0x1a3d   :  { %6930 = vrcp.f32 %v3524_v7 }
0x1a44   :  { %v3527_v8 = vpop.xlane.xlu1 %3526 }
0x1a45   :  { %6932 = vrcp.f32 %v3527_v8 }
0x1a47   :  { %v6931_v55 = vpop.eup %6930 }
0x1a48   :  { %v3530_v59 = vmul.f32 %v6931_v55, %v6927_v3 }
0x1a4a   :  { %v3532_v60 = vpack.c.bf16 %v3530_v59, %v3530_v59 }
0x1a4c   :  { %6530 = vmatmul.mubr.msk.bf16.vlgmr.msra.gmra.mrb[92].mxu0 %vm572_vm7, %v3532_v60 }
0x1a4d   :  { %6541 = vmatprep.mubr.msk.bf16.mxu0 %vm6991_vm1, %v6990_v0  ;;  %6540 = vmatpush3.bf16.msra.mxu0 %v6821_v1 }
0x1a4e   :  { %6551 = vmatprep.subr.bf16.mxu0 %v6990_v0 }
0x1a4f   :  { %v6933_v9 = vpop.eup %6932 }
0x1a50   :  { %v3531_v10 = vmul.f32 %v6933_v9, %v6929_v5 }
0x1a52   :  { %v3533_v12 = vpack.c.bf16 %v3531_v10, %v3531_v10 }
0x1a54   :  { %6536 = vmatmul.mubr.msk.bf16.vlgmr.msra.gmra.mrb[100].mxu1 %vm572_vm7, %v3533_v12 }
0x1a55   :  { %6546 = vmatpush3.bf16.msra.mxu1 %v6816_v11  ;;  %6547 = vmatprep.mubr.msk.bf16.mxu1 %vm6991_vm1, %v6990_v0  ;;  %v5729_v11 = vld [vmem:[%s8329_s11 + $0x6] ss:$0 sm:$0xff] }
0x1a56   :  { %6563 = vmatprep.subr.bf16.mxu1 %v6990_v0 }
0x1a5c   :  { %6548 = vmatmul.mubr.msk.bf16.vlgmr.msra.gmra.mrb[104].mxu1 %vm479_vm5, %v3163_v2 }
0x1a5d   :  { %6564 = vmatpush3.bf16.msra.mxu1 %v6817_v38  ;;  %6571 = vmatprep.mubr.msk.bf16.mxu1 %vm6991_vm1, %v6990_v0 }
0x1a5e   :  { %6565 = vmatprep.subr.bf16.mxu1 %v6990_v0 }
0x1a61   :  { %6566 = vmatpush3.bf16.msra.mxu1 %v6818_v14 }
0x1a62   :  { %6567 = vmatprep.subr.bf16.mxu1 %v6990_v0 }
0x1a65   :  { %6568 = vmatpush3.bf16.msra.mxu1 %v6819_v15 }
0x1a66   :  { %6569 = vmatprep.subr.bf16.mxu1 %v6990_v0 }
0x1a69   :  { %6570 = vmatpush3.bf16.msra.mxu1 %v6820_v61 }
0x1a6a   :  { %6587 = vmatprep.subr.bf16.mxu1 %v6990_v0 }
0x1a6c   :  { %6572 = vmatmul.mubr.msk.bf16.vlgmr.msra.gmra.mrb[108].mxu1 %vm266_vm4, %v7767_v31 }
0x1a6d   :  { %6589 = vmatprep.mubr.msk.bf16.mxu1 %vm6991_vm1, %v6990_v0 }
0x1b1f   :  { %v3574_v2 = vpop.f32.mrb[92].mxu0 }
0x1b20   :  { %v6531_v17 = vpop.f32.mrb[93].mxu0 }
0x1b21   :  { %v3577_v18 = vpop.f32.mrb[94].mxu0 }
0x1b22   :  { %v6532_v19 = vpop.f32.mrb[95].mxu0 }
0x1b27   :  { %v3620_v20 = vpop.f32.mrb[100].mxu1 }
0x1b28   :  { %v3629_v22 = vpack.c.bf16 %v3620_v20, %v3574_v2  ;;  %v6537_v23 = vpop.f32.mrb[101].mxu1 }
0x1b29   :  { %v3623_v25 = vpop.f32.mrb[102].mxu1 }
0x1b2a   :  { %v6538_v45 = vpop.f32.mrb[103].mxu1  ;;  %6542 = vmatmul.mubr.msk.bf16.vlgmr.msra.gmra.mrb[96].mxu0 %vm479_vm5, %v3629_v22 }
0x1b2b   :  { %6552 = vmatpush3.bf16.msra.mxu0 %v6822_v21  ;;  %6559 = vmatprep.mubr.msk.bf16.mxu0 %vm6991_vm1, %v6990_v0 }
0x1b2c   :  { %6553 = vmatprep.subr.bf16.mxu0 %v6990_v0 }
0x1b2f   :  { %6554 = vmatpush3.bf16.msra.mxu0 %v6823_v27  ;;  %v3723_v13 = vpop.f32.mrb[104].mxu1 }
0x1b30   :  { %v6549_v35 = vpop.f32.mrb[105].mxu1  ;;  %6555 = vmatprep.subr.bf16.mxu0 %v6990_v0 }
0x1b31   :  { %v3726_v36 = vpop.f32.mrb[106].mxu1 }
0x1b32   :  { %v6550_v30 = vpop.f32.mrb[107].mxu1 }
0x1b33   :  { %6556 = vmatpush3.bf16.msra.mxu0 %v6824_v16 }
0x1b34   :  { %6557 = vmatprep.subr.bf16.mxu0 %v6990_v0 }
0x1b37   :  { %6558 = vmatpush3.bf16.msra.mxu0 %v6825_v32 }
0x1b38   :  { %6575 = vmatprep.subr.bf16.mxu0 %v6990_v0 }
0x1b3a   :  { %6560 = vmatmul.mubr.msk.bf16.vlgmr.msra.gmra.mrb[100].mxu0 %vm266_vm4, %v7767_v31 }
0x1b3b   :  { %6576 = vmatpush3.bf16.msra.mxu0 %v6826_v33  ;;  %6583 = vmatprep.mubr.msk.bf16.mxu0 %vm6991_vm1, %v6990_v0 }
0x1b3c   :  { %6577 = vmatprep.subr.bf16.mxu0 %v6990_v0 }
0x1b3f   :  { %v3887_v40 = vpop.f32.mrb[108].mxu1  ;;  %6578 = vmatpush3.bf16.msra.mxu0 %v6827_v34 }
0x1b40   :  { %v3888_v43 = vadd.f32 %v5714_v37, %v3887_v40  ;;  %v6573_v44 = vpop.f32.mrb[109].mxu1  ;;  %6579 = vmatprep.subr.bf16.mxu0 %v6990_v0 }
0x1b41   :  { %v3890_v46 = vpop.f32.mrb[110].mxu1 }
0x1b42   :  { %v3980_v47 = vpack.c.bf16 %v3888_v43, %v3888_v43  ;;  %v3891_v48 = vadd.f32 %v5714_v37, %v3890_v46  ;;  %v6574_v49 = vpop.f32.mrb[111].mxu1 }
0x1b43   :  { %6580 = vmatpush3.bf16.msra.mxu0 %v6828_v41 }
0x1b44   :  { %v3988_v51 = vsel %vm479_vm5, %v3980_v47, 0  ;;  %6581 = vmatprep.subr.bf16.mxu0 %v6990_v0  ;;  %v3981_v6 = vpack.c.bf16 %v3891_v48, %v3891_v48 }
0x1b45   :  { %6588 = vmatpush3.bf16.xpose.msra.mxu1 %v3988_v51 }
0x1b46   :  { %6593 = vmatprep.subr.bf16.mxu1 %v6990_v0  ;;  %v4034_v60 = vsel %vm479_vm5, %v3981_v6, 0  ;;  %v6837_v6 = vld [vmem:[%s8372_s7 + $0xf8] sm:$0xff]  }
0x1b47   :  { %6582 = vmatpush3.bf16.msra.mxu0 %v6829_v50 }
0x1b48   :  { %6599 = vmatprep.subr.bf16.mxu0 %v6990_v0 }
0x1b4a   :  { %6584 = vmatmul.mubr.msk.bf16.vlgmr.msra.gmra.mrb[104].mxu0 %vm266_vm4, %v7767_v31 }
0x1b4b   :  { %6601 = vmatprep.mubr.msk.bf16.mxu0 %vm6991_vm1, %v6990_v0 }
0x1bfd   :  { %v3673_v52 = vpop.f32.mrb[96].mxu0 }
0x1bfe   :  { %v8008_v53 = vadd.f32 %v3723_v13, %v3673_v52  ;;  %v6543_v54 = vpop.f32.mrb[97].mxu0 }
0x1bff   :  { %v3676_v56 = vpop.f32.mrb[98].mxu0  ;;  %v6830_v54 = vld [vmem:[%s8367_s27 + $0xe0] sm:$0xff]  }
0x1c00   :  { %v8010_v57 = vadd.f32 %v3726_v36, %v3676_v56  ;;  %v6544_v58 = vpop.f32.mrb[99].mxu0 }
0x1c01   :  { %v6831_v58 = vld [vmem:[%s8367_s27 + $0xe8] sm:$0xff]  }
0x1c0d   :  { %v3805_v63 = vpop.f32.mrb[100].mxu0 }
0x1c0e   :  { %v3806_v3 = vadd.f32 %v5699_v62, %v3805_v63  ;;  %v6561_v4 = vpop.f32.mrb[101].mxu0  ;;  %v6833_v63 = vld [vmem:[%s8367_s27 + $0xf8] sm:$0xff]  }
0x1c0f   :  { %v3808_v5 = vpop.f32.mrb[102].mxu0  ;;  %v6835_v4 = vld [vmem:[%s8372_s7 + $0xe8] sm:$0xff]  }
0x1c10   :  { %v3976_v7 = vmul.f32 0.25, %v3806_v3  ;;  %v6562_v8 = vpop.f32.mrb[103].mxu0  ;;  %v3809_v59 = vadd.f32 %v5699_v62, %v3808_v5  ;;  %v6832_v62 = vld [vmem:[%s8367_s27 + $0xf0] sm:$0xff]   ;;  %v6834_v3 = vld [vmem:[%s8372_s7 + $0xe0] sm:$0xff]  }
0x1c11   :  { %v6836_v5 = vld [vmem:[%s8372_s7 + $0xf0] sm:$0xff]  }
0x1c12   :  { %v3978_v55 = vpack.c.bf16 %v3976_v7, %v3976_v7  ;;  %v3977_v9 = vmul.f32 0.25, %v3809_v59  ;;  %v6838_v7 = vld [vmem:[%s8330_s12 + $0x30] sm:$0xff]  }
0x1c14   :  { %6590 = vmatmul.mubr.msk.bf16.vlgmr.msra.gmra.mrb[112].mxu1 %vm479_vm5, %v3978_v55  ;;  %v3979_v10 = vpack.c.bf16 %v3977_v9, %v3977_v9 }
0x1c15   :  { %6594 = vmatpush3.bf16.xpose.msra.mxu1 %v4034_v60  ;;  %6595 = vmatprep.mubr.msk.bf16.mxu1 %vm6991_vm1, %v6990_v0 }
0x1c16   :  { %6605 = vmatprep.subr.bf16.mxu1 %v6990_v0 }
0x1c1c   :  { %6596 = vmatmul.mubr.msk.bf16.vlgmr.msra.gmra.mrb[116].mxu1 %vm479_vm5, %v3979_v10  ;;  %v6839_v10 = vld [vmem:[%s8369_s9 + $0xe0] sm:$0xff]  }
0x1c1d   :  { %v3969_v12 = vpop.f32.mrb[104].mxu0  ;;  %6607 = vmatprep.mubr.msk.bf16.mxu1 %vm6991_vm1, %v6990_v0 }
0x1c1e   :  { %v3970_v38 = vadd.f32 %v5729_v11, %v3969_v12  ;;  %v6585_v14 = vpop.f32.mrb[105].mxu0 }
0x1c1f   :  { %v3972_v15 = vpop.f32.mrb[106].mxu0 }
0x1c20   :  { %v3982_v61 = vpack.c.bf16 %v3970_v38, %v3970_v38  ;;  %v3973_v1 = vadd.f32 %v5729_v11, %v3972_v15  ;;  %v6586_v2 = vpop.f32.mrb[107].mxu0  ;;  %v6840_v15 = vld [vmem:[%s8369_s9 + $0xe8] sm:$0xff]  }
0x1c22   :  { %v4104_v17 = vsel %vm600_vm6, %v3982_v61, 0  ;;  %v3983_v18 = vpack.c.bf16 %v3973_v1, %v3973_v1  ;;  %v6841_v61 = vld [vmem:[%s8369_s9 + $0xf0] sm:$0xff]   ;;  %v6842_v1 = vld [vmem:[%s8369_s9 + $0xf8] sm:$0xff]  }
0x1c23   :  { %6600 = vmatpush3.bf16.msra.mxu0 %v4104_v17 }
0x1c24   :  { %v4150_v19 = vsel %vm600_vm6, %v3983_v18, 0  ;;  %6611 = vmatprep.subr.bf16.mxu0 %v6990_v0 }
0x1c25   :  { %6606 = vmatpush3.bf16.msra.mxu1 %v4150_v19 }
0x1c26   :  { %6617 = vmatprep.subr.bf16.mxu1 %v6990_v0 }
0x1ce7   :  { %v4024_v20 = vpop.f32.mrb[112].mxu1 }
0x1ce8   :  { %v6591_v21 = vpop.f32.mrb[113].mxu1  ;;  %v4076_v22 = vsel %vm572_vm7, %v4024_v20, -inf }
0x1ce9   :  { %4077 = vmax.xlane.f32.xlu0 %v4076_v22  ;;  %v4027_v23 = vpop.f32.mrb[114].mxu1 }
0x1cea   :  { %v6592_v25 = vpop.f32.mrb[115].mxu1 }
0x1cef   :  { %v4070_v45 = vpop.f32.mrb[116].mxu1 }
0x1cf0   :  { %v6597_v27 = vpop.f32.mrb[117].mxu1  ;;  %v4079_v13 = vsel %vm572_vm7, %v4070_v45, -inf }
0x1cf1   :  { %4080 = vmax.xlane.f32.xlu1 %v4079_v13  ;;  %v4073_v16 = vpop.f32.mrb[118].mxu1 }
0x1cf2   :  { %v6598_v35 = vpop.f32.mrb[119].mxu1 }
0x1d76   :  { %v4078_v36 = vpop.xlane.xlu0 %4077 }
0x1d77   :  { %v4082_v30 = vsub.f32 %v4024_v20, %v4078_v36  ;;  %v5782_v20 = vld [vmem:[%s8329_s11 + $0x7] ss:$0 sm:$0xff] }
0x1d79   :  { %v4084_v32 = vmul.f32 1.442695, %v4082_v30 }
0x1d7b   :  { %6934 = vpow2.f32 %v4084_v32 }
0x1d7e   :  { %v4081_v33 = vpop.xlane.xlu1 %4080 }
0x1d7f   :  { %v4083_v34 = vsub.f32 %v4070_v45, %v4081_v33 }
0x1d81   :  { %v4086_v37 = vmul.f32 1.442695, %v4083_v34  ;;  %v5767_v34 = vld [vmem:[%s8373_s10 + $0x7] ss:$0 sm:$0xff] }
0x1d83   :  { %6936 = vpow2.f32 %v4086_v37  ;;  %v5752_v37 = vld [vmem:[%s8374_s3 + $0x7] ss:$0 sm:$0xff] }
0x1d85   :  { %v6935_v40 = vpop.eup %6934 }
0x1d86   :  { %v4088_v41 = vsel %vm572_vm7, %v6935_v40, 0.0 }
0x1d87   :  { %4089 = vadd.xlane.f32.xlu0 %v4088_v41 }
0x1d8d   :  { %v6937_v43 = vpop.eup %6936 }
0x1d8e   :  { %v4091_v44 = vsel %vm572_vm7, %v6937_v43, 0.0 }
0x1d8f   :  { %4092 = vadd.xlane.f32.xlu1 %v4091_v44 }
0x1e14   :  { %v4090_v46 = vpop.xlane.xlu0 %4089 }
0x1e15   :  { %6938 = vrcp.f32 %v4090_v46 }
0x1e1c   :  { %v4093_v47 = vpop.xlane.xlu1 %4092 }
0x1e1d   :  { %6940 = vrcp.f32 %v4093_v47 }
0x1e1f   :  { %v6939_v48 = vpop.eup %6938 }
0x1e20   :  { %v4096_v49 = vmul.f32 %v6939_v48, %v6935_v40 }
0x1e22   :  { %v4098_v50 = vpack.c.bf16 %v4096_v49, %v4096_v49 }
0x1e24   :  { %6602 = vmatmul.mubr.msk.bf16.vlgmr.msra.gmra.mrb[108].mxu0 %vm572_vm7, %v4098_v50 }
0x1e25   :  { %6613 = vmatprep.mubr.msk.bf16.mxu0 %vm6991_vm1, %v6990_v0  ;;  %6612 = vmatpush3.bf16.msra.mxu0 %v6838_v7 }
0x1e26   :  { %6629 = vmatprep.subr.bf16.mxu0 %v6990_v0 }
0x1e27   :  { %v6941_v51 = vpop.eup %6940 }
0x1e28   :  { %v4097_v52 = vmul.f32 %v6941_v51, %v6937_v43 }
0x1e2a   :  { %v4099_v56 = vpack.c.bf16 %v4097_v52, %v4097_v52 }
0x1e2c   :  { %6608 = vmatmul.mubr.msk.bf16.vlgmr.msra.gmra.mrb[120].mxu1 %vm572_vm7, %v4099_v56 }
0x1e2d   :  { %6618 = vmatpush3.bf16.msra.mxu1 %v6830_v54  ;;  %6625 = vmatprep.mubr.msk.bf16.mxu1 %vm6991_vm1, %v6990_v0 }
0x1e2e   :  { %6619 = vmatprep.subr.bf16.mxu1 %v6990_v0 }
0x1e31   :  { %6620 = vmatpush3.bf16.msra.mxu1 %v6831_v58 }
0x1e32   :  { %6621 = vmatprep.subr.bf16.mxu1 %v6990_v0 }
0x1e35   :  { %6622 = vmatpush3.bf16.msra.mxu1 %v6832_v62 }
0x1e36   :  { %6623 = vmatprep.subr.bf16.mxu1 %v6990_v0 }
0x1e39   :  { %6624 = vmatpush3.bf16.msra.mxu1 %v6833_v63 }
0x1e3a   :  { %6641 = vmatprep.subr.bf16.mxu1 %v6990_v0 }
0x1e3c   :  { %6626 = vmatmul.mubr.msk.bf16.vlgmr.msra.gmra.mrb[124].mxu1 %vm266_vm4, %v7767_v31 }
0x1e3d   :  { %6642 = vmatpush3.bf16.msra.mxu1 %v6834_v3  ;;  %6649 = vmatprep.mubr.msk.bf16.mxu1 %vm6991_vm1, %v6990_v0 }
0x1e3e   :  { %6643 = vmatprep.subr.bf16.mxu1 %v6990_v0 }
0x1e41   :  { %6644 = vmatpush3.bf16.msra.mxu1 %v6835_v4 }
0x1e42   :  { %6645 = vmatprep.subr.bf16.mxu1 %v6990_v0 }
0x1e45   :  { %6646 = vmatpush3.bf16.msra.mxu1 %v6836_v5 }
0x1e46   :  { %6647 = vmatprep.subr.bf16.mxu1 %v6990_v0 }
0x1e49   :  { %6648 = vmatpush3.bf16.msra.mxu1 %v6837_v6 }
0x1e4a   :  { %6665 = vmatprep.subr.bf16.mxu1 %v6990_v0 }
0x1e4c   :  { %6650 = vmatmul.mubr.msk.bf16.vlgmr.msra.gmra.mrb[128].mxu1 %vm266_vm4, %v7767_v31 }
0x1e4d   :  { %6667 = vmatprep.mubr.msk.bf16.mxu1 %vm6991_vm1, %v6990_v0 }
0x1ef7   :  { %v4140_v8 = vpop.f32.mrb[108].mxu0 }
0x1ef8   :  { %v6603_v55 = vpop.f32.mrb[109].mxu0 }
0x1ef9   :  { %v4143_v59 = vpop.f32.mrb[110].mxu0 }
0x1efa   :  { %v6604_v60 = vpop.f32.mrb[111].mxu0 }
0x1eff   :  { %v4186_v9 = vpop.f32.mrb[120].mxu1 }
0x1f00   :  { %v4195_v11 = vpack.c.bf16 %v4186_v9, %v4140_v8  ;;  %v6609_v12 = vpop.f32.mrb[121].mxu1 }
0x1f01   :  { %v4189_v38 = vpop.f32.mrb[122].mxu1 }
0x1f02   :  { %v6610_v14 = vpop.f32.mrb[123].mxu1  ;;  %6614 = vmatmul.mubr.msk.bf16.vlgmr.msra.gmra.mrb[112].mxu0 %vm479_vm5, %v4195_v11 }
0x1f03   :  { %6630 = vmatpush3.bf16.msra.mxu0 %v6839_v10  ;;  %6637 = vmatprep.mubr.msk.bf16.mxu0 %vm6991_vm1, %v6990_v0 }
0x1f04   :  { %6631 = vmatprep.subr.bf16.mxu0 %v6990_v0 }
0x1f07   :  { %6632 = vmatpush3.bf16.msra.mxu0 %v6840_v15 }
0x1f08   :  { %6633 = vmatprep.subr.bf16.mxu0 %v6990_v0 }
0x1f0b   :  { %6634 = vmatpush3.bf16.msra.mxu0 %v6841_v61 }
0x1f0c   :  { %6635 = vmatprep.subr.bf16.mxu0 %v6990_v0 }
0x1f0f   :  { %v4323_v2 = vpop.f32.mrb[124].mxu1  ;;  %6636 = vmatpush3.bf16.msra.mxu0 %v6842_v1 }
0x1f10   :  { %v6627_v17 = vpop.f32.mrb[125].mxu1  ;;  %6653 = vmatprep.subr.bf16.mxu0 %v6990_v0 }
0x1f11   :  { %v4326_v18 = vpop.f32.mrb[126].mxu1 }
0x1f12   :  { %v6628_v19 = vpop.f32.mrb[127].mxu1  ;;  %6638 = vmatmul.mubr.msk.bf16.vlgmr.msra.gmra.mrb[116].mxu0 %vm266_vm4, %v7767_v31  ;;  %v4327_v52 = vadd.f32 %v5752_v37, %v4326_v18 }
0x1f13   :  { %6655 = vmatprep.mubr.msk.bf16.mxu0 %vm6991_vm1, %v6990_v0 }
0x1f14   :  { %v4495_v56 = vmul.f32 0.25, %v4327_v52 }
0x1f16   :  { %v4497_v62 = vpack.c.bf16 %v4495_v56, %v4495_v56  ;;  %v6844_v56 = vld [vmem:[%s8334_s16 + $0x40] ss:$8 sps:$4 sm:$0xff]  }
0x1f1f   :  { %v4487_v21 = vpop.f32.mrb[128].mxu1 }
0x1f20   :  { %v4488_v22 = vadd.f32 %v5782_v20, %v4487_v21  ;;  %v6651_v23 = vpop.f32.mrb[129].mxu1 }
0x1f21   :  { %v4490_v25 = vpop.f32.mrb[130].mxu1 }
0x1f22   :  { %v4500_v45 = vpack.c.bf16 %v4488_v22, %v4488_v22  ;;  %v4491_v27 = vadd.f32 %v5782_v20, %v4490_v25  ;;  %v6652_v13 = vpop.f32.mrb[131].mxu1 }
0x1f24   :  { %v4622_v16 = vsel %vm600_vm6, %v4500_v45, 0  ;;  %v4501_v58 = vpack.c.bf16 %v4491_v27, %v4491_v27  ;;  %v6843_v27 = vld [vmem:[%s8330_s12 + $0x38] sm:$0xff]  }
0x1f25   :  { %6666 = vmatpush3.bf16.msra.mxu1 %v4622_v16 }
0x1f26   :  { %6677 = vmatprep.subr.bf16.mxu1 %v6990_v0  ;;  %v4668_v63 = vsel %vm600_vm6, %v4501_v58, 0  ;;  %v6849_v58 = vld [vmem:[%s8334_s16 + $0x54] ss:$8 sps:$4 sm:$0xff]  }
0x1fd5   :  { %v4239_v31 = vpop.f32.mrb[112].mxu0 }
0x1fd6   :  { %v8113_v35 = vadd.f32 %v4239_v31, %v8008_v53  ;;  %v6615_v36 = vpop.f32.mrb[113].mxu0  ;;  %v4324_v53 = vadd.f32 %v5752_v37, %v4323_v2 }
0x1fd7   :  { %v4242_v30 = vpop.f32.mrb[114].mxu0 }
0x1fd8   :  { %v8116_v32 = vadd.f32 %v4242_v30, %v8010_v57  ;;  %v6616_v33 = vpop.f32.mrb[115].mxu0  ;;  %v4494_v49 = vmul.f32 0.25, %v4324_v53 }
0x1fda   :  { %v4496_v51 = vpack.c.bf16 %v4494_v49, %v4494_v49 }
0x1fe5   :  { %v4405_v40 = vpop.f32.mrb[116].mxu0 }
0x1fe6   :  { %v4406_v41 = vadd.f32 %v5767_v34, %v4405_v40  ;;  %v6639_v43 = vpop.f32.mrb[117].mxu0 }
0x1fe7   :  { %v4408_v44 = vpop.f32.mrb[118].mxu0 }
0x1fe8   :  { %v4498_v46 = vpack.c.bf16 %v4406_v41, %v4406_v41  ;;  %v6640_v47 = vpop.f32.mrb[119].mxu0  ;;  %v4409_v57 = vadd.f32 %v5767_v34, %v4408_v44 }
0x1fea   :  { %v4506_v48 = vsel %vm479_vm5, %v4498_v46, 0  ;;  %v4499_v50 = vpack.c.bf16 %v4409_v57, %v4409_v57 }
0x1feb   :  { %6654 = vmatpush3.bf16.xpose.msra.mxu0 %v4506_v48 }
0x1fec   :  { %6659 = vmatprep.subr.bf16.mxu0 %v6990_v0  ;;  %v4552_v54 = vsel %vm479_vm5, %v4499_v50, 0 }
0x1ff2   :  { %6656 = vmatmul.mubr.msk.bf16.vlgmr.msra.gmra.mrb[120].mxu0 %vm479_vm5, %v4496_v51 }
0x1ff3   :  { %6660 = vmatpush3.bf16.xpose.msra.mxu0 %v4552_v54  ;;  %6661 = vmatprep.mubr.msk.bf16.mxu0 %vm6991_vm1, %v6990_v0  ;;  %v6846_v54 = vld [vmem:[%s8334_s16 + $0x44] ss:$8 sps:$4 sm:$0xff]  }
0x1ff4   :  { %6671 = vmatprep.subr.bf16.mxu0 %v6990_v0 }
0x1ffa   :  { %6662 = vmatmul.mubr.msk.bf16.vlgmr.msra.gmra.mrb[124].mxu0 %vm479_vm5, %v4497_v62  ;;  %v6847_v62 = vld [vmem:[%s8334_s16 + $0x50] ss:$8 sps:$4 sm:$0xff]  }
0x1ffb   :  { %6672 = vmatpush3.bf16.msra.mxu0 %v4668_v63  ;;  %6673 = vmatprep.mubr.msk.bf16.mxu0 %vm6991_vm1, %v6990_v0  ;;  %v6852_v63 = vld [vmem:[%s8334_s16 + $0x64] ss:$8 sps:$4 sm:$0xff]  }
0x1ffc   :  { %4894 = vmatprep.subr.bf16.mxu0 %v6846_v54 }
0x20c5   :  { %v4542_v3 = vpop.f32.mrb[120].mxu0 }
0x20c6   :  { %v6657_v4 = vpop.f32.mrb[121].mxu0  ;;  %v4594_v5 = vsel %vm572_vm7, %v4542_v3, -inf }
0x20c7   :  { %4595 = vmax.xlane.f32.xlu0 %v4594_v5  ;;  %v4545_v6 = vpop.f32.mrb[122].mxu0  ;;  %v6855_v4 = vld [vmem:[%s8334_s16 + $0x74] ss:$8 sps:$4 sm:$0xff]   ;;  %v6853_v5 = vld [vmem:[%s8334_s16 + $0x70] ss:$8 sps:$4 sm:$0xff]  }
0x20c8   :  { %v6658_v7 = vpop.f32.mrb[123].mxu0  ;;  %v6856_v6 = vld [vmem:[%s8336_s18 + $0xc0] sm:$0xff]  }
0x20c9   :  { %v6857_v7 = vld [vmem:[%s8336_s18 + $0x80] sm:$0xff]  }
0x20cd   :  { %v4588_v8 = vpop.f32.mrb[124].mxu0 }
0x20ce   :  { %v6663_v55 = vpop.f32.mrb[125].mxu0  ;;  %v4597_v59 = vsel %vm572_vm7, %v4588_v8, -inf }
0x20cf   :  { %4598 = vmax.xlane.f32.xlu1 %v4597_v59  ;;  %v4591_v60 = vpop.f32.mrb[126].mxu0  ;;  %v6859_v55 = vld [vmem:[%s8336_s18 + $0x88] sm:$0xff]   ;;  %v6860_v59 = vld [vmem:[%s8336_s18 + $0xd0] sm:$0xff]  }
0x20d0   :  { %v6664_v9 = vpop.f32.mrb[127].mxu0  ;;  %v6861_v60 = vld [vmem:[%s8336_s18 + $0x90] sm:$0xff]  }
0x20d1   :  { %v6862_v9 = vld [vmem:[%s8336_s18 + $0xd8] sm:$0xff]  }
0x2154   :  { %v4596_v10 = vpop.xlane.xlu0 %4595 }
0x2155   :  { %v4600_v11 = vsub.f32 %v4542_v3, %v4596_v10  ;;  %v6850_v3 = vld [vmem:[%s8334_s16 + $0x60] ss:$8 sps:$4 sm:$0xff]   ;;  %v6863_v10 = vld [vmem:[%s8336_s18 + $0x98] sm:$0xff]  }
0x2157   :  { %v4602_v12 = vmul.f32 1.442695, %v4600_v11  ;;  %v6864_v11 = vld [vmem:[%s8336_s18 + $0xe0] sm:$0xff]  }
0x2159   :  { %6942 = vpow2.f32 %v4602_v12  ;;  %v6865_v12 = vld [vmem:[%s8336_s18 + $0xa0] sm:$0xff]  }
0x215c   :  { %v4599_v38 = vpop.xlane.xlu1 %4598 }
0x215d   :  { %v4601_v14 = vsub.f32 %v4588_v8, %v4599_v38  ;;  %v6858_v8 = vld [vmem:[%s8336_s18 + $0xc8] sm:$0xff]  }
0x215e   :  { %v6866_v38 = vld [vmem:[%s8336_s18 + $0xe8] sm:$0xff]  }
0x215f   :  { %v4604_v15 = vmul.f32 1.442695, %v4601_v14 }
0x2161   :  { %6944 = vpow2.f32 %v4604_v15 }
0x2163   :  { %v6943_v61 = vpop.eup %6942 }
0x2164   :  { %v4606_v1 = vsel %vm572_vm7, %v6943_v61, 0.0 }
0x2165   :  { %4607 = vadd.xlane.f32.xlu0 %v4606_v1 }
0x216b   :  { %v6945_v2 = vpop.eup %6944 }
0x216c   :  { %v4609_v17 = vsel %vm572_vm7, %v6945_v2, 0.0 }
0x216d   :  { %4610 = vadd.xlane.f32.xlu1 %v4609_v17 }
0x21f2   :  { %v4608_v18 = vpop.xlane.xlu0 %4607 }
0x21f3   :  { %6946 = vrcp.f32 %v4608_v18 }
0x21fa   :  { %v4611_v19 = vpop.xlane.xlu1 %4610 }
0x21fb   :  { %6948 = vrcp.f32 %v4611_v19 }
0x21fd   :  { %v6947_v20 = vpop.eup %6946 }
0x21fe   :  { %v4614_v21 = vmul.f32 %v6947_v20, %v6943_v61 }
0x2200   :  { %v4616_v22 = vpack.c.bf16 %v4614_v21, %v4614_v21 }
0x2202   :  { %6668 = vmatmul.mubr.msk.bf16.vlgmr.msra.gmra.mrb[132].mxu1 %vm572_vm7, %v4616_v22 }
0x2203   :  { %6679 = vmatprep.mubr.msk.bf16.mxu1 %vm6991_vm1, %v6990_v0  ;;  %6678 = vmatpush3.bf16.msra.mxu1 %v6843_v27 }
0x2204   :  { %6111 = vmatprep.subr.bf16.mxu1 %v6856_v6 }
0x2205   :  { %v6949_v23 = vpop.eup %6948 }
0x2206   :  { %v4615_v25 = vmul.f32 %v6949_v23, %v6945_v2 }
0x2208   :  { %v4617_v45 = vpack.c.bf16 %v4615_v25, %v4615_v25 }
0x220a   :  { %6674 = vmatmul.mubr.msk.bf16.vlgmr.msra.gmra.mrb[128].mxu0 %vm572_vm7, %v4617_v45 }
0x220b   :  { %4926 = vmatprep.mubr.bf16.mxu0 %v6992_v39  ;;  %v5797_v39 = vld [vmem:[%s8331_s13 + $0x1] ss:$0 sm:$0xff]  ;;  %4895 = vmatpush1.bf16.msra.mxu0 %v6844_v56 }
0x220c   :  { %4896 = vmatprep.subr.bf16.mxu0 %v6849_v58 }
0x220f   :  { %4897 = vmatpush1.bf16.msra.mxu0 %v6847_v62 }
0x2210   :  { %4898 = vmatprep.subr.bf16.mxu0 %v6852_v63 }
0x2213   :  { %4899 = vmatpush1.bf16.msra.mxu0 %v6850_v3 }
0x2214   :  { %4900 = vmatprep.subr.bf16.mxu0 %v6855_v4 }
0x2217   :  { %4901 = vmatpush1.bf16.msra.mxu0 %v6853_v5 }
0x2218   :  { %6683 = vmatprep.subr.bf16.mxu0 %v6990_v0 }
0x22d5   :  { %v4658_v13 = vpop.f32.mrb[132].mxu1 }
0x22d6   :  { %v6669_v16 = vpop.f32.mrb[133].mxu1 }
0x22d7   :  { %v4661_v31 = vpop.f32.mrb[134].mxu1  ;;  %v5800_v16 = vld [vmem:[%s8332_s14 + $0x1] ss:$0 sm:$0xff] }
0x22d8   :  { %v6670_v36 = vpop.f32.mrb[135].mxu1 }
0x22dd   :  { %v4704_v30 = vpop.f32.mrb[128].mxu0 }
0x22de   :  { %v4713_v33 = vpack.c.bf16 %v4704_v30, %v4658_v13  ;;  %v6675_v34 = vpop.f32.mrb[129].mxu0 }
0x22df   :  { %v4707_v37 = vpop.f32.mrb[130].mxu0 }
0x22e0   :  { %v6676_v40 = vpop.f32.mrb[131].mxu0  ;;  %6680 = vmatmul.mubr.msk.bf16.vlgmr.msra.gmra.mrb[136].mxu1 %vm479_vm5, %v4713_v33  ;;  %v5801_v37 = vld [vmem:[%s8333_s15 + $0x1] ss:$0 sm:$0xff] }
0x22e1   :  { %6112 = vmatpush3.bf16.msra.mxu1 %v6857_v7 }
0x22e2   :  { %6113 = vmatprep.subr.bf16.mxu1 %v6858_v8 }
0x22e5   :  { %6114 = vmatpush3.bf16.msra.mxu1 %v6859_v55 }
0x22e6   :  { %6115 = vmatprep.subr.bf16.mxu1 %v6860_v59 }
0x22e9   :  { %6116 = vmatpush3.bf16.msra.mxu1 %v6861_v60 }
0x22ea   :  { %6117 = vmatprep.subr.bf16.mxu1 %v6862_v9 }
0x22ed   :  { %6118 = vmatpush3.bf16.msra.mxu1 %v6863_v10 }
0x22ee   :  { %6119 = vmatprep.subr.bf16.mxu1 %v6864_v11 }
0x22f1   :  { %6120 = vmatpush3.bf16.msra.mxu1 %v6865_v12 }
0x22f2   :  { %6121 = vmatprep.subr.bf16.mxu1 %v6866_v38 }
0x23b3   :  { %v4757_v41 = vpop.f32.mrb[136].mxu1 }
0x23b4   :  { %v4764_v43 = vadd.f32 %v4757_v41, %v8113_v35  ;;  %v6681_v44 = vpop.f32.mrb[137].mxu1 }
0x23b5   :  { %v4760_v53 = vpop.f32.mrb[138].mxu1  ;;  %v6867_v44 = vld [vmem:[%s8336_s18 + $0xa8] sm:$0xff]  }
0x23b6   :  { %v4774_v46 = vadd.f32 %v5797_v39, %v4764_v43  ;;  %v4765_v47 = vadd.f32 %v4760_v53, %v8116_v32  ;;  %v6682_v48 = vpop.f32.mrb[139].mxu1  ;;  %6122 = vmatpush3.bf16.msra.mxu1 %v6867_v44  ;;  %v6868_v53 = vld [vmem:[%s8336_s18 + $0xf0] sm:$0xff]  }
0x23b7   :  { %6123 = vmatprep.subr.bf16.mxu1 %v6868_v53  ;;  %v6871_v48 = vld [vmem:[%s8336_s18 + $0xb8] sm:$0xff]  }
0x23b8   :  { %v8154_v57 = vadd.f32 %v4774_v46, %v7758_v28  ;;  %v4775_v49 = vadd.f32 %v5797_v39, %v4765_v47  ;;  %v6869_v46 = vld [vmem:[%s8336_s18 + $0xb0] sm:$0xff]   ;;  %v6870_v47 = vld [vmem:[%s8336_s18 + $0xf8] sm:$0xff]  }
0x23ba   :  { %v8157_v50 = vadd.f32 %v4775_v49, %v7760_v29  ;;  %v4782_v51 = vsel %vm266_vm4, %v8154_v57, 0.0  ;;  %v4790_v52 = vmul.f32 %v8154_v57, %v8154_v57  ;;  %6124 = vmatpush3.bf16.msra.mxu1 %v6869_v46  ;;  %v5873_v46 = vld [vmem:[%s8339_s21 + $0x1] ss:$0 sm:$0xff] }
0x23bb   :  { %4783 = vadd.xlane.f32.xlu0 %v4782_v51  ;;  %6125 = vmatprep.subr.bf16.mxu1 %v6870_v47 }
0x23bc   :  { %v4785_v35 = vsel %vm266_vm4, %v8157_v50, 0.0  ;;  %v4791_v32 = vmul.f32 %v8157_v50, %v8157_v50  ;;  %v4792_v28 = vsel %vm266_vm4, %v4790_v52, 0.0 }
0x23bd   :  { %4786 = vadd.xlane.f32.xlu1 %v4785_v35 }
0x23be   :  { %v4795_v29 = vsel %vm266_vm4, %v4791_v32, 0.0  ;;  %6126 = vmatpush3.bf16.msra.mxu1 %v6871_v48 }
0x23bf   :  { %4793 = vadd.xlane.f32.xlu0 %v4792_v28 }
0x23c1   :  { %4796 = vadd.xlane.f32.xlu1 %v4795_v29 }
0x2448   :  { %v4784_v14 = vpop.xlane.xlu0 %4783 }
0x2449   :  { %v4788_v15 = vmul.f32 0.015625, %v4784_v14 }
0x244a   :  { %v4787_v61 = vpop.xlane.xlu1 %4786 }
0x244b   :  { %v4789_v1 = vmul.f32 0.015625, %v4787_v61  ;;  %v4800_v17 = vmul.f32 %v4788_v15, %v4788_v15  ;;  %v4804_v27 = vsub.f32 %v8154_v57, %v4788_v15  ;;  %v5810_v57 = vld [vmem:[%s8335_s17 + $0x2] sm:$0x3] }
0x244c   :  { %v4794_v2 = vpop.xlane.xlu0 %4793  ;;  %v4844_v49 = vrot.slane %v5810_v57, %v2368_v24 }
0x244d   :  { %v4798_v18 = vmul.f32 0.015625, %v4794_v2  ;;  %v4801_v20 = vmul.f32 %v4789_v1, %v4789_v1  ;;  %v4805_v31 = vsub.f32 %v8157_v50, %v4789_v1  ;;  %v4848_v50 = vrot.slane %v5810_v57, %v2372_v26  ;;  %v6872_v1 = vld [vmem:[%s8340_s22] sm:$0xff]   ;;  %v6873_v2 = vld [vmem:[%s8340_s22 + $0x8] sm:$0xff]  }
0x244e   :  { %v4797_v19 = vpop.xlane.xlu1 %4796 }
0x244f   :  { %v4802_v21 = vsub.f32 %v4798_v18, %v4800_v17  ;;  %v4799_v22 = vmul.f32 0.015625, %v4797_v19  ;;  %v6874_v17 = vld [vmem:[%s8340_s22 + $0x10] sm:$0xff]   ;;  %v6875_v18 = vld [vmem:[%s8340_s22 + $0x18] sm:$0xff]  }
0x2451   :  { %v4806_v23 = vadd.f32 1e-05, %v4802_v21  ;;  %v4803_v25 = vsub.f32 %v4799_v22, %v4801_v20 }
0x2453   :  { %6950 = vrsqrt.f32 %v4806_v23  ;;  %v4807_v45 = vadd.f32 1e-05, %v4803_v25 }
0x2455   :  { %6952 = vrsqrt.f32 %v4807_v45 }
0x245d   :  { %v6951_v13 = vpop.eup %6950 }
0x245e   :  { %v4810_v36 = vmul.f32 %v6951_v13, %v4804_v27 }
0x245f   :  { %v6953_v30 = vpop.eup %6952 }
0x2460   :  { %v4811_v33 = vmul.f32 %v6953_v30, %v4805_v31  ;;  %v4818_v34 = vmul.f32 %v5800_v16, %v4810_v36 }
0x2462   :  { %v4819_v40 = vmul.f32 %v5800_v16, %v4811_v33  ;;  %v4826_v41 = vadd.f32 %v5801_v37, %v4818_v34 }
0x2464   :  { %v4827_v39 = vadd.f32 %v5801_v37, %v4819_v40  ;;  %v5872_v40 = vld [vmem:[%s8338_s20 + $0x1] ss:$0 sm:$0xff] }
0x2466   :  { %v4837_v43 = vpack.c.bf16 %v4827_v39, %v4826_v41 }
0x2468   :  { %5819 = vmatmul.mubr.msk.bf16.vlgmr.msra.gmra.mrb[132].mxu0 %vm266_vm4, %v4837_v43 }
0x2469   :  { %6691 = vmatprep.mubr.msk.bf16.mxu0 %vm6991_vm1, %v6990_v0  ;;  %6684 = vmatpush3.bf16.msra.mxu0 %v6872_v1 }
0x246a   :  { %6685 = vmatprep.subr.bf16.mxu0 %v6990_v0 }
0x246d   :  { %6686 = vmatpush3.bf16.msra.mxu0 %v6873_v2 }
0x246e   :  { %6687 = vmatprep.subr.bf16.mxu0 %v6990_v0 }
0x2471   :  { %6688 = vmatpush3.bf16.msra.mxu0 %v6874_v17 }
0x2472   :  { %6689 = vmatprep.subr.bf16.mxu0 %v6990_v0 }
0x2475   :  { %6690 = vmatpush3.bf16.msra.mxu0 %v6875_v18 }
0x2476   :  { %6695 = vmatprep.subr.bf16.mxu0 %v6990_v0 }
0x253b   :  { %v4928_v51 = vpop.f32.mrb[132].mxu0 }
0x253c   :  { %v4929_v52 = vadd.f32 %v4928_v51, %v4844_v49  ;;  %v4930_v35 = vpop.f32.mrb[133].mxu0  ;;  %v6877_v51 = vld [vmem:[%s8342_s24 + $0x8] sm:$0xff]  }
0x253d   :  { %v4931_v32 = vadd.f32 %v4930_v35, %v4848_v50  ;;  %v4932_v28 = vpop.f32.mrb[134].mxu0 }
0x253e   :  { %v4933_v29 = vadd.f32 %v4932_v28, %v4844_v49  ;;  %v4934_v54 = vpop.f32.mrb[135].mxu0  ;;  %v4937_v58 = vmax.f32 %v4929_v52, 0.0  ;;  %v5874_v52 = vld [vmem:[%s8341_s23] ss:$0 sm:$0xff]  ;;  %s6993_s23 = smov [#allocation2]  }
0x253f   :  { %v4935_v56 = vadd.f32 %v4934_v54, %v4848_v50  ;;  %v4938_v63 = vmax.f32 %v4931_v32, 0.0  ;;  %v6876_v50 = vld [vmem:[%s8342_s24] sm:$0xff]   ;;  %s5352_s24 = sshll.u32 %s6993_s23, 4  ;;  %s5353_s24 = int_to_ptr.vmem [resolvable:$true] %s5352_s24 }
0x2540   :  { %v4939_v62 = vmax.f32 %v4933_v29, 0.0  ;;  %p6971_p1 = scmp.lt.s32.totalorder %s5353_s24, %s5353_s24 }
0x2541   :  { %v4940_v3 = vmax.f32 %v4935_v56, 0.0 }
0x2542   :  { %v4974_v4 = vpack.c.bf16 %v4939_v62, %v4937_v58 }
0x2543   :  { %v4975_v5 = vpack.c.bf16 %v4940_v3, %v4938_v63 }
0x2545   :  { %5112 = vmatprep.mubr.bf16.mxu1 %v4975_v5 }
0x2546   :  { %5113 = vmatmul.mubr.bf16.vlgmr.msra.gmra.mrb[140].mxu1 %v4974_v4 }
0x2619   :  { %v6127_v24 = vpop.f32.mrb[140].mxu1 }
0x261a   :  { %v6128_v26 = vpop.f32.mrb[141].mxu1 }
0x261b   :  { %v6129_v6 = vadd.f32 %v6128_v26, %v6127_v24  ;;  %v6130_v7 = vpop.f32.mrb[142].mxu1 }
0x261c   :  { %v6131_v8 = vpop.f32.mrb[143].mxu1 }
0x261d   :  { %v5115_v55 = vadd.f32 %v6129_v6, %v5853_v42  ;;  %v6132_v59 = vadd.f32 %v6131_v8, %v6130_v7 }
0x261f   :  { %v5121_v60 = vadd.f32 %v5115_v55, %v4826_v41  ;;  %v5118_v9 = vadd.f32 %v6132_v59, %v5853_v42 }
0x2621   :  { %v5122_v10 = vadd.f32 %v5118_v9, %v4827_v39  ;;  %v5127_v11 = vsel %vm266_vm4, %v5121_v60, 0.0  ;;  %v5135_v12 = vmul.f32 %v5121_v60, %v5121_v60 }
0x2622   :  { %5128 = vadd.xlane.f32.xlu0 %v5127_v11 }
0x2623   :  { %v5130_v38 = vsel %vm266_vm4, %v5122_v10, 0.0  ;;  %v5136_v14 = vmul.f32 %v5122_v10, %v5122_v10  ;;  %v5137_v15 = vsel %vm266_vm4, %v5135_v12, 0.0 }
0x2624   :  { %5131 = vadd.xlane.f32.xlu1 %v5130_v38 }
0x2625   :  { %v5140_v61 = vsel %vm266_vm4, %v5136_v14, 0.0 }
0x2626   :  { %5138 = vadd.xlane.f32.xlu0 %v5137_v15 }
0x2628   :  { %5141 = vadd.xlane.f32.xlu1 %v5140_v61 }
0x26af   :  { %v5129_v19 = vpop.xlane.xlu0 %5128 }
0x26b0   :  { %v5133_v20 = vmul.f32 0.015625, %v5129_v19 }
0x26b1   :  { %v5132_v21 = vpop.xlane.xlu1 %5131 }
0x26b2   :  { %v5134_v22 = vmul.f32 0.015625, %v5132_v21  ;;  %v5145_v25 = vmul.f32 %v5133_v20, %v5133_v20  ;;  %v5149_v34 = vsub.f32 %v5121_v60, %v5133_v20 }
0x26b3   :  { %v5139_v23 = vpop.xlane.xlu0 %5138 }
0x26b4   :  { %v5143_v45 = vmul.f32 0.015625, %v5139_v23  ;;  %v5146_v13 = vmul.f32 %v5134_v22, %v5134_v22  ;;  %v5150_v41 = vsub.f32 %v5122_v10, %v5134_v22 }
0x26b5   :  { %v5142_v27 = vpop.xlane.xlu1 %5141 }
0x26b6   :  { %v5147_v16 = vsub.f32 %v5143_v45, %v5145_v25  ;;  %v5144_v31 = vmul.f32 0.015625, %v5142_v27 }
0x26b8   :  { %v5151_v36 = vadd.f32 1e-05, %v5147_v16  ;;  %v5148_v30 = vsub.f32 %v5144_v31, %v5146_v13 }
0x26ba   :  { %6954 = vrsqrt.f32 %v5151_v36  ;;  %v5152_v33 = vadd.f32 1e-05, %v5148_v30 }
0x26bc   :  { %6956 = vrsqrt.f32 %v5152_v33 }
0x26c4   :  { %v6955_v37 = vpop.eup %6954 }
0x26c5   :  { %v5155_v39 = vmul.f32 %v6955_v37, %v5149_v34 }
0x26c6   :  { %v6957_v43 = vpop.eup %6956 }
0x26c7   :  { %v5156_v44 = vmul.f32 %v6957_v43, %v5150_v41  ;;  %v5163_v53 = vmul.f32 %v5872_v40, %v5155_v39 }
0x26c9   :  { %v5164_v47 = vmul.f32 %v5872_v40, %v5156_v44  ;;  %v5171_v48 = vadd.f32 %v5873_v46, %v5163_v53 }
0x26cb   :  { %v5172_v57 = vadd.f32 %v5873_v46, %v5164_v47 }
0x26cd   :  { %v5181_v49 = vpack.c.bf16 %v5172_v57, %v5171_v48 }
0x26cf   :  { %6692 = vmatmul.mubr.msk.bf16.vlgmr.msra.gmra.mrb[136].mxu0 %vm266_vm4, %v5181_v49 }
0x26d0   :  { %6699 = vmatprep.mubr.msk.bf16.mxu0 %vm6991_vm1, %v6990_v0  ;;  %6696 = vmatpush3.bf16.msra.mxu0 %v6876_v50 }
0x26d1   :  { %6697 = vmatprep.subr.bf16.mxu0 %v6990_v0  ;;  %v5880_v0 = vld [vmem:[%s8343_s25] ss:$0 sm:$0xff]  ;;  %s6966_s25 = scalar_lea.vmem %s5353_s24, 256 }
0x26d2   :  { %p6967_p0 = scmp.ne.s32.totalorder %s5353_s24, %s6966_s25  ;;  %p6972_p2 = scmp.lt.s32.totalorder %s6966_s25, %s6966_s25 }
0x26d4   :  { %6698 = vmatpush3.bf16.msra.mxu0 %v6877_v51  ;;  %p6973_p3 = por %p6972_p2, %p6971_p1 }
0x26d6   :  { %p6974_p4 = pnand %p6973_p3, %p6967_p0 }
0x27a2   :  { %v5250_v35 = vpop.f32.mrb[136].mxu0 }
0x27a3   :  { %v5251_v32 = vadd.f32 %v5874_v52, %v5250_v35  ;;  %v6693_v28 = vpop.f32.mrb[137].mxu0 }
0x27a4   :  { %v5253_v29 = vpop.f32.mrb[138].mxu0 }
0x27a5   :  { %v5254_v54 = vadd.f32 %v5874_v52, %v5253_v29  ;;  %v6694_v56 = vpop.f32.mrb[139].mxu0  ;;  %v5257_v58 = vmax.f32 %v5251_v32, 0.0 }
0x27a7   :  { %v5258_v62 = vmax.f32 %v5254_v54, 0.0 }
0x27a9   :  { %v5263_v63 = vpack.c.bf16 %v5258_v62, %v5257_v58 }
0x27ab   :  { %6700 = vmatmul.mubr.msk.bf16.vlgmr.msra.gmra.mrb[140].mxu0 %vm177_vm3, %v5263_v63 }
0x287e   :  { %v5320_v3 = vpop.f32.mrb[140].mxu0 }
0x287f   :  { %v5321_v4 = vadd.f32 %v5880_v0, %v5320_v3  ;;  %v6701_v5 = vpop.f32.mrb[141].mxu0 }
0x2880   :  { %v5323_v24 = vpop.f32.mrb[142].mxu0 }
0x2881   :  { %v5324_v42 = vadd.f32 %v5880_v0, %v5323_v24  ;;  %5327 = vmax.xlane.f32.xlu0 %v5321_v4  ;;  %v6702_v26 = vpop.f32.mrb[143].mxu0 }
0x2883   :  { %5329 = vmax.xlane.f32.xlu1 %v5324_v42 }
0x290e   :  { %v5328_v6 = vpop.xlane.xlu0 %5327 }
0x290f   :  { %v5331_v7 = vsub.f32 %v5321_v4, %v5328_v6 }
0x2910   :  { %v5330_v8 = vpop.xlane.xlu1 %5329 }
0x2911   :  { %v5333_v55 = vmul.f32 1.442695, %v5331_v7  ;;  %v5332_v59 = vsub.f32 %v5324_v42, %v5330_v8 }
0x2913   :  { %6958 = vpow2.f32 %v5333_v55  ;;  %v5335_v60 = vmul.f32 1.442695, %v5332_v59 }
0x2915   :  { %6960 = vpow2.f32 %v5335_v60 }
0x291d   :  { %v6959_v9 = vpop.eup %6958 }
0x291e   :  { %5337 = vadd.xlane.f32.xlu0 %v6959_v9 }
0x291f   :  { %v6961_v10 = vpop.eup %6960 }
0x2920   :  { %5339 = vadd.xlane.f32.xlu1 %v6961_v10 }
0x29ab   :  { %v5338_v11 = vpop.xlane.xlu0 %5337 }
0x29ac   :  { %6962 = vrcp.f32 %v5338_v11 }
0x29ad   :  { %v5340_v12 = vpop.xlane.xlu1 %5339 }
0x29ae   :  { %6964 = vrcp.f32 %v5340_v12 }
0x29b6   :  { %v6963_v38 = vpop.eup %6962 }
0x29b7   :  { %v5342_v14 = vmul.f32 %v6963_v38, %v6959_v9 }
0x29b8   :  { %v6965_v15 = vpop.eup %6964 }
0x29b9   :  { %v5344_v61 = vmul.f32 %v6965_v15, %v6961_v10  ;;  %5345 = vst [vmem:[#allocation2] sm:$0xff] %v5342_v14 }
0x29bb   :  { %5346 = vst [vmem:[#allocation2 + $0x8] sm:$0xff] %v5344_v61 }
0x29bc   :  { %6977 = shalt.err (!%p6974_p4)
}
0x29bd   :  { %s6978_s9 = scalar_lea.hbm %s8344_s26, 256 }
0x29be   :  { %p6979_p5 = scmp.ne.s32.totalorder %s8344_s26, %s6978_s9  ;;  %p6982_p6 = scmp.lt.u32.totalorder %s6978_s9, %s8344_s26 }
0x29c0   :  { %p6984_p7 = pnand %p6982_p6, %p6979_p5 }
0x29c2   :  { %6987 = shalt.err (!%p6984_p7)
}
0x29c3   :  { %s6994_s19 = smov 128   ;;  %s6995_s10 = smov 8  }
0x29c4   :  { %5358 = dma.vmem_to_hbm [thread:$0]  %s5353_s24, 256, %s8344_s26, [#allocation3], %s6994_s19, %s6994_s19, %s6995_s10  }
0x29c5   :  { %6988 = dma.done.wait [#allocation3], 256  }
0x29c6   :  { %6989 = vsyncadd [#allocation3], 4294967040 }
0x29c7   :  { %5362 = vsyncpa [#allocation3], 1 }

</bundles_post_ra>
